<compile_context>
chip_gen: v7x
topology: tpu7x:2x2x1
jax: 0.10.0
libtpu: 0.0.40
codegen_flags: <defaults>
</compile_context>

<pallas_src>
import functools
import math

import jax
import jax.numpy as jnp
from jax.experimental import pallas as pl
from jax.experimental.pallas import tpu as pltpu


# fc1(8->60) tanh, fc2(60->300) lrelu, fc3(300->800) lrelu, fc4(800->800) lrelu,
# fc5(800->400) lrelu, fc6(400->30) lrelu (fin_relu), fin(30->2)
LAYER_DIMS = [8, 60, 300, 800, 800, 400, 30, 2]
LEAKY_SLOPE = 0.01  # nn.LeakyReLU default
IN_FEATURES = LAYER_DIMS[0]    # 8
OUT_FEATURES = LAYER_DIMS[-1]  # 2


def _pad_to(n, m):
    return ((n + m - 1) // m) * m


# Lane-padded feature widths. fc1 keeps its real contraction dim K=8 (the block
# covers the full array dim, so no 128-padding is needed on the input side).
PADDED_DIMS = [_pad_to(d, 128) for d in LAYER_DIMS]
K_DIMS = [IN_FEATURES] + PADDED_DIMS[1:-1]   # per-layer padded contraction dim
N_DIMS = PADDED_DIMS[1:]                     # per-layer padded output dim


def mlp_kernel(x_ref, *refs):
    """Whole MLP for one batch tile: 7 chained MXU matmuls + VPU/EUP activations.

    Weights are bf16 (MXU-native input); activations / bias / accumulation f32.
    """
    out_ref = refs[-1]
    wb_refs = refs[:-1]
    n_layers = len(wb_refs) // 2

    h = x_ref[...]  # f32 (TM, 8)
    for i in range(n_layers):
        w = wb_refs[2 * i][...]          # bf16 (K, N_p)
        b = wb_refs[2 * i + 1][...]      # f32  (1, N_p)
        h = jnp.dot(h.astype(w.dtype), w, preferred_element_type=jnp.float32) + b
        if i == 0:
            h = jnp.tanh(h)                              # tanh1 (EUP)
        elif i < n_layers - 1:
            h = jnp.where(h > 0, h, LEAKY_SLOPE * h)     # LeakyReLU (incl. fin_relu)
        # final layer (fin): no activation
    # Store only the 2 real output columns (64x less writeback than 128 lanes).
    out_ref[...] = h[:, :OUT_FEATURES].astype(out_ref.dtype)


def make_params(key):
    """Deterministic xavier-uniform weights (like torch.nn.init.xavier_uniform_)
    and PyTorch-default uniform biases. Weights returned as (in, out)."""
    params = []
    for i in range(len(LAYER_DIMS) - 1):
        fan_in, fan_out = LAYER_DIMS[i], LAYER_DIMS[i + 1]
        key, wk, bk = jax.random.split(key, 3)
        w_bound = math.sqrt(6.0 / (fan_in + fan_out))
        w = jax.random.uniform(wk, (fan_in, fan_out), jnp.float32, -w_bound, w_bound)
        b_bound = 1.0 / math.sqrt(fan_in)
        b = jax.random.uniform(bk, (fan_out,), jnp.float32, -b_bound, b_bound)
        params.append((w, b))
    return params


def prepare_params(params, weight_dtype=jnp.bfloat16):
    """One-time: zero-pad weights/biases to (8,128)-friendly shapes.

    Zero padding is activation-safe: tanh(0)=0, leaky_relu(0)=0, padded bias
    lanes are 0, so padded lanes stay exactly 0 through the whole network.
    Weights are cast to bf16 (halves weight DMA); biases stay f32.
    Pass weight_dtype=jnp.float32 if bit-level parity with the torch module
    matters more than DMA bandwidth.
    """
    padded = []
    for i, (w, b) in enumerate(params):
        kp, np_ = K_DIMS[i], N_DIMS[i]
        wp = (
            jnp.zeros((kp, np_), weight_dtype)
            .at[: LAYER_DIMS[i], : LAYER_DIMS[i + 1]]
            .set(w.astype(weight_dtype))
        )
        bp = (
            jnp.zeros((1, np_), jnp.float32)
            .at[0, : LAYER_DIMS[i + 1]]
            .set(b.astype(jnp.float32))
        )
        padded += [wp, bp]
    return tuple(jax.device_put(a) for a in padded)


def _choose_batch_tiling(batch, tm_max, split_threshold):
    """Rows-per-tile (multiple of 8) and padded batch, sized from B."""
    if batch <= split_threshold:
        tm = _pad_to(max(batch, 8), 8)       # single exact tile (weight-DMA bound)
        return tm, tm
    # >=2 near-equal tiles: keeps both v7x TensorCores busy and caps padded-row
    # waste at <= 8 rows per tile. Extra grid steps are cheap (weights resident).
    n_tiles = max(2, pl.cdiv(batch, tm_max))
    tm = _pad_to(pl.cdiv(batch, n_tiles), 8)
    return tm, n_tiles * tm


@functools.partial(jax.jit, static_argnames=("tm_max", "split_threshold"))
def score_module_forward(padded_params, x_next, x_cur, x_prev, t, path_t,
                         *, tm_max=512, split_threshold=128):
    """Matches ScoreModule.forward: cat((x_cur, x_prev, x_next, path_t[:,None], t)) -> MLP."""
    B = x_cur.shape[0]
    y = jnp.full((B, 1), t, dtype=jnp.float32)
    x = jnp.concatenate(
        [x_cur.astype(jnp.float32),
         x_prev.astype(jnp.float32),
         x_next.astype(jnp.float32),
         path_t.astype(jnp.float32)[:, None],
         y],
        axis=1,
    )  # (B, 8)

    tm, Bp = _choose_batch_tiling(B, tm_max, split_threshold)
    # Only row padding (zero rows are safe: they never mix across rows and are
    # sliced off at the end). Feature dim stays 8 — no 128-lane inflation.
    xp = x if Bp == B else jnp.zeros((Bp, IN_FEATURES), jnp.float32).at[:B].set(x)

    in_specs = [pl.BlockSpec((tm, IN_FEATURES), lambda i: (i, 0))]
    for a in padded_params:
        # Constant block index -> weights/biases stay VMEM-resident across the
        # grid (no re-DMA per batch tile). pl.Buffered(1) would also drop the
        # unused second buffer (~3.5 MiB) but is left off for portability.
        in_specs.append(pl.BlockSpec(a.shape, lambda i: (0, 0)))

    weight_bytes = sum(int(a.size) * a.dtype.itemsize for a in padded_params)
    flops = 2 * Bp * sum(k * n for k, n in zip(K_DIMS, N_DIMS))
    cost = pl.CostEstimate(
        flops=flops,
        transcendentals=Bp * N_DIMS[0],  # tanh on the fc1 output tile
        bytes_accessed=weight_bytes + Bp * IN_FEATURES * 4 + Bp * OUT_FEATURES * 4,
    )

    out = pl.pallas_call(
        mlp_kernel,
        grid=(Bp // tm,),
        in_specs=in_specs,
        out_specs=pl.BlockSpec((tm, OUT_FEATURES), lambda i: (i, 0)),
        out_shape=jax.ShapeDtypeStruct((Bp, OUT_FEATURES), jnp.float32),
        compiler_params=pltpu.CompilerParams(
            dimension_semantics=("parallel",),   # batch tiles independent (v7x 2 TCs)
            vmem_limit_bytes=32 << 20,           # load-bearing on v5e (16 MiB default)
        ),
        cost_estimate=cost,
    )(xp, *padded_params)

    return out[:B]  # (B, 2)


def reference_forward(params, x_next, x_cur, x_prev, t, path_t,
                      weight_dtype=jnp.float32):
    """Pure-JAX reference. weight_dtype=bf16 mirrors the kernel's matmul dtype."""
    B = x_cur.shape[0]
    y = jnp.full((B, 1), t, dtype=jnp.float32)
    h = jnp.concatenate(
        [x_cur, x_prev, x_next, path_t[:, None], y], axis=1
    ).astype(jnp.float32)
    for i, (w, b) in enumerate(params):
        h = jnp.dot(h.astype(weight_dtype), w.astype(weight_dtype),
                    preferred_element_type=jnp.float32) + b
        if i == 0:
            h = jnp.tanh(h)
        elif i < len(params) - 1:
            h = jnp.where(h > 0, h, LEAKY_SLOPE * h)
    return h


if __name__ == "__main__":
    key = jax.random.PRNGKey(0)
    pkey, dkey = jax.random.split(key)

    params = make_params(pkey)
    padded_params = prepare_params(params)   # one-time padding + bf16 cast
    t = 0.5  # scalar, broadcast exactly like torch.tensor([t]).repeat(B, 1)

    # Small batch (single exact tile) and larger batch (2-tile "parallel" grid).
    for B in (2, 300):
        k1, k2, k3, k4 = jax.random.split(jax.random.fold_in(dkey, B), 4)
        x_cur = jax.random.normal(k1, (B, 2), jnp.float32)
        x_prev = jax.random.normal(k2, (B, 2), jnp.float32)
        x_next = jax.random.normal(k3, (B, 2), jnp.float32)
        path_t = jax.random.uniform(k4, (B,), jnp.float32)

        out = score_module_forward(padded_params, x_next, x_cur, x_prev, t, path_t)
        out = jax.block_until_ready(out)
        assert out.shape == (B, 2), out.shape

        # Tight check against a reference using the same bf16-weight matmul path.
        ref_bf16 = reference_forward(params, x_next, x_cur, x_prev, t, path_t,
                                     weight_dtype=jnp.bfloat16)
        assert jnp.allclose(out, ref_bf16, atol=1e-3, rtol=1e-3), (
            "bf16-path mismatch", float(jnp.abs(out - ref_bf16).max()))

        # Sanity check against the full-f32 reference (looser: bf16 weights).
        ref_f32 = reference_forward(params, x_next, x_cur, x_prev, t, path_t)
        assert jnp.allclose(out, ref_f32, atol=1e-1, rtol=1e-1), (
            "f32 sanity mismatch", float(jnp.abs(out - ref_f32).max()))

    print("KERNEL_OK")
</pallas_src>

<mosaic_0001>
module attributes {stable_mosaic.version = 11 : i64} {
  func.func @mlp_kernel(%arg0: i32, %arg1: memref<8x8xf32, #tpu.memory_space<vmem>>, %arg2: memref<8x128xbf16, #tpu.memory_space<vmem>>, %arg3: memref<1x128xf32, #tpu.memory_space<vmem>>, %arg4: memref<128x384xbf16, #tpu.memory_space<vmem>>, %arg5: memref<1x384xf32, #tpu.memory_space<vmem>>, %arg6: memref<384x896xbf16, #tpu.memory_space<vmem>>, %arg7: memref<1x896xf32, #tpu.memory_space<vmem>>, %arg8: memref<896x896xbf16, #tpu.memory_space<vmem>>, %arg9: memref<1x896xf32, #tpu.memory_space<vmem>>, %arg10: memref<896x512xbf16, #tpu.memory_space<vmem>>, %arg11: memref<1x512xf32, #tpu.memory_space<vmem>>, %arg12: memref<512x128xbf16, #tpu.memory_space<vmem>>, %arg13: memref<1x128xf32, #tpu.memory_space<vmem>>, %arg14: memref<128x128xbf16, #tpu.memory_space<vmem>>, %arg15: memref<1x128xf32, #tpu.memory_space<vmem>>, %arg16: memref<8x2xf32, #tpu.memory_space<vmem>>) attributes {dimension_semantics = [#tpu.dimension_semantics<parallel>], iteration_bounds = array<i64: 1>, scalar_prefetch = 0 : i64, scratch_operands = 0 : i64, tpu.core_type = #tpu.core_type<tc>, window_params = [{transform_indices = @transform_0, window_bounds = array<i64: 8, 8>}, {pipeline_mode = #tpu.pipeline_mode<synchronous>, transform_indices = @transform_1, window_bounds = array<i64: 8, 128>}, {pipeline_mode = #tpu.pipeline_mode<synchronous>, transform_indices = @transform_2, window_bounds = array<i64: 1, 128>}, {pipeline_mode = #tpu.pipeline_mode<synchronous>, transform_indices = @transform_3, window_bounds = array<i64: 128, 384>}, {pipeline_mode = #tpu.pipeline_mode<synchronous>, transform_indices = @transform_4, window_bounds = array<i64: 1, 384>}, {pipeline_mode = #tpu.pipeline_mode<synchronous>, transform_indices = @transform_5, window_bounds = array<i64: 384, 896>}, {pipeline_mode = #tpu.pipeline_mode<synchronous>, transform_indices = @transform_6, window_bounds = array<i64: 1, 896>}, {pipeline_mode = #tpu.pipeline_mode<synchronous>, transform_indices = @transform_7, window_bounds = array<i64: 896, 896>}, {pipeline_mode = #tpu.pipeline_mode<synchronous>, transform_indices = @transform_8, window_bounds = array<i64: 1, 896>}, {pipeline_mode = #tpu.pipeline_mode<synchronous>, transform_indices = @transform_9, window_bounds = array<i64: 896, 512>}, {pipeline_mode = #tpu.pipeline_mode<synchronous>, transform_indices = @transform_10, window_bounds = array<i64: 1, 512>}, {pipeline_mode = #tpu.pipeline_mode<synchronous>, transform_indices = @transform_11, window_bounds = array<i64: 512, 128>}, {pipeline_mode = #tpu.pipeline_mode<synchronous>, transform_indices = @transform_12, window_bounds = array<i64: 1, 128>}, {pipeline_mode = #tpu.pipeline_mode<synchronous>, transform_indices = @transform_13, window_bounds = array<i64: 128, 128>}, {pipeline_mode = #tpu.pipeline_mode<synchronous>, transform_indices = @transform_14, window_bounds = array<i64: 1, 128>}, {transform_indices = @transform_15, window_bounds = array<i64: 8, 2>}]} {
    %c0 = arith.constant 0 : index
    %c0_0 = arith.constant 0 : index
    %0 = vector.load %arg1[%c0, %c0_0] : memref<8x8xf32, #tpu.memory_space<vmem>>, vector<8x8xf32>
    %c0_1 = arith.constant 0 : index
    %c0_2 = arith.constant 0 : index
    %1 = vector.load %arg2[%c0_1, %c0_2] : memref<8x128xbf16, #tpu.memory_space<vmem>>, vector<8x128xbf16>
    %c0_3 = arith.constant 0 : index
    %c0_4 = arith.constant 0 : index
    %2 = vector.load %arg3[%c0_3, %c0_4] : memref<1x128xf32, #tpu.memory_space<vmem>>, vector<1x128xf32>
    %3 = arith.truncf %0 : vector<8x8xf32> to vector<8x8xbf16>
    %cst = arith.constant dense<0.000000e+00> : vector<8x128xf32>
    %4 = tpu.matmul %3, %1, %cst {dimension_numbers = #tpu.dot_dimension_numbers<[1], [0], [0], [1], [0, 0, 1, 1], [], []>} : vector<8x8xbf16>, vector<8x128xbf16>, vector<8x128xf32> -> vector<8x128xf32>
    %5 = vector.broadcast %2 : vector<1x128xf32> to vector<8x128xf32>
    %6 = arith.addf %4, %5 : vector<8x128xf32>
    %7 = math.tanh %6 : vector<8x128xf32>
    %c0_5 = arith.constant 0 : index
    %c0_6 = arith.constant 0 : index
    %8 = vector.load %arg4[%c0_5, %c0_6] : memref<128x384xbf16, #tpu.memory_space<vmem>>, vector<128x384xbf16>
    %c0_7 = arith.constant 0 : index
    %c0_8 = arith.constant 0 : index
    %9 = vector.load %arg5[%c0_7, %c0_8] : memref<1x384xf32, #tpu.memory_space<vmem>>, vector<1x384xf32>
    %10 = arith.truncf %7 : vector<8x128xf32> to vector<8x128xbf16>
    %cst_9 = arith.constant dense<0.000000e+00> : vector<8x384xf32>
    %11 = tpu.matmul %10, %8, %cst_9 {dimension_numbers = #tpu.dot_dimension_numbers<[1], [0], [0], [1], [0, 0, 1, 1], [], []>} : vector<8x128xbf16>, vector<128x384xbf16>, vector<8x384xf32> -> vector<8x384xf32>
    %12 = vector.broadcast %9 : vector<1x384xf32> to vector<8x384xf32>
    %13 = arith.addf %11, %12 : vector<8x384xf32>
    %cst_10 = arith.constant 0.000000e+00 : f32
    %14 = vector.broadcast %cst_10 : f32 to vector<8x384xf32>
    %15 = arith.cmpf ogt, %13, %14 : vector<8x384xf32>
    %cst_11 = arith.constant 0.00999999977 : f32
    %16 = vector.broadcast %cst_11 : f32 to vector<8x384xf32>
    %17 = arith.mulf %16, %13 : vector<8x384xf32>
    %18 = arith.select %15, %13, %17 : vector<8x384xi1>, vector<8x384xf32>
    %c0_12 = arith.constant 0 : index
    %c0_13 = arith.constant 0 : index
    %19 = vector.load %arg6[%c0_12, %c0_13] : memref<384x896xbf16, #tpu.memory_space<vmem>>, vector<384x896xbf16>
    %c0_14 = arith.constant 0 : index
    %c0_15 = arith.constant 0 : index
    %20 = vector.load %arg7[%c0_14, %c0_15] : memref<1x896xf32, #tpu.memory_space<vmem>>, vector<1x896xf32>
    %21 = arith.truncf %18 : vector<8x384xf32> to vector<8x384xbf16>
    %cst_16 = arith.constant dense<0.000000e+00> : vector<8x896xf32>
    %22 = tpu.matmul %21, %19, %cst_16 {dimension_numbers = #tpu.dot_dimension_numbers<[1], [0], [0], [1], [0, 0, 1, 1], [], []>} : vector<8x384xbf16>, vector<384x896xbf16>, vector<8x896xf32> -> vector<8x896xf32>
    %23 = vector.broadcast %20 : vector<1x896xf32> to vector<8x896xf32>
    %24 = arith.addf %22, %23 : vector<8x896xf32>
    %cst_17 = arith.constant 0.000000e+00 : f32
    %25 = vector.broadcast %cst_17 : f32 to vector<8x896xf32>
    %26 = arith.cmpf ogt, %24, %25 : vector<8x896xf32>
    %cst_18 = arith.constant 0.00999999977 : f32
    %27 = vector.broadcast %cst_18 : f32 to vector<8x896xf32>
    %28 = arith.mulf %27, %24 : vector<8x896xf32>
    %29 = arith.select %26, %24, %28 : vector<8x896xi1>, vector<8x896xf32>
    %c0_19 = arith.constant 0 : index
    %c0_20 = arith.constant 0 : index
    %30 = vector.load %arg8[%c0_19, %c0_20] : memref<896x896xbf16, #tpu.memory_space<vmem>>, vector<896x896xbf16>
    %c0_21 = arith.constant 0 : index
    %c0_22 = arith.constant 0 : index
    %31 = vector.load %arg9[%c0_21, %c0_22] : memref<1x896xf32, #tpu.memory_space<vmem>>, vector<1x896xf32>
    %32 = arith.truncf %29 : vector<8x896xf32> to vector<8x896xbf16>
    %cst_23 = arith.constant dense<0.000000e+00> : vector<8x896xf32>
    %33 = tpu.matmul %32, %30, %cst_23 {dimension_numbers = #tpu.dot_dimension_numbers<[1], [0], [0], [1], [0, 0, 1, 1], [], []>} : vector<8x896xbf16>, vector<896x896xbf16>, vector<8x896xf32> -> vector<8x896xf32>
    %34 = vector.broadcast %31 : vector<1x896xf32> to vector<8x896xf32>
    %35 = arith.addf %33, %34 : vector<8x896xf32>
    %cst_24 = arith.constant 0.000000e+00 : f32
    %36 = vector.broadcast %cst_24 : f32 to vector<8x896xf32>
    %37 = arith.cmpf ogt, %35, %36 : vector<8x896xf32>
    %cst_25 = arith.constant 0.00999999977 : f32
    %38 = vector.broadcast %cst_25 : f32 to vector<8x896xf32>
    %39 = arith.mulf %38, %35 : vector<8x896xf32>
    %40 = arith.select %37, %35, %39 : vector<8x896xi1>, vector<8x896xf32>
    %c0_26 = arith.constant 0 : index
    %c0_27 = arith.constant 0 : index
    %41 = vector.load %arg10[%c0_26, %c0_27] : memref<896x512xbf16, #tpu.memory_space<vmem>>, vector<896x512xbf16>
    %c0_28 = arith.constant 0 : index
    %c0_29 = arith.constant 0 : index
    %42 = vector.load %arg11[%c0_28, %c0_29] : memref<1x512xf32, #tpu.memory_space<vmem>>, vector<1x512xf32>
    %43 = arith.truncf %40 : vector<8x896xf32> to vector<8x896xbf16>
    %cst_30 = arith.constant dense<0.000000e+00> : vector<8x512xf32>
    %44 = tpu.matmul %43, %41, %cst_30 {dimension_numbers = #tpu.dot_dimension_numbers<[1], [0], [0], [1], [0, 0, 1, 1], [], []>} : vector<8x896xbf16>, vector<896x512xbf16>, vector<8x512xf32> -> vector<8x512xf32>
    %45 = vector.broadcast %42 : vector<1x512xf32> to vector<8x512xf32>
    %46 = arith.addf %44, %45 : vector<8x512xf32>
    %cst_31 = arith.constant 0.000000e+00 : f32
    %47 = vector.broadcast %cst_31 : f32 to vector<8x512xf32>
    %48 = arith.cmpf ogt, %46, %47 : vector<8x512xf32>
    %cst_32 = arith.constant 0.00999999977 : f32
    %49 = vector.broadcast %cst_32 : f32 to vector<8x512xf32>
    %50 = arith.mulf %49, %46 : vector<8x512xf32>
    %51 = arith.select %48, %46, %50 : vector<8x512xi1>, vector<8x512xf32>
    %c0_33 = arith.constant 0 : index
    %c0_34 = arith.constant 0 : index
    %52 = vector.load %arg12[%c0_33, %c0_34] : memref<512x128xbf16, #tpu.memory_space<vmem>>, vector<512x128xbf16>
    %c0_35 = arith.constant 0 : index
    %c0_36 = arith.constant 0 : index
    %53 = vector.load %arg13[%c0_35, %c0_36] : memref<1x128xf32, #tpu.memory_space<vmem>>, vector<1x128xf32>
    %54 = arith.truncf %51 : vector<8x512xf32> to vector<8x512xbf16>
    %cst_37 = arith.constant dense<0.000000e+00> : vector<8x128xf32>
    %55 = tpu.matmul %54, %52, %cst_37 {dimension_numbers = #tpu.dot_dimension_numbers<[1], [0], [0], [1], [0, 0, 1, 1], [], []>} : vector<8x512xbf16>, vector<512x128xbf16>, vector<8x128xf32> -> vector<8x128xf32>
    %56 = vector.broadcast %53 : vector<1x128xf32> to vector<8x128xf32>
    %57 = arith.addf %55, %56 : vector<8x128xf32>
    %cst_38 = arith.constant 0.000000e+00 : f32
    %58 = vector.broadcast %cst_38 : f32 to vector<8x128xf32>
    %59 = arith.cmpf ogt, %57, %58 : vector<8x128xf32>
    %cst_39 = arith.constant 0.00999999977 : f32
    %60 = vector.broadcast %cst_39 : f32 to vector<8x128xf32>
    %61 = arith.mulf %60, %57 : vector<8x128xf32>
    %62 = arith.select %59, %57, %61 : vector<8x128xi1>, vector<8x128xf32>
    %c0_40 = arith.constant 0 : index
    %c0_41 = arith.constant 0 : index
    %63 = vector.load %arg14[%c0_40, %c0_41] : memref<128x128xbf16, #tpu.memory_space<vmem>>, vector<128x128xbf16>
    %c0_42 = arith.constant 0 : index
    %c0_43 = arith.constant 0 : index
    %64 = vector.load %arg15[%c0_42, %c0_43] : memref<1x128xf32, #tpu.memory_space<vmem>>, vector<1x128xf32>
    %65 = arith.truncf %62 : vector<8x128xf32> to vector<8x128xbf16>
    %cst_44 = arith.constant dense<0.000000e+00> : vector<8x128xf32>
    %66 = tpu.matmul %65, %63, %cst_44 {dimension_numbers = #tpu.dot_dimension_numbers<[1], [0], [0], [1], [0, 0, 1, 1], [], []>} : vector<8x128xbf16>, vector<128x128xbf16>, vector<8x128xf32> -> vector<8x128xf32>
    %67 = vector.broadcast %64 : vector<1x128xf32> to vector<8x128xf32>
    %68 = arith.addf %66, %67 : vector<8x128xf32>
    %69 = vector.extract_strided_slice %68 {offsets = [0, 0], sizes = [8, 2], strides = [1, 1]} : vector<8x128xf32> to vector<8x2xf32>
    %c0_45 = arith.constant 0 : index
    %c0_46 = arith.constant 0 : index
    %70 = vector.load %arg16[%c0_45, %c0_46] : memref<8x2xf32, #tpu.memory_space<vmem>>, vector<8x2xf32>
    tpu.vector_store %arg16[%c0_45, %c0_46], %69 {strides = array<i32>} : memref<8x2xf32, #tpu.memory_space<vmem>>, vector<8x2xf32>,
    return
  }
  func.func @transform_0(%arg0: i32) -> (i32, i32) {
    %c0_i32 = arith.constant 0 : i32
    %c0_i32_0 = arith.constant 0 : i32
    return %arg0, %c0_i32 : i32, i32
  }
  func.func @transform_1(%arg0: i32) -> (i32, i32) {
    %c0_i32 = arith.constant 0 : i32
    %c0_i32_0 = arith.constant 0 : i32
    %c0_i32_1 = arith.constant 0 : i32
    return %c0_i32, %c0_i32_0 : i32, i32
  }
  func.func @transform_2(%arg0: i32) -> (i32, i32) {
    %c0_i32 = arith.constant 0 : i32
    %c0_i32_0 = arith.constant 0 : i32
    %c0_i32_1 = arith.constant 0 : i32
    return %c0_i32, %c0_i32_0 : i32, i32
  }
  func.func @transform_3(%arg0: i32) -> (i32, i32) {
    %c0_i32 = arith.constant 0 : i32
    %c0_i32_0 = arith.constant 0 : i32
    %c0_i32_1 = arith.constant 0 : i32
    return %c0_i32, %c0_i32_0 : i32, i32
  }
  func.func @transform_4(%arg0: i32) -> (i32, i32) {
    %c0_i32 = arith.constant 0 : i32
    %c0_i32_0 = arith.constant 0 : i32
    %c0_i32_1 = arith.constant 0 : i32
    return %c0_i32, %c0_i32_0 : i32, i32
  }
  func.func @transform_5(%arg0: i32) -> (i32, i32) {
    %c0_i32 = arith.constant 0 : i32
    %c0_i32_0 = arith.constant 0 : i32
    %c0_i32_1 = arith.constant 0 : i32
    return %c0_i32, %c0_i32_0 : i32, i32
  }
  func.func @transform_6(%arg0: i32) -> (i32, i32) {
    %c0_i32 = arith.constant 0 : i32
    %c0_i32_0 = arith.constant 0 : i32
    %c0_i32_1 = arith.constant 0 : i32
    return %c0_i32, %c0_i32_0 : i32, i32
  }
  func.func @transform_7(%arg0: i32) -> (i32, i32) {
    %c0_i32 = arith.constant 0 : i32
    %c0_i32_0 = arith.constant 0 : i32
    %c0_i32_1 = arith.constant 0 : i32
    return %c0_i32, %c0_i32_0 : i32, i32
  }
  func.func @transform_8(%arg0: i32) -> (i32, i32) {
    %c0_i32 = arith.constant 0 : i32
    %c0_i32_0 = arith.constant 0 : i32
    %c0_i32_1 = arith.constant 0 : i32
    return %c0_i32, %c0_i32_0 : i32, i32
  }
  func.func @transform_9(%arg0: i32) -> (i32, i32) {
    %c0_i32 = arith.constant 0 : i32
    %c0_i32_0 = arith.constant 0 : i32
    %c0_i32_1 = arith.constant 0 : i32
    return %c0_i32, %c0_i32_0 : i32, i32
  }
  func.func @transform_10(%arg0: i32) -> (i32, i32) {
    %c0_i32 = arith.constant 0 : i32
    %c0_i32_0 = arith.constant 0 : i32
    %c0_i32_1 = arith.constant 0 : i32
    return %c0_i32, %c0_i32_0 : i32, i32
  }
  func.func @transform_11(%arg0: i32) -> (i32, i32) {
    %c0_i32 = arith.constant 0 : i32
    %c0_i32_0 = arith.constant 0 : i32
    %c0_i32_1 = arith.constant 0 : i32
    return %c0_i32, %c0_i32_0 : i32, i32
  }
  func.func @transform_12(%arg0: i32) -> (i32, i32) {
    %c0_i32 = arith.constant 0 : i32
    %c0_i32_0 = arith.constant 0 : i32
    %c0_i32_1 = arith.constant 0 : i32
    return %c0_i32, %c0_i32_0 : i32, i32
  }
  func.func @transform_13(%arg0: i32) -> (i32, i32) {
    %c0_i32 = arith.constant 0 : i32
    %c0_i32_0 = arith.constant 0 : i32
    %c0_i32_1 = arith.constant 0 : i32
    return %c0_i32, %c0_i32_0 : i32, i32
  }
  func.func @transform_14(%arg0: i32) -> (i32, i32) {
    %c0_i32 = arith.constant 0 : i32
    %c0_i32_0 = arith.constant 0 : i32
    %c0_i32_1 = arith.constant 0 : i32
    return %c0_i32, %c0_i32_0 : i32, i32
  }
  func.func @transform_15(%arg0: i32) -> (i32, i32) {
    %c0_i32 = arith.constant 0 : i32
    %c0_i32_0 = arith.constant 0 : i32
    return %arg0, %c0_i32 : i32, i32
  }
}

</mosaic_0001>

<bundles_post_ra>
// kernel: score_module_forward.1
= control target key start
LH: loop header
LB: loop body
LE: loop exit
PB: predicated region body
PF: predicated region fallthrough
CT: control target
= control target key end

     0   :  { %20 = vsyncpa [#allocation3], 0  ;;  %s10628_s0 = inlined_call_operand.vmem [shape: f32[8,8], index: 0, kind: input, shape index: {}]   ;;  %s10629_s1 = inlined_call_operand.hbm [shape: bf16[8,128], index: 1, kind: input, shape index: {}]   ;;  %s10630_s2 = inlined_call_operand.hbm [shape: f32[1,128], index: 2, kind: input, shape index: {}]   ;;  %s10631_s3 = inlined_call_operand.hbm [shape: bf16[128,384], index: 3, kind: input, shape index: {}]   ;;  %s10632_s4 = inlined_call_operand.hbm [shape: f32[1,384], index: 4, kind: input, shape index: {}]   ;;  %s10633_s5 = inlined_call_operand.hbm [shape: bf16[384,896], index: 5, kind: input, shape index: {}]   ;;  %s10634_s6 = inlined_call_operand.hbm [shape: f32[1,896], index: 6, kind: input, shape index: {}]   ;;  %s10635_s7 = inlined_call_operand.hbm [shape: bf16[896,896], index: 7, kind: input, shape index: {}]   ;;  %s10636_s8 = inlined_call_operand.hbm [shape: f32[1,896], index: 8, kind: input, shape index: {}]   ;;  %s10637_s9 = inlined_call_operand.hbm [shape: bf16[896,512], index: 9, kind: input, shape index: {}]   ;;  %s10638_s10 = inlined_call_operand.hbm [shape: f32[1,512], index: 10, kind: input, shape index: {}]   ;;  %s10639_s11 = inlined_call_operand.hbm [shape: bf16[512,128], index: 11, kind: input, shape index: {}]   ;;  %s10640_s12 = inlined_call_operand.hbm [shape: f32[1,128], index: 12, kind: input, shape index: {}]   ;;  %s10641_s13 = inlined_call_operand.hbm [shape: bf16[128,128], index: 13, kind: input, shape index: {}]   ;;  %s10642_s14 = inlined_call_operand.hbm [shape: f32[1,128], index: 14, kind: input, shape index: {}]   ;;  %s10643_s15 = inlined_call_operand.vmem [shape: f32[8,2], index: 15, kind: output, shape index: {}]  }
   0x1   :  { %21 = vsyncpa [#allocation5], 0 }
   0x2   :  { %22 = vsyncpa [#allocation8], 0 }
   0x3   :  { %23 = vsyncpa [#allocation11], 0 }
   0x4   :  { %24 = vsyncpa [#allocation14], 0 }
   0x5   :  { %25 = vsyncpa [#allocation17], 0 }
   0x6   :  { %26 = vsyncpa [#allocation20], 0 }
   0x7   :  { %27 = vsyncpa [#allocation23], 0  ;;  %s10120_s18 = smov [#allocation4]   ;;  %s10121_s20 = smov [#allocation7]  }
   0x8   :  { %s46_s19 = sshll.u32 %s10120_s18, 4  ;;  %s68_s21 = sshll.u32 %s10121_s20, 4  ;;  %s47_s19 = int_to_ptr.vmem [resolvable:$true] %s46_s19  ;;  %s69_s21 = int_to_ptr.vmem [resolvable:$true] %s68_s21 }
   0x9   :  { %s9796_s24 = scalar_lea.hbm %s10630_s2, 16 }
   0xa   :  { %p9797_p0 = scmp.ne.s32.totalorder %s10630_s2, %s9796_s24  ;;  %p9800_p1 = scmp.lt.u32.totalorder %s9796_s24, %s10630_s2 }
   0xc   :  { %p9802_p2 = pnand %p9800_p1, %p9797_p0 }
   0xe   :  { %9805 = shalt.err (!%p9802_p2)
}
   0xf   :  { %s9806_s29 = scalar_lea.vmem %s47_s19, 16  ;;  %s9810_s30 = scalar_lea.vmem %s47_s19, 32 }
  0x10   :  { %p9807_p3 = scmp.ne.s32.totalorder %s47_s19, %s9806_s29  ;;  %p9811_p4 = scmp.lt.s32.totalorder %s47_s19, %s47_s19 }
  0x11   :  { %p9812_p5 = scmp.lt.s32.totalorder %s9810_s30, %s9806_s29 }
  0x13   :  { %p9813_p6 = por %p9812_p5, %p9811_p4 }
  0x15   :  { %p9814_p7 = pnand %p9813_p6, %p9807_p3 }
  0x17   :  { %9817 = shalt.err (!%p9814_p7)
}
  0x18   :  { %49 = dma.hbm_to_vmem [thread:$0]  %s10630_s2, 16, %s47_s19, [#allocation5]  }
  0x19   :  { %s9818_s22 = scalar_lea.hbm %s10632_s4, 48 }
  0x1a   :  { %p9819_p8 = scmp.ne.s32.totalorder %s10632_s4, %s9818_s22  ;;  %p9822_p9 = scmp.lt.u32.totalorder %s9818_s22, %s10632_s4 }
  0x1c   :  { %p9824_p10 = pnand %p9822_p9, %p9819_p8 }
  0x1e   :  { %9827 = shalt.err (!%p9824_p10)
}
  0x1f   :  { %s9828_s27 = scalar_lea.vmem %s69_s21, 48  ;;  %s9832_s28 = scalar_lea.vmem %s69_s21, 64 }
  0x20   :  { %p9829_p11 = scmp.ne.s32.totalorder %s69_s21, %s9828_s27  ;;  %p9833_p12 = scmp.lt.s32.totalorder %s69_s21, %s69_s21 }
  0x21   :  { %p9834_p13 = scmp.lt.s32.totalorder %s9832_s28, %s9828_s27 }
  0x23   :  { %p9835_p0 = por %p9834_p13, %p9833_p12 }
  0x25   :  { %p9836_p1 = pnand %p9835_p0, %p9829_p11 }
  0x27   :  { %9839 = shalt.err (!%p9836_p1)
}
  0x28   :  { %71 = dma.hbm_to_vmem [thread:$0]  %s10632_s4, 48, %s69_s21, [#allocation8]  }
  0x29   :  { %s10122_s29 = smov [#allocation10]   ;;  %s10123_s16 = smov [#allocation13]  }
  0x2a   :  { %s90_s30 = sshll.u32 %s10122_s29, 4  ;;  %s112_s17 = sshll.u32 %s10123_s16, 4  ;;  %s91_s30 = int_to_ptr.vmem [resolvable:$true] %s90_s30  ;;  %s113_s17 = int_to_ptr.vmem [resolvable:$true] %s112_s17 }
  0x2b   :  { %s9840_s22 = scalar_lea.hbm %s10634_s6, 112 }
  0x2c   :  { %p9841_p2 = scmp.ne.s32.totalorder %s10634_s6, %s9840_s22  ;;  %p9844_p3 = scmp.lt.u32.totalorder %s9840_s22, %s10634_s6 }
  0x2e   :  { %p9846_p4 = pnand %p9844_p3, %p9841_p2 }
  0x30   :  { %9849 = shalt.err (!%p9846_p4)
}
  0x31   :  { %s9850_s4 = scalar_lea.vmem %s91_s30, 112  ;;  %s9854_s21 = scalar_lea.vmem %s91_s30, 128 }
  0x32   :  { %p9851_p5 = scmp.ne.s32.totalorder %s91_s30, %s9850_s4  ;;  %p9855_p6 = scmp.lt.s32.totalorder %s91_s30, %s91_s30 }
  0x33   :  { %p9856_p7 = scmp.lt.s32.totalorder %s9854_s21, %s9850_s4 }
  0x35   :  { %p9857_p8 = por %p9856_p7, %p9855_p6 }
  0x37   :  { %p9858_p9 = pnand %p9857_p8, %p9851_p5 }
  0x39   :  { %9861 = shalt.err (!%p9858_p9)
}
  0x3a   :  { %93 = dma.hbm_to_vmem [thread:$0]  %s10634_s6, 112, %s91_s30, [#allocation11]  }
  0x3b   :  { %s9862_s29 = scalar_lea.hbm %s10636_s8, 112 }
  0x3c   :  { %p9863_p10 = scmp.ne.s32.totalorder %s10636_s8, %s9862_s29  ;;  %p9866_p11 = scmp.lt.u32.totalorder %s9862_s29, %s10636_s8 }
  0x3e   :  { %p9868_p12 = pnand %p9866_p11, %p9863_p10 }
  0x40   :  { %9871 = shalt.err (!%p9868_p12)
}
  0x41   :  { %s9872_s23 = scalar_lea.vmem %s113_s17, 112  ;;  %s9876_s24 = scalar_lea.vmem %s113_s17, 128 }
  0x42   :  { %p9873_p13 = scmp.ne.s32.totalorder %s113_s17, %s9872_s23  ;;  %p9877_p0 = scmp.lt.s32.totalorder %s113_s17, %s113_s17 }
  0x43   :  { %p9878_p1 = scmp.lt.s32.totalorder %s9876_s24, %s9872_s23 }
  0x45   :  { %p9879_p2 = por %p9878_p1, %p9877_p0 }
  0x47   :  { %p9880_p3 = pnand %p9879_p2, %p9873_p13 }
  0x49   :  { %9883 = shalt.err (!%p9880_p3)
}
  0x4a   :  { %115 = dma.hbm_to_vmem [thread:$0]  %s10636_s8, 112, %s113_s17, [#allocation14]  }
  0x4b   :  { %s10124_s25 = smov [#allocation16]   ;;  %s10125_s4 = smov [#allocation19]  }
  0x4c   :  { %s134_s26 = sshll.u32 %s10124_s25, 4  ;;  %s156_s21 = sshll.u32 %s10125_s4, 4  ;;  %s135_s26 = int_to_ptr.vmem [resolvable:$true] %s134_s26  ;;  %s157_s21 = int_to_ptr.vmem [resolvable:$true] %s156_s21 }
  0x4d   :  { %s9884_s2 = scalar_lea.hbm %s10638_s10, 64 }
  0x4e   :  { %p9885_p4 = scmp.ne.s32.totalorder %s10638_s10, %s9884_s2  ;;  %p9888_p5 = scmp.lt.u32.totalorder %s9884_s2, %s10638_s10 }
  0x50   :  { %p9890_p6 = pnand %p9888_p5, %p9885_p4 }
  0x52   :  { %9893 = shalt.err (!%p9890_p6)
}
  0x53   :  { %s9894_s8 = scalar_lea.vmem %s135_s26, 64  ;;  %p9899_p8 = scmp.lt.s32.totalorder %s135_s26, %s135_s26 }
  0x54   :  { %p9895_p7 = scmp.ne.s32.totalorder %s135_s26, %s9894_s8  ;;  %p9900_p9 = scmp.lt.s32.totalorder %s9894_s8, %s9894_s8 }
  0x56   :  { %p9901_p10 = por %p9900_p9, %p9899_p8 }
  0x58   :  { %p9902_p11 = pnand %p9901_p10, %p9895_p7 }
  0x5a   :  { %9905 = shalt.err (!%p9902_p11)
}
  0x5b   :  { %137 = dma.hbm_to_vmem [thread:$0]  %s10638_s10, 64, %s135_s26, [#allocation17]  }
  0x5c   :  { %s9906_s24 = scalar_lea.hbm %s10640_s12, 16 }
  0x5d   :  { %p9907_p12 = scmp.ne.s32.totalorder %s10640_s12, %s9906_s24  ;;  %p9910_p13 = scmp.lt.u32.totalorder %s9906_s24, %s10640_s12 }
  0x5f   :  { %p9912_p0 = pnand %p9910_p13, %p9907_p12 }
  0x61   :  { %9915 = shalt.err (!%p9912_p0)
}
  0x62   :  { %s9916_s27 = scalar_lea.vmem %s157_s21, 16  ;;  %s9920_s28 = scalar_lea.vmem %s157_s21, 32 }
  0x63   :  { %p9917_p1 = scmp.ne.s32.totalorder %s157_s21, %s9916_s27  ;;  %p9921_p2 = scmp.lt.s32.totalorder %s157_s21, %s157_s21 }
  0x64   :  { %p9922_p3 = scmp.lt.s32.totalorder %s9920_s28, %s9916_s27 }
  0x66   :  { %p9923_p4 = por %p9922_p3, %p9921_p2 }
  0x68   :  { %p9924_p5 = pnand %p9923_p4, %p9917_p1 }
  0x6a   :  { %9927 = shalt.err (!%p9924_p5)
}
  0x6b   :  { %159 = dma.hbm_to_vmem [thread:$0]  %s10640_s12, 16, %s157_s21, [#allocation20]  }
  0x6c   :  { %s10126_s2 = smov [#allocation2]   ;;  %s10127_s29 = smov [#allocation6]  }
  0x6d   :  { %s36_s19 = sshll.u32 %s10126_s2, 4  ;;  %s55_s16 = sshll.u32 %s10127_s29, 4  ;;  %s37_s19 = int_to_ptr.vmem [resolvable:$true] %s36_s19  ;;  %s10297_s16 = int_to_ptr.vmem [resolvable:$true] %s55_s16 }
  0x6e   :  { %s9928_s17 = scalar_lea.hbm %s10629_s1, 64 }
  0x6f   :  { %p9929_p6 = scmp.ne.s32.totalorder %s10629_s1, %s9928_s17  ;;  %p9932_p7 = scmp.lt.u32.totalorder %s9928_s17, %s10629_s1 }
  0x71   :  { %p9934_p8 = pnand %p9932_p7, %p9929_p6 }
  0x73   :  { %9937 = shalt.err (!%p9934_p8)
}
  0x74   :  { %s9938_s12 = scalar_lea.vmem %s37_s19, 64  ;;  %p9943_p10 = scmp.lt.s32.totalorder %s37_s19, %s37_s19 }
  0x75   :  { %p9939_p9 = scmp.ne.s32.totalorder %s37_s19, %s9938_s12  ;;  %p9944_p11 = scmp.lt.s32.totalorder %s9938_s12, %s9938_s12 }
  0x77   :  { %p9945_p12 = por %p9944_p11, %p9943_p10 }
  0x79   :  { %p9946_p13 = pnand %p9945_p12, %p9939_p9 }
  0x7b   :  { %9949 = shalt.err (!%p9946_p13)
}
  0x7c   :  { %39 = dma.hbm_to_vmem [thread:$0]  %s10629_s1, 64, %s37_s19, [#allocation3]  }
  0x7d   :  { %s9950_s4 = scalar_lea.hbm %s10631_s3, 3072 }
  0x7e   :  { %p9951_p0 = scmp.ne.s32.totalorder %s10631_s3, %s9950_s4  ;;  %p9954_p1 = scmp.lt.u32.totalorder %s9950_s4, %s10631_s3 }
  0x80   :  { %p9956_p2 = pnand %p9954_p1, %p9951_p0 }
  0x82   :  { %9959 = shalt.err (!%p9956_p2)
}
  0x83   :  { %s9960_s2 = scalar_lea.vmem %s10297_s16, 3072  ;;  %p9965_p4 = scmp.lt.s32.totalorder %s10297_s16, %s10297_s16 }
  0x84   :  { %p9961_p3 = scmp.ne.s32.totalorder %s10297_s16, %s9960_s2  ;;  %p9966_p5 = scmp.lt.s32.totalorder %s9960_s2, %s9960_s2 }
  0x86   :  { %p9967_p6 = por %p9966_p5, %p9965_p4 }
  0x88   :  { %p9968_p7 = pnand %p9967_p6, %p9961_p3 }
  0x8a   :  { %9971 = shalt.err (!%p9968_p7)
}
  0x8b   :  { %s10128_s1 = smov 192   ;;  %s10129_s19 = smov 12  }
  0x8c   :  { %61 = dma.hbm_to_vmem [thread:$0]  %s10631_s3, 3072, %s10297_s16, [#allocation5], %s10128_s1, %s10128_s1, %s10129_s19  }
  0x8d   :  { %s10130_s8 = smov [#allocation9]   ;;  %s9972_s23 = scalar_lea.hbm %s10633_s5, 21504 }
  0x8e   :  { %s77_s17 = sshll.u32 %s10130_s8, 4  ;;  %p9973_p8 = scmp.ne.s32.totalorder %s10633_s5, %s9972_s23  ;;  %s78_s17 = int_to_ptr.vmem [resolvable:$true] %s77_s17 }
  0x8f   :  { %p9976_p9 = scmp.lt.u32.totalorder %s9972_s23, %s10633_s5 }
  0x91   :  { %p9978_p10 = pnand %p9976_p9, %p9973_p8 }
  0x93   :  { %9981 = shalt.err (!%p9978_p10)
}
  0x94   :  { %s9982_s30 = scalar_lea.vmem %s78_s17, 21504  ;;  %p9987_p12 = scmp.lt.s32.totalorder %s78_s17, %s78_s17 }
  0x95   :  { %p9983_p11 = scmp.ne.s32.totalorder %s78_s17, %s9982_s30  ;;  %p9988_p13 = scmp.lt.s32.totalorder %s9982_s30, %s9982_s30 }
  0x97   :  { %p9989_p0 = por %p9988_p13, %p9987_p12 }
  0x99   :  { %p9990_p1 = pnand %p9989_p0, %p9983_p11 }
  0x9b   :  { %9993 = shalt.err (!%p9990_p1)
}
  0x9c   :  { %s10131_s3 = smov 448   ;;  %s10132_s16 = smov 28  }
  0x9d   :  { %83 = dma.hbm_to_vmem [thread:$0]  %s10633_s5, 21504, %s78_s17, [#allocation8], %s10131_s3, %s10131_s3, %s10132_s16  }
  0x9e   :  { %s10133_s27 = smov [#allocation12]   ;;  %s10134_s10 = smov [#allocation15]  }
  0x9f   :  { %s99_s28 = sshll.u32 %s10133_s27, 4  ;;  %s121_s26 = sshll.u32 %s10134_s10, 4  ;;  %s100_s28 = int_to_ptr.vmem [resolvable:$true] %s99_s28  ;;  %s122_s26 = int_to_ptr.vmem [resolvable:$true] %s121_s26 }
  0xa0   :  { %s9994_s19 = scalar_lea.hbm %s10635_s7, 50176 }
  0xa1   :  { %p9995_p2 = scmp.ne.s32.totalorder %s10635_s7, %s9994_s19  ;;  %p9998_p3 = scmp.lt.u32.totalorder %s9994_s19, %s10635_s7 }
  0xa3   :  { %p10000_p4 = pnand %p9998_p3, %p9995_p2 }
  0xa5   :  { %10003 = shalt.err (!%p10000_p4)
}
  0xa6   :  { %s10004_s5 = scalar_lea.vmem %s100_s28, 50176  ;;  %p10009_p6 = scmp.lt.s32.totalorder %s100_s28, %s100_s28 }
  0xa7   :  { %p10005_p5 = scmp.ne.s32.totalorder %s100_s28, %s10004_s5  ;;  %p10010_p7 = scmp.lt.s32.totalorder %s10004_s5, %s10004_s5 }
  0xa9   :  { %p10011_p8 = por %p10010_p7, %p10009_p6 }
  0xab   :  { %p10012_p9 = pnand %p10011_p8, %p10005_p5 }
  0xad   :  { %10015 = shalt.err (!%p10012_p9)
}
  0xae   :  { %105 = dma.hbm_to_vmem [thread:$0]  %s10635_s7, 50176, %s100_s28, [#allocation11], %s10131_s3, %s10131_s3, %s10132_s16  }
  0xaf   :  { %s10016_s12 = scalar_lea.hbm %s10637_s9, 28672 }
  0xb0   :  { %p10017_p10 = scmp.ne.s32.totalorder %s10637_s9, %s10016_s12  ;;  %p10020_p11 = scmp.lt.u32.totalorder %s10016_s12, %s10637_s9 }
  0xb2   :  { %p10022_p12 = pnand %p10020_p11, %p10017_p10 }
  0xb4   :  { %10025 = shalt.err (!%p10022_p12)
}
  0xb5   :  { %s10026_s4 = scalar_lea.vmem %s122_s26, 28672  ;;  %p10031_p0 = scmp.lt.s32.totalorder %s122_s26, %s122_s26 }
  0xb6   :  { %p10027_p13 = scmp.ne.s32.totalorder %s122_s26, %s10026_s4  ;;  %p10032_p1 = scmp.lt.s32.totalorder %s10026_s4, %s10026_s4 }
  0xb8   :  { %p10033_p2 = por %p10032_p1, %p10031_p0 }
  0xba   :  { %p10034_p3 = pnand %p10033_p2, %p10027_p13 }
  0xbc   :  { %10037 = shalt.err (!%p10034_p3)
}
  0xbd   :  { %s10135_s7 = smov 256   ;;  %s10136_s3 = smov 16  }
  0xbe   :  { %127 = dma.hbm_to_vmem [thread:$0]  %s10637_s9, 28672, %s122_s26, [#allocation14], %s10135_s7, %s10135_s7, %s10136_s3  }
  0xbf   :  { %s10137_s28 = smov [#allocation18]   ;;  %s10038_s19 = scalar_lea.hbm %s10639_s11, 4096 }
  0xc0   :  { %s143_s10 = sshll.u32 %s10137_s28, 4  ;;  %p10039_p4 = scmp.ne.s32.totalorder %s10639_s11, %s10038_s19  ;;  %s144_s10 = int_to_ptr.vmem [resolvable:$true] %s143_s10 }
  0xc1   :  { %p10042_p5 = scmp.lt.u32.totalorder %s10038_s19, %s10639_s11 }
  0xc3   :  { %p10044_p6 = pnand %p10042_p5, %p10039_p4 }
  0xc5   :  { %10047 = shalt.err (!%p10044_p6)
}
  0xc6   :  { %s10048_s5 = scalar_lea.vmem %s144_s10, 4096  ;;  %p10053_p8 = scmp.lt.s32.totalorder %s144_s10, %s144_s10 }
  0xc7   :  { %p10049_p7 = scmp.ne.s32.totalorder %s144_s10, %s10048_s5  ;;  %p10054_p9 = scmp.lt.s32.totalorder %s10048_s5, %s10048_s5 }
  0xc9   :  { %p10055_p10 = por %p10054_p9, %p10053_p8 }
  0xcb   :  { %p10056_p11 = pnand %p10055_p10, %p10049_p7 }
  0xcd   :  { %10059 = shalt.err (!%p10056_p11)
}
  0xce   :  { %s10138_s9 = smov 64   ;;  %s10139_s26 = smov 4  }
  0xcf   :  { %149 = dma.hbm_to_vmem [thread:$0]  %s10639_s11, 4096, %s144_s10, [#allocation17], %s10138_s9, %s10138_s9, %s10139_s26  }
  0xd0   :  { %s10140_s23 = smov [#allocation21]   ;;  %s10141_s12 = smov [#allocation22]  }
  0xd1   :  { %s165_s24 = sshll.u32 %s10140_s23, 4  ;;  %s178_s21 = sshll.u32 %s10141_s12, 4  ;;  %s166_s24 = int_to_ptr.vmem [resolvable:$true] %s165_s24  ;;  %s179_s21 = int_to_ptr.vmem [resolvable:$true] %s178_s21 }
  0xd2   :  { %s10060_s25 = scalar_lea.hbm %s10641_s13, 1024 }
  0xd3   :  { %p10061_p12 = scmp.ne.s32.totalorder %s10641_s13, %s10060_s25  ;;  %p10064_p13 = scmp.lt.u32.totalorder %s10060_s25, %s10641_s13 }
  0xd5   :  { %p10066_p0 = pnand %p10064_p13, %p10061_p12 }
  0xd7   :  { %10069 = shalt.err (!%p10066_p0)
}
  0xd8   :  { %s10070_s11 = scalar_lea.vmem %s166_s24, 1024  ;;  %p10075_p2 = scmp.lt.s32.totalorder %s166_s24, %s166_s24 }
  0xd9   :  { %p10071_p1 = scmp.ne.s32.totalorder %s166_s24, %s10070_s11  ;;  %p10076_p3 = scmp.lt.s32.totalorder %s10070_s11, %s10070_s11 }
  0xdb   :  { %p10077_p4 = por %p10076_p3, %p10075_p2 }
  0xdd   :  { %p10078_p5 = pnand %p10077_p4, %p10071_p1 }
  0xdf   :  { %10081 = shalt.err (!%p10078_p5)
}
  0xe0   :  { %171 = dma.hbm_to_vmem [thread:$0]  %s10641_s13, 1024, %s166_s24, [#allocation20], %s10138_s9, %s10138_s9, %s10139_s26  }
  0xe1   :  { %s10082_s1 = scalar_lea.hbm %s10642_s14, 16 }
  0xe2   :  { %p10083_p6 = scmp.ne.s32.totalorder %s10642_s14, %s10082_s1  ;;  %p10086_p7 = scmp.lt.u32.totalorder %s10082_s1, %s10642_s14 }
  0xe4   :  { %p10088_p8 = pnand %p10086_p7, %p10083_p6 }
  0xe6   :  { %10091 = shalt.err (!%p10088_p8)
}
  0xe7   :  { %s10092_s20 = scalar_lea.vmem %s179_s21, 16  ;;  %s10096_s5 = scalar_lea.vmem %s179_s21, 32 }
  0xe8   :  { %p10093_p9 = scmp.ne.s32.totalorder %s179_s21, %s10092_s20  ;;  %p10097_p10 = scmp.lt.s32.totalorder %s179_s21, %s179_s21 }
  0xe9   :  { %p10098_p11 = scmp.lt.s32.totalorder %s10096_s5, %s10092_s20 }
  0xeb   :  { %p10099_p12 = por %p10098_p11, %p10097_p10 }
  0xed   :  { %p10100_p13 = pnand %p10099_p12, %p10093_p9 }
  0xef   :  { %10103 = shalt.err (!%p10100_p13)
}
  0xf0   :  { %181 = dma.hbm_to_vmem [thread:$0]  %s10642_s14, 16, %s179_s21, [#allocation23]  }
  0xf1   :  { %10104 = dma.done.wait [#allocation3], 64  }
  0xf2   :  { %10105 = vsyncadd [#allocation3], 4294967232 }
  0xf3   :  { %10106 = dma.done.wait [#allocation5], 3088  }
  0xf4   :  { %10107 = vsyncadd [#allocation5], 4294964208 }
  0xf5   :  { %10108 = dma.done.wait [#allocation8], 21552  }
  0xf6   :  { %10109 = vsyncadd [#allocation8], 4294945744 }
  0xf7   :  { %10110 = dma.done.wait [#allocation11], 50288  }
  0xf8   :  { %10111 = vsyncadd [#allocation11], 4294917008 }
  0xf9   :  { %10112 = dma.done.wait [#allocation14], 28784  }
  0xfa   :  { %10113 = vsyncadd [#allocation14], 4294938512 }
  0xfb   :  { %10114 = dma.done.wait [#allocation17], 4160  }
  0xfc   :  { %10115 = vsyncadd [#allocation17], 4294963136 }
  0xfd   :  { %10116 = dma.done.wait [#allocation20], 1040  }
  0xfe   :  { %10117 = vsyncadd [#allocation20], 4294966256 }
  0xff   :  { %10118 = dma.done.wait [#allocation23], 16  }
 0x100   :  { %10119 = vsyncadd [#allocation23], 4294967280  ;;  %v10142_v0 = vmov 0.0   ;;  %vm10143_vm0 = vmmov 0   ;;  %vm239_vm1 = vcmask 1043456   ;;  %v225_v2 = vld [vmem:[%s10628_s0] sm:$0xff] }
 0x101   :  { %8387 = vmatprep.subr.bf16.mxu0 %v10142_v0  ;;  %8389 = vmatprep.mubr.msk.bf16.mxu0 %vm10143_vm0, %v10142_v0  ;;  %v226_v1 = vld [vmem:[#allocation2] sm:$0xf]  ;;  %vm235_vm2 = vcmask 64512   ;;  %v228_v4 = vpack.c.bf16 %v225_v2, %v225_v2  ;;  %v8586_v5 = vld [vmem:[#allocation6 + $0x4] ss:$12 sps:$4 sm:$0xff]   ;;  %v10144_v29 = vmov 0  }
 0x102   :  { %v241_v3 = vsel %vm239_vm1, %v226_v1, 0  ;;  %v8588_v6 = vld [vmem:[#allocation6] ss:$12 sps:$4 sm:$0xff]   ;;  %v8589_v7 = vld [vmem:[#allocation6 + $0x8] ss:$12 sps:$4 sm:$0xff]   ;;  %462 = vmatprep.subr.bf16.mxu1 %v8586_v5  ;;  %494 = vmatprep.mubr.bf16.mxu1 %v10144_v29 }
 0x103   :  { %8388 = vmatpush3.bf16.msra.mxu0 %v241_v3  ;;  %v8590_v8 = vld [vmem:[#allocation6 + $0x1c] ss:$12 sps:$4 sm:$0xff]   ;;  %463 = vmatpush1.bf16.msra.mxu1 %v8588_v6  ;;  %v8592_v9 = vld [vmem:[#allocation6 + $0x18] ss:$12 sps:$4 sm:$0xff]   ;;  %v8593_v10 = vld [vmem:[#allocation6 + $0x20] ss:$12 sps:$4 sm:$0xff]  }
 0x104   :  { %8393 = vmatprep.subr.bf16.mxu0 %v10142_v0  ;;  %464 = vmatprep.subr.bf16.mxu1 %v8590_v8  ;;  %v8594_v11 = vld [vmem:[#allocation6 + $0x34] ss:$12 sps:$4 sm:$0xff]   ;;  %v8596_v12 = vld [vmem:[#allocation6 + $0x30] ss:$12 sps:$4 sm:$0xff]   ;;  %v8597_v13 = vld [vmem:[#allocation6 + $0x38] ss:$12 sps:$4 sm:$0xff]  }
 0x105   :  { %v8598_v14 = vld [vmem:[#allocation6 + $0x4c] ss:$12 sps:$4 sm:$0xff]   ;;  %v8600_v15 = vld [vmem:[#allocation6 + $0x48] ss:$12 sps:$4 sm:$0xff]   ;;  %v8601_v16 = vld [vmem:[#allocation6 + $0x50] ss:$12 sps:$4 sm:$0xff]  }
 0x106   :  { %8390 = vmatmul.mubr.msk.bf16.vlgmr.msra.gmra.mrb[0].mxu0 %vm235_vm2, %v228_v4  ;;  %v8602_v17 = vld [vmem:[#allocation6 + $0x64] ss:$12 sps:$4 sm:$0xff]   ;;  %v8604_v18 = vld [vmem:[#allocation6 + $0x60] ss:$12 sps:$4 sm:$0xff]   ;;  %v8605_v19 = vld [vmem:[#allocation6 + $0x68] ss:$12 sps:$4 sm:$0xff]  }
 0x107   :  { %8394 = vmatpush3.bf16.msra.mxu0 %v8589_v7  ;;  %8409 = vmatprep.mubr.msk.bf16.mxu0 %vm10143_vm0, %v10142_v0  ;;  %v8606_v20 = vld [vmem:[#allocation6 + $0x7c] ss:$12 sps:$4 sm:$0xff]   ;;  %v8608_v21 = vld [vmem:[#allocation6 + $0x78] ss:$12 sps:$4 sm:$0xff]   ;;  %v8609_v22 = vld [vmem:[#allocation6 + $0x80] ss:$12 sps:$4 sm:$0xff]  }
 0x108   :  { %8395 = vmatprep.subr.bf16.mxu0 %v10142_v0  ;;  %465 = vmatpush1.bf16.msra.mxu1 %v8592_v9  ;;  %v8610_v23 = vld [vmem:[#allocation6 + $0x94] ss:$12 sps:$4 sm:$0xff]   ;;  %v8612_v24 = vld [vmem:[#allocation6 + $0x90] ss:$12 sps:$4 sm:$0xff]   ;;  %v8613_v25 = vld [vmem:[#allocation6 + $0x98] ss:$12 sps:$4 sm:$0xff]  }
 0x109   :  { %466 = vmatprep.subr.bf16.mxu1 %v8594_v11  ;;  %v8614_v26 = vld [vmem:[#allocation6 + $0xac] ss:$12 sps:$4 sm:$0xff]   ;;  %v8616_v27 = vld [vmem:[#allocation6 + $0xa8] ss:$12 sps:$4 sm:$0xff]   ;;  %v8617_v28 = vld [vmem:[#allocation6 + $0xb0] ss:$12 sps:$4 sm:$0xff]  }
 0x10a   :  { %v8620_v30 = vld [vmem:[#allocation9 + $0x4] ss:$28 sps:$4 sm:$0xff]   ;;  %v8623_v31 = vld [vmem:[#allocation9 + $0xc] ss:$28 sps:$4 sm:$0xff]   ;;  %v7365_v32 = vld [vmem:[#allocation4] ss:$0 sm:$0xff] }
 0x10b   :  { %8396 = vmatpush3.bf16.msra.mxu0 %v8593_v10  ;;  %v8618_v38 = vld [vmem:[#allocation9] ss:$28 sps:$4 sm:$0xff]   ;;  %v8621_v39 = vld [vmem:[#allocation9 + $0x8] ss:$28 sps:$4 sm:$0xff]   ;;  %v8624_v44 = vld [vmem:[#allocation9 + $0x38] ss:$28 sps:$4 sm:$0xff]  }
 0x10c   :  { %8397 = vmatprep.subr.bf16.mxu0 %v10142_v0  ;;  %467 = vmatpush1.bf16.msra.mxu1 %v8596_v12  ;;  %v8626_v40 = vld [vmem:[#allocation9 + $0x3c] ss:$28 sps:$4 sm:$0xff]   ;;  %v8629_v41 = vld [vmem:[#allocation9 + $0x44] ss:$28 sps:$4 sm:$0xff]   ;;  %v8632_v46 = vld [vmem:[#allocation9 + $0x74] ss:$28 sps:$4 sm:$0xff]  }
 0x10d   :  { %468 = vmatprep.subr.bf16.mxu1 %v8598_v14  ;;  %v8627_v45 = vld [vmem:[#allocation9 + $0x40] ss:$28 sps:$4 sm:$0xff]   ;;  %v8630_v48 = vld [vmem:[#allocation9 + $0x70] ss:$28 sps:$4 sm:$0xff]   ;;  %v8633_v49 = vld [vmem:[#allocation9 + $0x78] ss:$28 sps:$4 sm:$0xff]  }
 0x10e   :  { %v8635_v47 = vld [vmem:[#allocation9 + $0x7c] ss:$28 sps:$4 sm:$0xff]   ;;  %v8638_v50 = vld [vmem:[#allocation9 + $0xac] ss:$28 sps:$4 sm:$0xff]   ;;  %v8641_v51 = vld [vmem:[#allocation9 + $0xb4] ss:$28 sps:$4 sm:$0xff]  }
 0x10f   :  { %8398 = vmatpush3.bf16.msra.mxu0 %v8597_v13  ;;  %v8636_v52 = vld [vmem:[#allocation9 + $0xa8] ss:$28 sps:$4 sm:$0xff]   ;;  %v8639_v53 = vld [vmem:[#allocation9 + $0xb0] ss:$28 sps:$4 sm:$0xff]   ;;  %v8642_v56 = vld [vmem:[#allocation9 + $0xe0] ss:$28 sps:$4 sm:$0xff]  }
 0x110   :  { %8399 = vmatprep.subr.bf16.mxu0 %v10142_v0  ;;  %469 = vmatpush1.bf16.msra.mxu1 %v8600_v15  ;;  %v8644_v54 = vld [vmem:[#allocation9 + $0xe4] ss:$28 sps:$4 sm:$0xff]   ;;  %v8647_v55 = vld [vmem:[#allocation9 + $0xec] ss:$28 sps:$4 sm:$0xff]   ;;  %v8650_v58 = vld [vmem:[#allocation9 + $0x11c] ss:$28 sps:$4 sm:$0xff]  }
 0x111   :  { %470 = vmatprep.subr.bf16.mxu1 %v8602_v17  ;;  %v8645_v57 = vld [vmem:[#allocation9 + $0xe8] ss:$28 sps:$4 sm:$0xff]   ;;  %v8648_v60 = vld [vmem:[#allocation9 + $0x118] ss:$28 sps:$4 sm:$0xff]   ;;  %v8651_v61 = vld [vmem:[#allocation9 + $0x120] ss:$28 sps:$4 sm:$0xff]  }
 0x112   :  { %v8653_v59 = vld [vmem:[#allocation9 + $0x124] ss:$28 sps:$4 sm:$0xff]   ;;  %v8656_v62 = vld [vmem:[#allocation9 + $0x154] ss:$28 sps:$4 sm:$0xff]   ;;  %v8659_v63 = vld [vmem:[#allocation9 + $0x15c] ss:$28 sps:$4 sm:$0xff]  }
 0x113   :  { %8400 = vmatpush3.bf16.msra.mxu0 %v8601_v16  ;;  %v8654_v1 = vld [vmem:[#allocation9 + $0x150] ss:$28 sps:$4 sm:$0xff]   ;;  %v8657_v2 = vld [vmem:[#allocation9 + $0x158] ss:$28 sps:$4 sm:$0xff]   ;;  %v8660_v5 = vld [vmem:[#allocation9 + $0x188] ss:$28 sps:$4 sm:$0xff]  }
 0x114   :  { %8401 = vmatprep.subr.bf16.mxu0 %v10142_v0  ;;  %471 = vmatpush1.bf16.msra.mxu1 %v8604_v18  ;;  %v8662_v3 = vld [vmem:[#allocation9 + $0x18c] ss:$28 sps:$4 sm:$0xff]   ;;  %v8665_v4 = vld [vmem:[#allocation9 + $0x194] ss:$28 sps:$4 sm:$0xff]   ;;  %v8668_v7 = vld [vmem:[#allocation9 + $0x1c4] ss:$28 sps:$4 sm:$0xff]  }
 0x115   :  { %472 = vmatprep.subr.bf16.mxu1 %v8606_v20  ;;  %v8663_v6 = vld [vmem:[#allocation9 + $0x190] ss:$28 sps:$4 sm:$0xff]   ;;  %v8666_v9 = vld [vmem:[#allocation9 + $0x1c0] ss:$28 sps:$4 sm:$0xff]   ;;  %v8669_v10 = vld [vmem:[#allocation9 + $0x1c8] ss:$28 sps:$4 sm:$0xff]  }
 0x116   :  { %v8671_v8 = vld [vmem:[#allocation9 + $0x1cc] ss:$28 sps:$4 sm:$0xff]   ;;  %v8674_v11 = vld [vmem:[#allocation9 + $0x1fc] ss:$28 sps:$4 sm:$0xff]   ;;  %v8677_v12 = vld [vmem:[#allocation9 + $0x204] ss:$28 sps:$4 sm:$0xff]  }
 0x117   :  { %8402 = vmatpush3.bf16.msra.mxu0 %v8605_v19  ;;  %v8672_v13 = vld [vmem:[#allocation9 + $0x1f8] ss:$28 sps:$4 sm:$0xff]   ;;  %v8675_v14 = vld [vmem:[#allocation9 + $0x200] ss:$28 sps:$4 sm:$0xff]   ;;  %v8678_v17 = vld [vmem:[#allocation9 + $0x230] ss:$28 sps:$4 sm:$0xff]  }
 0x118   :  { %8403 = vmatprep.subr.bf16.mxu0 %v10142_v0  ;;  %473 = vmatpush1.bf16.msra.mxu1 %v8608_v21  ;;  %v8680_v15 = vld [vmem:[#allocation9 + $0x234] ss:$28 sps:$4 sm:$0xff]   ;;  %v8683_v16 = vld [vmem:[#allocation9 + $0x23c] ss:$28 sps:$4 sm:$0xff]   ;;  %v8686_v19 = vld [vmem:[#allocation9 + $0x26c] ss:$28 sps:$4 sm:$0xff]  }
 0x119   :  { %474 = vmatprep.subr.bf16.mxu1 %v8610_v23  ;;  %v8681_v18 = vld [vmem:[#allocation9 + $0x238] ss:$28 sps:$4 sm:$0xff]   ;;  %v8684_v21 = vld [vmem:[#allocation9 + $0x268] ss:$28 sps:$4 sm:$0xff]  }
 0x11a   :  { %v8689_v20 = vld [vmem:[#allocation9 + $0x274] ss:$28 sps:$4 sm:$0xff]   ;;  %v8692_v23 = vld [vmem:[#allocation9 + $0x2a4] ss:$28 sps:$4 sm:$0xff]  }
 0x11b   :  { %8404 = vmatpush3.bf16.msra.mxu0 %v8609_v22  ;;  %v8687_v22 = vld [vmem:[#allocation9 + $0x270] ss:$28 sps:$4 sm:$0xff]  }
 0x11c   :  { %8405 = vmatprep.subr.bf16.mxu0 %v10142_v0  ;;  %475 = vmatpush1.bf16.msra.mxu1 %v8612_v24  ;;  %v8695_v24 = vld [vmem:[#allocation9 + $0x2ac] ss:$28 sps:$4 sm:$0xff]  }
 0x11d   :  { %476 = vmatprep.subr.bf16.mxu1 %v8614_v26  ;;  %v8693_v26 = vld [vmem:[#allocation9 + $0x2a8] ss:$28 sps:$4 sm:$0xff]  }
 0x11f   :  { %8406 = vmatpush3.bf16.msra.mxu0 %v8613_v25  ;;  %v8690_v25 = vld [vmem:[#allocation9 + $0x2a0] ss:$28 sps:$4 sm:$0xff]  }
 0x120   :  { %8407 = vmatprep.subr.bf16.mxu0 %v10142_v0  ;;  %477 = vmatpush1.bf16.msra.mxu1 %v8616_v27  ;;  %v8698_v27 = vld [vmem:[#allocation9 + $0x2dc] ss:$28 sps:$4 sm:$0xff]  }
 0x121   :  { %1648 = vmatprep.subr.bf16.mxu1 %v8620_v30  ;;  %v8696_v30 = vld [vmem:[#allocation9 + $0x2d8] ss:$28 sps:$4 sm:$0xff]  }
 0x123   :  { %8408 = vmatpush3.bf16.msra.mxu0 %v8617_v28  ;;  %v8701_v28 = vld [vmem:[#allocation9 + $0x2e4] ss:$28 sps:$4 sm:$0xff]  }
 0x124   :  { %1730 = vmatprep.subr.bf16.mxu0 %v8623_v31  ;;  %v8699_v31 = vld [vmem:[#allocation9 + $0x2e0] ss:$28 sps:$4 sm:$0xff]  }
 0x1d9   :  { %v277_v33 = vpop.f32.mrb[0].mxu0 }
 0x1da   :  { %v278_v34 = vadd.f32 %v7365_v32, %v277_v33  ;;  %v8391_v35 = vpop.f32.mrb[1].mxu0  ;;  %v8704_v32 = vld [vmem:[#allocation9 + $0x314] ss:$28 sps:$4 sm:$0xff]   ;;  %v8707_v33 = vld [vmem:[#allocation9 + $0x31c] ss:$28 sps:$4 sm:$0xff]  }
 0x1db   :  { %v280_v36 = vpop.f32.mrb[2].mxu0  ;;  %v8705_v35 = vld [vmem:[#allocation9 + $0x318] ss:$28 sps:$4 sm:$0xff]  }
 0x1dc   :  { %9794 = vtanh.f32 %v278_v34  ;;  %v8392_v37 = vpop.f32.mrb[3].mxu0  ;;  %v8702_v34 = vld [vmem:[#allocation9 + $0x310] ss:$28 sps:$4 sm:$0xff]  }
 0x1dd   :  { %v8710_v36 = vld [vmem:[#allocation9 + $0x34c] ss:$28 sps:$4 sm:$0xff]   ;;  %v8713_v37 = vld [vmem:[#allocation9 + $0x354] ss:$28 sps:$4 sm:$0xff]  }
 0x1e6   :  { %v9795_v42 = vpop.eup %9794 }
 0x1e7   :  { %v317_v43 = vpack.c.bf16 %v9795_v42, %v9795_v42  ;;  %v319_v42 = vlaneseq }
 0x1e9   :  { %495 = vmatmul.mubr.bf16.vlgmr.msra.gmra.mrb[0].mxu1 %v317_v43  ;;  %8410 = vmatmul.mubr.bf16.vlgmr.msra.gmra.mrb[4].mxu0 %v317_v43  ;;  %v10417_v43 = vshrl.u32 %v319_v42, 7  ;;  %v8766_v42 = vld [vmem:[#allocation9 + $0x18] ss:$28 sps:$4 sm:$0xff]  }
 0x1ea   :  { %1649 = vmatpush1.bf16.msra.mxu1 %v8618_v38  ;;  %1731 = vmatpush1.bf16.msra.mxu0 %v8621_v39  ;;  %v8708_v38 = vld [vmem:[#allocation9 + $0x348] ss:$28 sps:$4 sm:$0xff]   ;;  %v8711_v39 = vld [vmem:[#allocation9 + $0x350] ss:$28 sps:$4 sm:$0xff]  }
 0x1eb   :  { %1650 = vmatprep.subr.bf16.mxu1 %v8626_v40  ;;  %1732 = vmatprep.subr.bf16.mxu0 %v8629_v41  ;;  %v8716_v40 = vld [vmem:[#allocation9 + $0x384] ss:$28 sps:$4 sm:$0xff]   ;;  %v8719_v41 = vld [vmem:[#allocation9 + $0x38c] ss:$28 sps:$4 sm:$0xff]  }
 0x1ee   :  { %1651 = vmatpush1.bf16.msra.mxu1 %v8624_v44  ;;  %1733 = vmatpush1.bf16.msra.mxu0 %v8627_v45  ;;  %v10420_v44 = vsub.s32 0, %v10417_v43  ;;  %v10422_v45 = vld [vmem:[#allocation7] sm:$0x7] }
 0x1ef   :  { %1652 = vmatprep.subr.bf16.mxu1 %v8632_v46  ;;  %1734 = vmatprep.subr.bf16.mxu0 %v8635_v47  ;;  %v10425_v46 = vsub.s32 1, %v10417_v43 }
 0x1f0   :  { %v322_v47 = vrot.slane %v10422_v45, %v10420_v44 }
 0x1f2   :  { %1653 = vmatpush1.bf16.msra.mxu1 %v8630_v48  ;;  %1735 = vmatpush1.bf16.msra.mxu0 %v8633_v49  ;;  %v326_v48 = vrot.slane %v10422_v45, %v10425_v46 }
 0x1f3   :  { %1654 = vmatprep.subr.bf16.mxu1 %v8638_v50  ;;  %1736 = vmatprep.subr.bf16.mxu0 %v8641_v51 }
 0x1f6   :  { %1655 = vmatpush1.bf16.msra.mxu1 %v8636_v52  ;;  %1737 = vmatpush1.bf16.msra.mxu0 %v8639_v53 }
 0x1f7   :  { %1656 = vmatprep.subr.bf16.mxu1 %v8644_v54  ;;  %1738 = vmatprep.subr.bf16.mxu0 %v8647_v55 }
 0x1fa   :  { %1657 = vmatpush1.bf16.msra.mxu1 %v8642_v56  ;;  %1739 = vmatpush1.bf16.msra.mxu0 %v8645_v57 }
 0x1fb   :  { %1658 = vmatprep.subr.bf16.mxu1 %v8650_v58  ;;  %1740 = vmatprep.subr.bf16.mxu0 %v8653_v59 }
 0x1fe   :  { %1659 = vmatpush1.bf16.msra.mxu1 %v8648_v60  ;;  %1741 = vmatpush1.bf16.msra.mxu0 %v8651_v61 }
 0x1ff   :  { %1660 = vmatprep.subr.bf16.mxu1 %v8656_v62  ;;  %1742 = vmatprep.subr.bf16.mxu0 %v8659_v63 }
 0x202   :  { %1661 = vmatpush1.bf16.msra.mxu1 %v8654_v1  ;;  %1743 = vmatpush1.bf16.msra.mxu0 %v8657_v2  ;;  %v8714_v1 = vld [vmem:[#allocation9 + $0x380] ss:$28 sps:$4 sm:$0xff]   ;;  %v8717_v2 = vld [vmem:[#allocation9 + $0x388] ss:$28 sps:$4 sm:$0xff]  }
 0x203   :  { %1662 = vmatprep.subr.bf16.mxu1 %v8662_v3  ;;  %1744 = vmatprep.subr.bf16.mxu0 %v8665_v4  ;;  %v8722_v4 = vld [vmem:[#allocation9 + $0x3bc] ss:$28 sps:$4 sm:$0xff]  }
 0x206   :  { %1663 = vmatpush1.bf16.msra.mxu1 %v8660_v5  ;;  %1745 = vmatpush1.bf16.msra.mxu0 %v8663_v6  ;;  %v8725_v5 = vld [vmem:[#allocation9 + $0x3c4] ss:$28 sps:$4 sm:$0xff]   ;;  %v8720_v6 = vld [vmem:[#allocation9 + $0x3b8] ss:$28 sps:$4 sm:$0xff]  }
 0x207   :  { %1664 = vmatprep.subr.bf16.mxu1 %v8668_v7  ;;  %1746 = vmatprep.subr.bf16.mxu0 %v8671_v8  ;;  %v8723_v7 = vld [vmem:[#allocation9 + $0x3c0] ss:$28 sps:$4 sm:$0xff]   ;;  %v8728_v8 = vld [vmem:[#allocation9 + $0x3f4] ss:$28 sps:$4 sm:$0xff]  }
 0x20a   :  { %1665 = vmatpush1.bf16.msra.mxu1 %v8666_v9  ;;  %1747 = vmatpush1.bf16.msra.mxu0 %v8669_v10  ;;  %v8731_v9 = vld [vmem:[#allocation9 + $0x3fc] ss:$28 sps:$4 sm:$0xff]   ;;  %v8726_v10 = vld [vmem:[#allocation9 + $0x3f0] ss:$28 sps:$4 sm:$0xff]  }
 0x20b   :  { %1666 = vmatprep.subr.bf16.mxu1 %v8674_v11  ;;  %1748 = vmatprep.subr.bf16.mxu0 %v8677_v12  ;;  %v8729_v11 = vld [vmem:[#allocation9 + $0x3f8] ss:$28 sps:$4 sm:$0xff]   ;;  %v8734_v12 = vld [vmem:[#allocation9 + $0x42c] ss:$28 sps:$4 sm:$0xff]  }
 0x20e   :  { %1667 = vmatpush1.bf16.msra.mxu1 %v8672_v13  ;;  %1749 = vmatpush1.bf16.msra.mxu0 %v8675_v14  ;;  %v8737_v13 = vld [vmem:[#allocation9 + $0x434] ss:$28 sps:$4 sm:$0xff]   ;;  %v8732_v14 = vld [vmem:[#allocation9 + $0x428] ss:$28 sps:$4 sm:$0xff]  }
 0x20f   :  { %1668 = vmatprep.subr.bf16.mxu1 %v8680_v15  ;;  %1750 = vmatprep.subr.bf16.mxu0 %v8683_v16  ;;  %v8735_v15 = vld [vmem:[#allocation9 + $0x430] ss:$28 sps:$4 sm:$0xff]   ;;  %v8740_v16 = vld [vmem:[#allocation9 + $0x464] ss:$28 sps:$4 sm:$0xff]  }
 0x212   :  { %1669 = vmatpush1.bf16.msra.mxu1 %v8678_v17  ;;  %1751 = vmatpush1.bf16.msra.mxu0 %v8681_v18  ;;  %v8743_v17 = vld [vmem:[#allocation9 + $0x46c] ss:$28 sps:$4 sm:$0xff]   ;;  %v10444_v18 = vsub.s32 2, %v10417_v43 }
 0x213   :  { %1670 = vmatprep.subr.bf16.mxu1 %v8686_v19  ;;  %1752 = vmatprep.subr.bf16.mxu0 %v8689_v20  ;;  %v8738_v19 = vld [vmem:[#allocation9 + $0x460] ss:$28 sps:$4 sm:$0xff]   ;;  %v8741_v20 = vld [vmem:[#allocation9 + $0x468] ss:$28 sps:$4 sm:$0xff]  }
 0x216   :  { %1671 = vmatpush1.bf16.msra.mxu1 %v8684_v21  ;;  %1753 = vmatpush1.bf16.msra.mxu0 %v8687_v22  ;;  %v8746_v21 = vld [vmem:[#allocation9 + $0x49c] ss:$28 sps:$4 sm:$0xff]   ;;  %v8749_v22 = vld [vmem:[#allocation9 + $0x4a4] ss:$28 sps:$4 sm:$0xff]  }
 0x217   :  { %1672 = vmatprep.subr.bf16.mxu1 %v8692_v23  ;;  %1754 = vmatprep.subr.bf16.mxu0 %v8695_v24  ;;  %v330_v23 = vrot.slane %v10422_v45, %v10444_v18  ;;  %v8744_v24 = vld [vmem:[#allocation9 + $0x498] ss:$28 sps:$4 sm:$0xff]   ;;  %v8769_v45 = vld [vmem:[#allocation9 + $0x4c] ss:$28 sps:$4 sm:$0xff]  }
 0x21a   :  { %1673 = vmatpush1.bf16.msra.mxu1 %v8690_v25  ;;  %1755 = vmatpush1.bf16.msra.mxu0 %v8693_v26  ;;  %v8747_v25 = vld [vmem:[#allocation9 + $0x4a0] ss:$28 sps:$4 sm:$0xff]   ;;  %v8752_v26 = vld [vmem:[#allocation9 + $0x4d4] ss:$28 sps:$4 sm:$0xff]  }
 0x21b   :  { %1674 = vmatprep.subr.bf16.mxu1 %v8698_v27  ;;  %1756 = vmatprep.subr.bf16.mxu0 %v8701_v28  ;;  %v8755_v27 = vld [vmem:[#allocation9 + $0x4dc] ss:$28 sps:$4 sm:$0xff]  }
 0x21e   :  { %1675 = vmatpush1.bf16.msra.mxu1 %v8696_v30  ;;  %1757 = vmatpush1.bf16.msra.mxu0 %v8699_v31  ;;  %v8750_v30 = vld [vmem:[#allocation9 + $0x4d0] ss:$28 sps:$4 sm:$0xff]   ;;  %v8753_v31 = vld [vmem:[#allocation9 + $0x4d8] ss:$28 sps:$4 sm:$0xff]  }
 0x21f   :  { %1676 = vmatprep.subr.bf16.mxu1 %v8704_v32  ;;  %1758 = vmatprep.subr.bf16.mxu0 %v8707_v33  ;;  %v8758_v32 = vld [vmem:[#allocation9 + $0x50c] ss:$28 sps:$4 sm:$0xff]   ;;  %v8761_v33 = vld [vmem:[#allocation9 + $0x514] ss:$28 sps:$4 sm:$0xff]  }
 0x222   :  { %1677 = vmatpush1.bf16.msra.mxu1 %v8702_v34  ;;  %1759 = vmatpush1.bf16.msra.mxu0 %v8705_v35  ;;  %v8756_v35 = vld [vmem:[#allocation9 + $0x508] ss:$28 sps:$4 sm:$0xff]  }
 0x223   :  { %1678 = vmatprep.subr.bf16.mxu1 %v8710_v36  ;;  %1760 = vmatprep.subr.bf16.mxu0 %v8713_v37  ;;  %v8759_v36 = vld [vmem:[#allocation9 + $0x510] ss:$28 sps:$4 sm:$0xff]  }
 0x224   :  { %v8764_v37 = vld [vmem:[#allocation9 + $0x14] ss:$28 sps:$4 sm:$0xff]  }
 0x226   :  { %1679 = vmatpush1.bf16.msra.mxu1 %v8708_v38  ;;  %1761 = vmatpush1.bf16.msra.mxu0 %v8711_v39  ;;  %v8765_v38 = vld [vmem:[#allocation9 + $0x1d8] ss:$28 sps:$4 sm:$0xff]  }
 0x227   :  { %1689 = vmatprep.subr.bf16.mxu1 %v8716_v40  ;;  %1771 = vmatprep.subr.bf16.mxu0 %v8719_v41  ;;  %v8762_v40 = vld [vmem:[#allocation9 + $0x10] ss:$28 sps:$4 sm:$0xff]  }
 0x2bc   :  { %v496_v49 = vpop.f32.mrb[0].mxu1  ;;  %v10431_v50 = vpop.f32.mrb[4].mxu0 }
 0x2bd   :  { %v497_v51 = vadd.f32 %v496_v49, %v322_v47  ;;  %v498_v52 = vpop.f32.mrb[1].mxu1  ;;  %v8411_v53 = vpop.f32.mrb[5].mxu0  ;;  %v538_v28 = vadd.f32 %v10431_v50, %v330_v23  ;;  %v8770_v47 = vld [vmem:[#allocation9 + $0x210] ss:$28 sps:$4 sm:$0xff]   ;;  %v8774_v50 = vld [vmem:[#allocation9 + $0x84] ss:$28 sps:$4 sm:$0xff]  }
 0x2be   :  { %v499_v54 = vadd.f32 %v498_v52, %v326_v48  ;;  %v500_v55 = vpop.f32.mrb[2].mxu1  ;;  %v540_v56 = vpop.f32.mrb[6].mxu0  ;;  %v8767_v48 = vld [vmem:[#allocation9 + $0x48] ss:$28 sps:$4 sm:$0xff]   ;;  %v8771_v49 = vld [vmem:[#allocation9 + $0x50] ss:$28 sps:$4 sm:$0xff]  }
 0x2bf   :  { %vm543_vm3 = vcmp.gt.f32.partialorder %v497_v51, 0.0  ;;  %v546_v57 = vmul.f32 0.01, %v497_v51  ;;  %v501_v59 = vpop.f32.mrb[3].mxu1  ;;  %v8412_v60 = vpop.f32.mrb[7].mxu0  ;;  %vm545_vm5 = vcmp.gt.f32.partialorder %v538_v28, 0.0 }
 0x2c0   :  { %vm544_vm4 = vcmp.gt.f32.partialorder %v499_v54, 0.0  ;;  %v547_v58 = vmul.f32 0.01, %v499_v54  ;;  %v548_v34 = vmul.f32 0.01, %v538_v28 }
 0x2c1   :  { %v549_v61 = vsel %vm543_vm3, %v497_v51, %v546_v57  ;;  %v8775_v51 = vld [vmem:[#allocation9 + $0x248] ss:$28 sps:$4 sm:$0xff]   ;;  %v8772_v52 = vld [vmem:[#allocation9 + $0x80] ss:$28 sps:$4 sm:$0xff]   ;;  %v8777_v56 = vld [vmem:[#allocation9 + $0xb8] ss:$28 sps:$4 sm:$0xff]  }
 0x2c2   :  { %v550_v62 = vsel %vm544_vm4, %v499_v54, %v547_v58  ;;  %v10435_v3 = vpack.c.bf16 %v549_v61, %v549_v61  ;;  %v551_v39 = vsel %vm545_vm5, %v538_v28, %v548_v34  ;;  %v8776_v53 = vld [vmem:[#allocation9 + $0x88] ss:$28 sps:$4 sm:$0xff]   ;;  %v8779_v54 = vld [vmem:[#allocation9 + $0xbc] ss:$28 sps:$4 sm:$0xff]   ;;  %v8784_v58 = vld [vmem:[#allocation9 + $0xf4] ss:$28 sps:$4 sm:$0xff]  }
 0x2c3   :  { %v10433_v63 = vpack.c.bf16 %v550_v62, %v550_v62  ;;  %v10449_v41 = vpack.c.bf16 %v551_v39, %v551_v39  ;;  %v8780_v55 = vld [vmem:[#allocation9 + $0x280] ss:$28 sps:$4 sm:$0xff]   ;;  %v8785_v59 = vld [vmem:[#allocation9 + $0x2b8] ss:$28 sps:$4 sm:$0xff]   ;;  %v8782_v60 = vld [vmem:[#allocation9 + $0xf0] ss:$28 sps:$4 sm:$0xff]  }
 0x2c4   :  { %v8781_v57 = vld [vmem:[#allocation9 + $0xc0] ss:$28 sps:$4 sm:$0xff]   ;;  %v8786_v61 = vld [vmem:[#allocation9 + $0xf8] ss:$28 sps:$4 sm:$0xff]   ;;  %v8789_v62 = vld [vmem:[#allocation9 + $0x12c] ss:$28 sps:$4 sm:$0xff]  }
 0x2c5   :  { %1680 = vmatprep.mubr.bf16.mxu1 %v10433_v63  ;;  %1762 = vmatprep.mubr.bf16.mxu0 %v10433_v63  ;;  %v8814_v23 = vld [vmem:[#allocation9 + $0x278] ss:$28 sps:$4 sm:$0xff]   ;;  %v8824_v28 = vld [vmem:[#allocation9 + $0x2ec] ss:$28 sps:$4 sm:$0xff]  }
 0x2c6   :  { %1681 = vmatmul.mubr.bf16.vlgmr.msra.gmra.mrb[4].mxu1 %v10435_v3  ;;  %1763 = vmatmul.mubr.bf16.vlgmr.msra.gmra.mrb[8].mxu0 %v10435_v3  ;;  %v8829_v34 = vld [vmem:[#allocation9 + $0x4e8] ss:$28 sps:$4 sm:$0xff]  }
 0x2c7   :  { %1690 = vmatpush1.bf16.msra.mxu1 %v8714_v1  ;;  %1772 = vmatpush1.bf16.msra.mxu0 %v8717_v2  ;;  %v8787_v1 = vld [vmem:[#allocation9 + $0x128] ss:$28 sps:$4 sm:$0xff]   ;;  %v8791_v2 = vld [vmem:[#allocation9 + $0x130] ss:$28 sps:$4 sm:$0xff]  }
 0x2c8   :  { %1691 = vmatprep.subr.bf16.mxu1 %v8722_v4  ;;  %1773 = vmatprep.subr.bf16.mxu0 %v8725_v5  ;;  %v8794_v4 = vld [vmem:[#allocation9 + $0x164] ss:$28 sps:$4 sm:$0xff]   ;;  %v8860_v39 = vld [vmem:[#allocation12 + $0x4] ss:$28 sps:$4 sm:$0xff]  }
 0x2c9   :  { %1721 = vmatprep.mubr.bf16.mxu1 %v10144_v29  ;;  %1803 = vmatprep.mubr.bf16.mxu0 %v10144_v29  ;;  %v8795_v5 = vld [vmem:[#allocation9 + $0x328] ss:$28 sps:$4 sm:$0xff]  }
 0x2cb   :  { %1692 = vmatpush1.bf16.msra.mxu1 %v8720_v6  ;;  %1774 = vmatpush1.bf16.msra.mxu0 %v8723_v7  ;;  %v8792_v6 = vld [vmem:[#allocation9 + $0x160] ss:$28 sps:$4 sm:$0xff]   ;;  %v8796_v7 = vld [vmem:[#allocation9 + $0x168] ss:$28 sps:$4 sm:$0xff]  }
 0x2cc   :  { %1693 = vmatprep.subr.bf16.mxu1 %v8728_v8  ;;  %1775 = vmatprep.subr.bf16.mxu0 %v8731_v9  ;;  %v8799_v8 = vld [vmem:[#allocation9 + $0x19c] ss:$28 sps:$4 sm:$0xff]  }
 0x2cd   :  { %v8800_v9 = vld [vmem:[#allocation9 + $0x360] ss:$28 sps:$4 sm:$0xff]  }
 0x2cf   :  { %1694 = vmatpush1.bf16.msra.mxu1 %v8726_v10  ;;  %1776 = vmatpush1.bf16.msra.mxu0 %v8729_v11  ;;  %v8797_v10 = vld [vmem:[#allocation9 + $0x198] ss:$28 sps:$4 sm:$0xff]   ;;  %v8801_v11 = vld [vmem:[#allocation9 + $0x1a0] ss:$28 sps:$4 sm:$0xff]  }
 0x2d0   :  { %1695 = vmatprep.subr.bf16.mxu1 %v8734_v12  ;;  %1777 = vmatprep.subr.bf16.mxu0 %v8737_v13  ;;  %v8804_v12 = vld [vmem:[#allocation9 + $0x1d4] ss:$28 sps:$4 sm:$0xff]  }
 0x2d1   :  { %v8802_v13 = vld [vmem:[#allocation9 + $0x1d0] ss:$28 sps:$4 sm:$0xff]  }
 0x2d3   :  { %1696 = vmatpush1.bf16.msra.mxu1 %v8732_v14  ;;  %1778 = vmatpush1.bf16.msra.mxu0 %v8735_v15  ;;  %v8805_v14 = vld [vmem:[#allocation9 + $0x398] ss:$28 sps:$4 sm:$0xff]   ;;  %v8808_v15 = vld [vmem:[#allocation9 + $0x20c] ss:$28 sps:$4 sm:$0xff]  }
 0x2d4   :  { %1697 = vmatprep.subr.bf16.mxu1 %v8740_v16  ;;  %1779 = vmatprep.subr.bf16.mxu0 %v8743_v17  ;;  %v8806_v16 = vld [vmem:[#allocation9 + $0x208] ss:$28 sps:$4 sm:$0xff]   ;;  %v8809_v17 = vld [vmem:[#allocation9 + $0x3d0] ss:$28 sps:$4 sm:$0xff]  }
 0x2d7   :  { %1698 = vmatpush1.bf16.msra.mxu1 %v8738_v19  ;;  %1780 = vmatpush1.bf16.msra.mxu0 %v8741_v20  ;;  %v8812_v19 = vld [vmem:[#allocation9 + $0x244] ss:$28 sps:$4 sm:$0xff]  }
 0x2d8   :  { %1699 = vmatprep.subr.bf16.mxu1 %v8746_v21  ;;  %1781 = vmatprep.subr.bf16.mxu0 %v8749_v22  ;;  %v8810_v20 = vld [vmem:[#allocation9 + $0x240] ss:$28 sps:$4 sm:$0xff]   ;;  %v8813_v21 = vld [vmem:[#allocation9 + $0x408] ss:$28 sps:$4 sm:$0xff]  }
 0x2d9   :  { %v8816_v22 = vld [vmem:[#allocation9 + $0x27c] ss:$28 sps:$4 sm:$0xff]  }
 0x2db   :  { %1700 = vmatpush1.bf16.msra.mxu1 %v8744_v24  ;;  %1782 = vmatpush1.bf16.msra.mxu0 %v8747_v25  ;;  %v8817_v24 = vld [vmem:[#allocation9 + $0x440] ss:$28 sps:$4 sm:$0xff]   ;;  %v8820_v25 = vld [vmem:[#allocation9 + $0x2b4] ss:$28 sps:$4 sm:$0xff]  }
 0x2dc   :  { %1701 = vmatprep.subr.bf16.mxu1 %v8752_v26  ;;  %1783 = vmatprep.subr.bf16.mxu0 %v8755_v27  ;;  %v8818_v26 = vld [vmem:[#allocation9 + $0x2b0] ss:$28 sps:$4 sm:$0xff]   ;;  %v8821_v27 = vld [vmem:[#allocation9 + $0x478] ss:$28 sps:$4 sm:$0xff]  }
 0x2df   :  { %1702 = vmatpush1.bf16.msra.mxu1 %v8750_v30  ;;  %1784 = vmatpush1.bf16.msra.mxu0 %v8753_v31  ;;  %v8822_v30 = vld [vmem:[#allocation9 + $0x2e8] ss:$28 sps:$4 sm:$0xff]   ;;  %v8825_v31 = vld [vmem:[#allocation9 + $0x4b0] ss:$28 sps:$4 sm:$0xff]  }
 0x2e0   :  { %1703 = vmatprep.subr.bf16.mxu1 %v8758_v32  ;;  %1785 = vmatprep.subr.bf16.mxu0 %v8761_v33  ;;  %v8828_v32 = vld [vmem:[#allocation9 + $0x324] ss:$28 sps:$4 sm:$0xff]  }
 0x2e1   :  { %v8826_v33 = vld [vmem:[#allocation9 + $0x320] ss:$28 sps:$4 sm:$0xff]  }
 0x2e3   :  { %1704 = vmatpush1.bf16.msra.mxu1 %v8756_v35  ;;  %1786 = vmatpush1.bf16.msra.mxu0 %v8759_v36  ;;  %v8832_v35 = vld [vmem:[#allocation9 + $0x35c] ss:$28 sps:$4 sm:$0xff]  }
 0x2e4   :  { %1812 = vmatprep.subr.bf16.mxu1 %v8764_v37  ;;  %8228 = vmatprep.subr.bf16.mxu0 %v8765_v38  ;;  %v8830_v36 = vld [vmem:[#allocation9 + $0x358] ss:$28 sps:$4 sm:$0xff]   ;;  %v8833_v37 = vld [vmem:[#allocation9 + $0x520] ss:$28 sps:$4 sm:$0xff]  }
 0x2e5   :  { %v8836_v38 = vld [vmem:[#allocation9 + $0x394] ss:$28 sps:$4 sm:$0xff]  }
 0x2e6   :  { %1722 = vmatmul.mubr.bf16.vlgmr.msra.gmra.mrb[4].mxu1 %v10449_v41  ;;  %1804 = vmatmul.mubr.bf16.vlgmr.msra.gmra.mrb[8].mxu0 %v10449_v41 }
 0x2e7   :  { %1813 = vmatpush1.bf16.msra.mxu1 %v8762_v40  ;;  %1844 = vmatprep.mubr.bf16.mxu1 %v10433_v63  ;;  %v8834_v40 = vld [vmem:[#allocation9 + $0x390] ss:$28 sps:$4 sm:$0xff]  }
 0x2e8   :  { %8229 = vmatpush3.bf16.msra.mxu0 %v8766_v42  ;;  %1926 = vmatprep.mubr.bf16.mxu0 %v10433_v63  ;;  %v8790_v63 = vld [vmem:[#allocation9 + $0x2f0] ss:$28 sps:$4 sm:$0xff]  }
 0x2e9   :  { %1814 = vmatprep.subr.bf16.mxu1 %v8769_v45  ;;  %8230 = vmatprep.subr.bf16.mxu0 %v8770_v47  ;;  %v8839_v42 = vld [vmem:[#allocation9 + $0x3cc] ss:$28 sps:$4 sm:$0xff]   ;;  %v8866_v47 = vld [vmem:[#allocation12 + $0x3c] ss:$28 sps:$4 sm:$0xff]  }
 0x2ea   :  { %v8858_v45 = vld [vmem:[#allocation12] ss:$28 sps:$4 sm:$0xff]  }
 0x2eb   :  { %1815 = vmatpush1.bf16.msra.mxu1 %v8767_v48  ;;  %v8837_v48 = vld [vmem:[#allocation9 + $0x3c8] ss:$28 sps:$4 sm:$0xff]  }
 0x2ec   :  { %8231 = vmatpush3.bf16.msra.mxu0 %v8771_v49  ;;  %1816 = vmatprep.subr.bf16.mxu1 %v8774_v50  ;;  %v8842_v49 = vld [vmem:[#allocation9 + $0x404] ss:$28 sps:$4 sm:$0xff]  }
 0x2ed   :  { %8232 = vmatprep.subr.bf16.mxu0 %v8775_v51  ;;  %v8864_v50 = vld [vmem:[#allocation12 + $0x38] ss:$28 sps:$4 sm:$0xff]  }
 0x2ee   :  { %v8872_v51 = vld [vmem:[#allocation12 + $0x74] ss:$28 sps:$4 sm:$0xff]  }
 0x2ef   :  { %1817 = vmatpush1.bf16.msra.mxu1 %v8772_v52  ;;  %v8840_v52 = vld [vmem:[#allocation9 + $0x400] ss:$28 sps:$4 sm:$0xff]  }
 0x2f0   :  { %8233 = vmatpush3.bf16.msra.mxu0 %v8776_v53  ;;  %1818 = vmatprep.subr.bf16.mxu1 %v8779_v54  ;;  %v8845_v53 = vld [vmem:[#allocation9 + $0x43c] ss:$28 sps:$4 sm:$0xff]  }
 0x2f1   :  { %8234 = vmatprep.subr.bf16.mxu0 %v8780_v55  ;;  %v8870_v54 = vld [vmem:[#allocation12 + $0x70] ss:$28 sps:$4 sm:$0xff]  }
 0x2f2   :  { %v8843_v55 = vld [vmem:[#allocation9 + $0x438] ss:$28 sps:$4 sm:$0xff]  }
 0x2f3   :  { %1819 = vmatpush1.bf16.msra.mxu1 %v8777_v56  ;;  %v8848_v56 = vld [vmem:[#allocation9 + $0x474] ss:$28 sps:$4 sm:$0xff]  }
 0x2f4   :  { %8235 = vmatpush3.bf16.msra.mxu0 %v8781_v57  ;;  %1820 = vmatprep.subr.bf16.mxu1 %v8784_v58  ;;  %v8876_v57 = vld [vmem:[#allocation12 + $0xa8] ss:$28 sps:$4 sm:$0xff]  }
 0x2f5   :  { %8236 = vmatprep.subr.bf16.mxu0 %v8785_v59  ;;  %v8884_v58 = vld [vmem:[#allocation12 + $0xe4] ss:$28 sps:$4 sm:$0xff]  }
 0x2f6   :  { %v8846_v59 = vld [vmem:[#allocation9 + $0x470] ss:$28 sps:$4 sm:$0xff]  }
 0x2f7   :  { %1821 = vmatpush1.bf16.msra.mxu1 %v8782_v60  ;;  %v8851_v60 = vld [vmem:[#allocation9 + $0x4ac] ss:$28 sps:$4 sm:$0xff]  }
 0x2f8   :  { %8237 = vmatpush3.bf16.msra.mxu0 %v8786_v61  ;;  %1822 = vmatprep.subr.bf16.mxu1 %v8789_v62  ;;  %v8882_v61 = vld [vmem:[#allocation12 + $0xe0] ss:$28 sps:$4 sm:$0xff]  }
 0x2f9   :  { %8238 = vmatprep.subr.bf16.mxu0 %v8790_v63  ;;  %v8890_v62 = vld [vmem:[#allocation12 + $0x11c] ss:$28 sps:$4 sm:$0xff]  }
 0x2fa   :  { %v8849_v63 = vld [vmem:[#allocation9 + $0x4a8] ss:$28 sps:$4 sm:$0xff]  }
 0x2fb   :  { %1823 = vmatpush1.bf16.msra.mxu1 %v8787_v1  ;;  %v8854_v1 = vld [vmem:[#allocation9 + $0x4e4] ss:$28 sps:$4 sm:$0xff]  }
 0x2fc   :  { %8239 = vmatpush3.bf16.msra.mxu0 %v8791_v2  ;;  %1824 = vmatprep.subr.bf16.mxu1 %v8794_v4  ;;  %v8888_v2 = vld [vmem:[#allocation12 + $0x118] ss:$28 sps:$4 sm:$0xff]  }
 0x2fd   :  { %8240 = vmatprep.subr.bf16.mxu0 %v8795_v5  ;;  %v8896_v4 = vld [vmem:[#allocation12 + $0x154] ss:$28 sps:$4 sm:$0xff]  }
 0x2fe   :  { %v8852_v5 = vld [vmem:[#allocation9 + $0x4e0] ss:$28 sps:$4 sm:$0xff]  }
 0x2ff   :  { %1825 = vmatpush1.bf16.msra.mxu1 %v8792_v6  ;;  %v8857_v6 = vld [vmem:[#allocation9 + $0x51c] ss:$28 sps:$4 sm:$0xff]  }
 0x300   :  { %8241 = vmatpush3.bf16.msra.mxu0 %v8796_v7  ;;  %1826 = vmatprep.subr.bf16.mxu1 %v8799_v8  ;;  %v8894_v7 = vld [vmem:[#allocation12 + $0x150] ss:$28 sps:$4 sm:$0xff]  }
 0x301   :  { %8242 = vmatprep.subr.bf16.mxu0 %v8800_v9  ;;  %v8902_v8 = vld [vmem:[#allocation12 + $0x18c] ss:$28 sps:$4 sm:$0xff]  }
 0x302   :  { %v8855_v9 = vld [vmem:[#allocation9 + $0x518] ss:$28 sps:$4 sm:$0xff]  }
 0x303   :  { %1827 = vmatpush1.bf16.msra.mxu1 %v8797_v10  ;;  %v8863_v10 = vld [vmem:[#allocation12 + $0xc] ss:$28 sps:$4 sm:$0xff]  }
 0x304   :  { %8243 = vmatpush3.bf16.msra.mxu0 %v8801_v11  ;;  %1828 = vmatprep.subr.bf16.mxu1 %v8804_v12  ;;  %v8900_v11 = vld [vmem:[#allocation12 + $0x188] ss:$28 sps:$4 sm:$0xff]  }
 0x305   :  { %8413 = vmatprep.subr.bf16.mxu0 %v10142_v0  ;;  %v8908_v12 = vld [vmem:[#allocation12 + $0x1c4] ss:$28 sps:$4 sm:$0xff]  }
 0x307   :  { %1927 = vmatmul.mubr.bf16.vlgmr.msra.gmra.mrb[12].mxu0 %v10435_v3  ;;  %1829 = vmatpush1.bf16.msra.mxu1 %v8802_v13  ;;  %v8861_v13 = vld [vmem:[#allocation12 + $0x8] ss:$28 sps:$4 sm:$0xff]  }
 0x308   :  { %8414 = vmatpush3.bf16.msra.mxu0 %v8805_v14  ;;  %1830 = vmatprep.subr.bf16.mxu1 %v8808_v15  ;;  %v8869_v14 = vld [vmem:[#allocation12 + $0x44] ss:$28 sps:$4 sm:$0xff]  }
 0x309   :  { %8415 = vmatprep.subr.bf16.mxu0 %v10142_v0  ;;  %8429 = vmatprep.mubr.msk.bf16.mxu0 %vm10143_vm0, %v10142_v0  ;;  %v8906_v15 = vld [vmem:[#allocation12 + $0x1c0] ss:$28 sps:$4 sm:$0xff]  }
 0x30b   :  { %1831 = vmatpush1.bf16.msra.mxu1 %v8806_v16  ;;  %v8914_v16 = vld [vmem:[#allocation12 + $0x1fc] ss:$28 sps:$4 sm:$0xff]  }
 0x30c   :  { %8416 = vmatpush3.bf16.msra.mxu0 %v8809_v17  ;;  %1832 = vmatprep.subr.bf16.mxu1 %v8812_v19  ;;  %v8867_v17 = vld [vmem:[#allocation12 + $0x40] ss:$28 sps:$4 sm:$0xff]  }
 0x30d   :  { %8417 = vmatprep.subr.bf16.mxu0 %v10142_v0  ;;  %v8875_v19 = vld [vmem:[#allocation12 + $0x7c] ss:$28 sps:$4 sm:$0xff]  }
 0x30f   :  { %1833 = vmatpush1.bf16.msra.mxu1 %v8810_v20  ;;  %v8912_v20 = vld [vmem:[#allocation12 + $0x1f8] ss:$28 sps:$4 sm:$0xff]  }
 0x310   :  { %8418 = vmatpush3.bf16.msra.mxu0 %v8813_v21  ;;  %1834 = vmatprep.subr.bf16.mxu1 %v8816_v22  ;;  %v8920_v21 = vld [vmem:[#allocation12 + $0x234] ss:$28 sps:$4 sm:$0xff]  }
 0x311   :  { %8419 = vmatprep.subr.bf16.mxu0 %v10142_v0  ;;  %v8873_v22 = vld [vmem:[#allocation12 + $0x78] ss:$28 sps:$4 sm:$0xff]  }
 0x313   :  { %1835 = vmatpush1.bf16.msra.mxu1 %v8814_v23  ;;  %v8881_v23 = vld [vmem:[#allocation12 + $0xb4] ss:$28 sps:$4 sm:$0xff]  }
 0x314   :  { %8420 = vmatpush3.bf16.msra.mxu0 %v8817_v24  ;;  %1836 = vmatprep.subr.bf16.mxu1 %v8820_v25  ;;  %v8918_v24 = vld [vmem:[#allocation12 + $0x230] ss:$28 sps:$4 sm:$0xff]  }
 0x315   :  { %8421 = vmatprep.subr.bf16.mxu0 %v10142_v0  ;;  %v8926_v25 = vld [vmem:[#allocation12 + $0x26c] ss:$28 sps:$4 sm:$0xff]  }
 0x317   :  { %1837 = vmatpush1.bf16.msra.mxu1 %v8818_v26  ;;  %v8887_v26 = vld [vmem:[#allocation12 + $0xec] ss:$28 sps:$4 sm:$0xff]  }
 0x318   :  { %8422 = vmatpush3.bf16.msra.mxu0 %v8821_v27  ;;  %1838 = vmatprep.subr.bf16.mxu1 %v8824_v28  ;;  %v8924_v27 = vld [vmem:[#allocation12 + $0x268] ss:$28 sps:$4 sm:$0xff]  }
 0x319   :  { %8423 = vmatprep.subr.bf16.mxu0 %v10142_v0  ;;  %v8932_v28 = vld [vmem:[#allocation12 + $0x2a4] ss:$28 sps:$4 sm:$0xff]  }
 0x31b   :  { %1839 = vmatpush1.bf16.msra.mxu1 %v8822_v30  ;;  %v8885_v30 = vld [vmem:[#allocation12 + $0xe8] ss:$28 sps:$4 sm:$0xff]  }
 0x31c   :  { %8424 = vmatpush3.bf16.msra.mxu0 %v8825_v31  ;;  %1840 = vmatprep.subr.bf16.mxu1 %v8828_v32  ;;  %v8893_v31 = vld [vmem:[#allocation12 + $0x124] ss:$28 sps:$4 sm:$0xff]  }
 0x31d   :  { %8425 = vmatprep.subr.bf16.mxu0 %v10142_v0  ;;  %v8930_v32 = vld [vmem:[#allocation12 + $0x2a0] ss:$28 sps:$4 sm:$0xff]  }
 0x31f   :  { %1841 = vmatpush1.bf16.msra.mxu1 %v8826_v33  ;;  %v8938_v33 = vld [vmem:[#allocation12 + $0x2dc] ss:$28 sps:$4 sm:$0xff]  }
 0x320   :  { %8426 = vmatpush3.bf16.msra.mxu0 %v8829_v34  ;;  %1842 = vmatprep.subr.bf16.mxu1 %v8832_v35  ;;  %v8891_v34 = vld [vmem:[#allocation12 + $0x120] ss:$28 sps:$4 sm:$0xff]  }
 0x321   :  { %8427 = vmatprep.subr.bf16.mxu0 %v10142_v0  ;;  %v8899_v35 = vld [vmem:[#allocation12 + $0x15c] ss:$28 sps:$4 sm:$0xff]  }
 0x323   :  { %1843 = vmatpush1.bf16.msra.mxu1 %v8830_v36  ;;  %v8936_v36 = vld [vmem:[#allocation12 + $0x2d8] ss:$28 sps:$4 sm:$0xff]  }
 0x324   :  { %8428 = vmatpush3.bf16.msra.mxu0 %v8833_v37  ;;  %1853 = vmatprep.subr.bf16.mxu1 %v8836_v38  ;;  %v8944_v37 = vld [vmem:[#allocation12 + $0x314] ss:$28 sps:$4 sm:$0xff]  }
 0x325   :  { %4503 = vmatprep.subr.bf16.mxu0 %v8860_v39  ;;  %v8897_v38 = vld [vmem:[#allocation12 + $0x158] ss:$28 sps:$4 sm:$0xff]  }
 0x326   :  { %1845 = vmatmul.mubr.bf16.vlgmr.msra.gmra.mrb[8].mxu1 %v10435_v3  ;;  %v8878_v3 = vld [vmem:[#allocation12 + $0xac] ss:$28 sps:$4 sm:$0xff]   ;;  %v8905_v39 = vld [vmem:[#allocation12 + $0x194] ss:$28 sps:$4 sm:$0xff]  }
 0x327   :  { %8430 = vmatmul.mubr.bf16.vlgmr.msra.gmra.mrb[16].mxu0 %v10449_v41  ;;  %1854 = vmatpush1.bf16.msra.mxu1 %v8834_v40  ;;  %v8942_v40 = vld [vmem:[#allocation12 + $0x310] ss:$28 sps:$4 sm:$0xff]  }
 0x328   :  { %1855 = vmatprep.subr.bf16.mxu1 %v8839_v42  ;;  %1885 = vmatprep.mubr.bf16.mxu1 %v10144_v29  ;;  %v8950_v42 = vld [vmem:[#allocation12 + $0x34c] ss:$28 sps:$4 sm:$0xff]  }
 0x329   :  { %4504 = vmatpush1.bf16.msra.mxu0 %v8858_v45  ;;  %v8903_v45 = vld [vmem:[#allocation12 + $0x190] ss:$28 sps:$4 sm:$0xff]  }
 0x32a   :  { %4505 = vmatprep.subr.bf16.mxu0 %v8866_v47  ;;  %v8911_v47 = vld [vmem:[#allocation12 + $0x1cc] ss:$28 sps:$4 sm:$0xff]  }
 0x32b   :  { %1856 = vmatpush1.bf16.msra.mxu1 %v8837_v48  ;;  %v8948_v48 = vld [vmem:[#allocation12 + $0x348] ss:$28 sps:$4 sm:$0xff]  }
 0x32c   :  { %1857 = vmatprep.subr.bf16.mxu1 %v8842_v49  ;;  %v8956_v49 = vld [vmem:[#allocation12 + $0x384] ss:$28 sps:$4 sm:$0xff]  }
 0x32d   :  { %4506 = vmatpush1.bf16.msra.mxu0 %v8864_v50  ;;  %v8909_v50 = vld [vmem:[#allocation12 + $0x1c8] ss:$28 sps:$4 sm:$0xff]  }
 0x32e   :  { %4507 = vmatprep.subr.bf16.mxu0 %v8872_v51  ;;  %v8917_v51 = vld [vmem:[#allocation12 + $0x204] ss:$28 sps:$4 sm:$0xff]  }
 0x32f   :  { %1858 = vmatpush1.bf16.msra.mxu1 %v8840_v52  ;;  %v8915_v52 = vld [vmem:[#allocation12 + $0x200] ss:$28 sps:$4 sm:$0xff]  }
 0x330   :  { %1859 = vmatprep.subr.bf16.mxu1 %v8845_v53  ;;  %v8923_v53 = vld [vmem:[#allocation12 + $0x23c] ss:$28 sps:$4 sm:$0xff]  }
 0x331   :  { %4508 = vmatpush1.bf16.msra.mxu0 %v8870_v54  ;;  %v8921_v54 = vld [vmem:[#allocation12 + $0x238] ss:$28 sps:$4 sm:$0xff]  }
 0x332   :  { %4509 = vmatprep.subr.bf16.mxu0 %v8878_v3  ;;  %v8929_v3 = vld [vmem:[#allocation12 + $0x274] ss:$28 sps:$4 sm:$0xff]  }
 0x333   :  { %1860 = vmatpush1.bf16.msra.mxu1 %v8843_v55  ;;  %v8927_v55 = vld [vmem:[#allocation12 + $0x270] ss:$28 sps:$4 sm:$0xff]  }
 0x334   :  { %1861 = vmatprep.subr.bf16.mxu1 %v8848_v56  ;;  %v8935_v56 = vld [vmem:[#allocation12 + $0x2ac] ss:$28 sps:$4 sm:$0xff]  }
 0x335   :  { %4510 = vmatpush1.bf16.msra.mxu0 %v8876_v57  ;;  %v8933_v57 = vld [vmem:[#allocation12 + $0x2a8] ss:$28 sps:$4 sm:$0xff]  }
 0x336   :  { %4511 = vmatprep.subr.bf16.mxu0 %v8884_v58  ;;  %v8941_v58 = vld [vmem:[#allocation12 + $0x2e4] ss:$28 sps:$4 sm:$0xff]  }
 0x337   :  { %1862 = vmatpush1.bf16.msra.mxu1 %v8846_v59  ;;  %v8939_v59 = vld [vmem:[#allocation12 + $0x2e0] ss:$28 sps:$4 sm:$0xff]  }
 0x338   :  { %1863 = vmatprep.subr.bf16.mxu1 %v8851_v60  ;;  %v8947_v60 = vld [vmem:[#allocation12 + $0x31c] ss:$28 sps:$4 sm:$0xff]  }
 0x339   :  { %4512 = vmatpush1.bf16.msra.mxu0 %v8882_v61  ;;  %v8945_v61 = vld [vmem:[#allocation12 + $0x318] ss:$28 sps:$4 sm:$0xff]  }
 0x33a   :  { %4513 = vmatprep.subr.bf16.mxu0 %v8890_v62  ;;  %v8953_v62 = vld [vmem:[#allocation12 + $0x354] ss:$28 sps:$4 sm:$0xff]  }
 0x33b   :  { %1864 = vmatpush1.bf16.msra.mxu1 %v8849_v63  ;;  %v8951_v63 = vld [vmem:[#allocation12 + $0x350] ss:$28 sps:$4 sm:$0xff]  }
 0x33c   :  { %1865 = vmatprep.subr.bf16.mxu1 %v8854_v1  ;;  %v8959_v1 = vld [vmem:[#allocation12 + $0x38c] ss:$28 sps:$4 sm:$0xff]  }
 0x33d   :  { %4514 = vmatpush1.bf16.msra.mxu0 %v8888_v2  ;;  %v10470_v2 = vld [vmem:[#allocation10] sm:$0xff] }
 0x33e   :  { %4515 = vmatprep.subr.bf16.mxu0 %v8896_v4  ;;  %v10473_v4 = vsub.s32 3, %v10417_v43 }
 0x33f   :  { %1866 = vmatpush1.bf16.msra.mxu1 %v8852_v5  ;;  %v752_v5 = vrot.slane %v10470_v2, %v10420_v44 }
 0x340   :  { %1867 = vmatprep.subr.bf16.mxu1 %v8857_v6  ;;  %v756_v6 = vrot.slane %v10470_v2, %v10425_v46 }
 0x341   :  { %4516 = vmatpush1.bf16.msra.mxu0 %v8894_v7  ;;  %v764_v7 = vrot.slane %v10470_v2, %v10473_v4 }
 0x342   :  { %4517 = vmatprep.subr.bf16.mxu0 %v8902_v8 }
 0x343   :  { %1868 = vmatpush1.bf16.msra.mxu1 %v8855_v9 }
 0x344   :  { %4667 = vmatprep.subr.bf16.mxu1 %v8863_v10 }
 0x345   :  { %4518 = vmatpush1.bf16.msra.mxu0 %v8900_v11 }
 0x346   :  { %1886 = vmatmul.mubr.bf16.vlgmr.msra.gmra.mrb[8].mxu1 %v10449_v41  ;;  %4519 = vmatprep.subr.bf16.mxu0 %v8908_v12  ;;  %v8879_v41 = vld [vmem:[#allocation12 + $0xb0] ss:$28 sps:$4 sm:$0xff]  }
 0x347   :  { %4668 = vmatpush1.bf16.msra.mxu1 %v8861_v13 }
 0x348   :  { %4669 = vmatprep.subr.bf16.mxu1 %v8869_v14 }
 0x349   :  { %4520 = vmatpush1.bf16.msra.mxu0 %v8906_v15 }
 0x34a   :  { %4521 = vmatprep.subr.bf16.mxu0 %v8914_v16 }
 0x34b   :  { %4670 = vmatpush1.bf16.msra.mxu1 %v8867_v17 }
 0x34c   :  { %4671 = vmatprep.subr.bf16.mxu1 %v8875_v19 }
 0x34d   :  { %4522 = vmatpush1.bf16.msra.mxu0 %v8912_v20 }
 0x34e   :  { %4523 = vmatprep.subr.bf16.mxu0 %v8920_v21 }
 0x34f   :  { %4672 = vmatpush1.bf16.msra.mxu1 %v8873_v22 }
 0x350   :  { %4673 = vmatprep.subr.bf16.mxu1 %v8881_v23 }
 0x351   :  { %4524 = vmatpush1.bf16.msra.mxu0 %v8918_v24 }
 0x352   :  { %4525 = vmatprep.subr.bf16.mxu0 %v8926_v25 }
 0x353   :  { %4674 = vmatpush1.bf16.msra.mxu1 %v8879_v41 }
 0x354   :  { %4675 = vmatprep.subr.bf16.mxu1 %v8887_v26  ;;  %v8954_v26 = vld [vmem:[#allocation12 + $0x380] ss:$28 sps:$4 sm:$0xff]  }
 0x355   :  { %4526 = vmatpush1.bf16.msra.mxu0 %v8924_v27  ;;  %v8957_v27 = vld [vmem:[#allocation12 + $0x388] ss:$28 sps:$4 sm:$0xff]  }
 0x356   :  { %4527 = vmatprep.subr.bf16.mxu0 %v8932_v28 }
 0x357   :  { %4676 = vmatpush1.bf16.msra.mxu1 %v8885_v30  ;;  %v8962_v30 = vld [vmem:[#allocation12 + $0x3bc] ss:$28 sps:$4 sm:$0xff]  }
 0x358   :  { %4677 = vmatprep.subr.bf16.mxu1 %v8893_v31  ;;  %v8965_v31 = vld [vmem:[#allocation12 + $0x3c4] ss:$28 sps:$4 sm:$0xff]  }
 0x359   :  { %4528 = vmatpush1.bf16.msra.mxu0 %v8930_v32 }
 0x35a   :  { %4529 = vmatprep.subr.bf16.mxu0 %v8938_v33  ;;  %v8960_v33 = vld [vmem:[#allocation12 + $0x3b8] ss:$28 sps:$4 sm:$0xff]  }
 0x35b   :  { %4678 = vmatpush1.bf16.msra.mxu1 %v8891_v34  ;;  %v8963_v34 = vld [vmem:[#allocation12 + $0x3c0] ss:$28 sps:$4 sm:$0xff]  }
 0x35c   :  { %4679 = vmatprep.subr.bf16.mxu1 %v8899_v35  ;;  %v8968_v35 = vld [vmem:[#allocation12 + $0x3f4] ss:$28 sps:$4 sm:$0xff]  }
 0x35d   :  { %4530 = vmatpush1.bf16.msra.mxu0 %v8936_v36  ;;  %v8971_v36 = vld [vmem:[#allocation12 + $0x3fc] ss:$28 sps:$4 sm:$0xff]  }
 0x35e   :  { %4531 = vmatprep.subr.bf16.mxu0 %v8944_v37  ;;  %v8966_v37 = vld [vmem:[#allocation12 + $0x3f0] ss:$28 sps:$4 sm:$0xff]  }
 0x35f   :  { %4680 = vmatpush1.bf16.msra.mxu1 %v8897_v38  ;;  %v8969_v38 = vld [vmem:[#allocation12 + $0x3f8] ss:$28 sps:$4 sm:$0xff]  }
 0x360   :  { %4681 = vmatprep.subr.bf16.mxu1 %v8905_v39  ;;  %v8974_v39 = vld [vmem:[#allocation12 + $0x42c] ss:$28 sps:$4 sm:$0xff]  }
 0x361   :  { %4532 = vmatpush1.bf16.msra.mxu0 %v8942_v40  ;;  %v8977_v40 = vld [vmem:[#allocation12 + $0x434] ss:$28 sps:$4 sm:$0xff]  }
 0x362   :  { %4533 = vmatprep.subr.bf16.mxu0 %v8950_v42  ;;  %v8972_v42 = vld [vmem:[#allocation12 + $0x428] ss:$28 sps:$4 sm:$0xff]  }
 0x363   :  { %4682 = vmatpush1.bf16.msra.mxu1 %v8903_v45  ;;  %v8975_v45 = vld [vmem:[#allocation12 + $0x430] ss:$28 sps:$4 sm:$0xff]  }
 0x364   :  { %4683 = vmatprep.subr.bf16.mxu1 %v8911_v47  ;;  %v8980_v47 = vld [vmem:[#allocation12 + $0x464] ss:$28 sps:$4 sm:$0xff]  }
 0x365   :  { %4534 = vmatpush1.bf16.msra.mxu0 %v8948_v48  ;;  %v8983_v48 = vld [vmem:[#allocation12 + $0x46c] ss:$28 sps:$4 sm:$0xff]  }
 0x366   :  { %4544 = vmatprep.subr.bf16.mxu0 %v8956_v49  ;;  %v8978_v49 = vld [vmem:[#allocation12 + $0x460] ss:$28 sps:$4 sm:$0xff]  }
 0x367   :  { %4684 = vmatpush1.bf16.msra.mxu1 %v8909_v50  ;;  %v8981_v50 = vld [vmem:[#allocation12 + $0x468] ss:$28 sps:$4 sm:$0xff]  }
 0x368   :  { %4685 = vmatprep.subr.bf16.mxu1 %v8917_v51  ;;  %v8986_v51 = vld [vmem:[#allocation12 + $0x49c] ss:$28 sps:$4 sm:$0xff]  }
 0x36b   :  { %4686 = vmatpush1.bf16.msra.mxu1 %v8915_v52  ;;  %v8989_v52 = vld [vmem:[#allocation12 + $0x4a4] ss:$28 sps:$4 sm:$0xff]  }
 0x36c   :  { %4687 = vmatprep.subr.bf16.mxu1 %v8923_v53  ;;  %v8984_v53 = vld [vmem:[#allocation12 + $0x498] ss:$28 sps:$4 sm:$0xff]  }
 0x36f   :  { %4688 = vmatpush1.bf16.msra.mxu1 %v8921_v54  ;;  %v8987_v54 = vld [vmem:[#allocation12 + $0x4a0] ss:$28 sps:$4 sm:$0xff]  }
 0x370   :  { %4689 = vmatprep.subr.bf16.mxu1 %v8929_v3  ;;  %v8992_v3 = vld [vmem:[#allocation12 + $0x4d4] ss:$28 sps:$4 sm:$0xff]  }
 0x373   :  { %4690 = vmatpush1.bf16.msra.mxu1 %v8927_v55  ;;  %v8995_v55 = vld [vmem:[#allocation12 + $0x4dc] ss:$28 sps:$4 sm:$0xff]  }
 0x374   :  { %4691 = vmatprep.subr.bf16.mxu1 %v8935_v56  ;;  %v8990_v56 = vld [vmem:[#allocation12 + $0x4d0] ss:$28 sps:$4 sm:$0xff]  }
 0x377   :  { %4692 = vmatpush1.bf16.msra.mxu1 %v8933_v57  ;;  %v8993_v57 = vld [vmem:[#allocation12 + $0x4d8] ss:$28 sps:$4 sm:$0xff]  }
 0x378   :  { %4693 = vmatprep.subr.bf16.mxu1 %v8941_v58  ;;  %v8998_v58 = vld [vmem:[#allocation12 + $0x50c] ss:$28 sps:$4 sm:$0xff]  }
 0x37b   :  { %4694 = vmatpush1.bf16.msra.mxu1 %v8939_v59  ;;  %v9001_v59 = vld [vmem:[#allocation12 + $0x514] ss:$28 sps:$4 sm:$0xff]  }
 0x37c   :  { %4695 = vmatprep.subr.bf16.mxu1 %v8947_v60 }
 0x37f   :  { %4696 = vmatpush1.bf16.msra.mxu1 %v8945_v61 }
 0x380   :  { %4697 = vmatprep.subr.bf16.mxu1 %v8953_v62 }
 0x383   :  { %4698 = vmatpush1.bf16.msra.mxu1 %v8951_v63 }
 0x384   :  { %4708 = vmatprep.subr.bf16.mxu1 %v8959_v1  ;;  %v8996_v1 = vld [vmem:[#allocation12 + $0x508] ss:$28 sps:$4 sm:$0xff]  }
 0x3b9   :  { %v1723_v8 = vpop.f32.mrb[4].mxu1  ;;  %v10481_v9 = vpop.f32.mrb[8].mxu0 }
 0x3ba   :  { %v8473_v10 = vadd.f32 %v1723_v8, %v752_v5  ;;  %v1725_v11 = vpop.f32.mrb[5].mxu1  ;;  %v1807_v12 = vpop.f32.mrb[9].mxu0  ;;  %v8999_v5 = vld [vmem:[#allocation12 + $0x510] ss:$28 sps:$4 sm:$0xff]  }
 0x3bb   :  { %v8474_v13 = vadd.f32 %v1725_v11, %v756_v6  ;;  %v8476_v14 = vadd.f32 %v1807_v12, %v764_v7  ;;  %v1727_v15 = vpop.f32.mrb[6].mxu1  ;;  %v1809_v16 = vpop.f32.mrb[10].mxu0  ;;  %v9004_v7 = vld [vmem:[#allocation12 + $0x544] ss:$28 sps:$4 sm:$0xff]   ;;  %v9007_v8 = vld [vmem:[#allocation12 + $0x54c] ss:$28 sps:$4 sm:$0xff]  }
 0x3bc   :  { %vm1974_vm6 = vcmp.gt.f32.partialorder %v8473_v10, 0.0  ;;  %v1981_v17 = vmul.f32 0.01, %v8473_v10  ;;  %v1728_v22 = vpop.f32.mrb[7].mxu1  ;;  %v1810_v23 = vpop.f32.mrb[11].mxu0 }
 0x3bd   :  { %vm1975_vm7 = vcmp.gt.f32.partialorder %v8474_v13, 0.0  ;;  %v1982_v19 = vmul.f32 0.01, %v8474_v13  ;;  %vm1977_vm8 = vcmp.gt.f32.partialorder %v8476_v14, 0.0  ;;  %v1984_v20 = vmul.f32 0.01, %v8476_v14 }
 0x3be   :  { %v1988_v21 = vsel %vm1974_vm6, %v8473_v10, %v1981_v17  ;;  %v9002_v10 = vld [vmem:[#allocation12 + $0x540] ss:$28 sps:$4 sm:$0xff]   ;;  %v9005_v11 = vld [vmem:[#allocation12 + $0x548] ss:$28 sps:$4 sm:$0xff]   ;;  %v9016_v16 = vld [vmem:[#allocation12 + $0x5b4] ss:$28 sps:$4 sm:$0xff]  }
 0x3bf   :  { %v1989_v24 = vsel %vm1975_vm7, %v8474_v13, %v1982_v19  ;;  %v1991_v41 = vsel %vm1977_vm8, %v8476_v14, %v1984_v20  ;;  %v10485_v28 = vpack.c.bf16 %v1988_v21, %v1988_v21  ;;  %v9010_v12 = vld [vmem:[#allocation12 + $0x57c] ss:$28 sps:$4 sm:$0xff]   ;;  %v9013_v13 = vld [vmem:[#allocation12 + $0x584] ss:$28 sps:$4 sm:$0xff]   ;;  %v9014_v19 = vld [vmem:[#allocation12 + $0x5b0] ss:$28 sps:$4 sm:$0xff]  }
 0x3c0   :  { %v10483_v25 = vpack.c.bf16 %v1989_v24, %v1989_v24  ;;  %v10489_v32 = vpack.c.bf16 %v1991_v41, %v1991_v41  ;;  %v9008_v14 = vld [vmem:[#allocation12 + $0x578] ss:$28 sps:$4 sm:$0xff]   ;;  %v9011_v15 = vld [vmem:[#allocation12 + $0x580] ss:$28 sps:$4 sm:$0xff]   ;;  %v9022_v21 = vld [vmem:[#allocation12 + $0x5ec] ss:$28 sps:$4 sm:$0xff]  }
 0x3c1   :  { %v9019_v17 = vld [vmem:[#allocation12 + $0x5bc] ss:$28 sps:$4 sm:$0xff]   ;;  %v9025_v22 = vld [vmem:[#allocation12 + $0x5f4] ss:$28 sps:$4 sm:$0xff]   ;;  %v9020_v23 = vld [vmem:[#allocation12 + $0x5e8] ss:$28 sps:$4 sm:$0xff]  }
 0x3c2   :  { %4535 = vmatprep.mubr.bf16.mxu0 %v10483_v25  ;;  %4699 = vmatprep.mubr.bf16.mxu1 %v10483_v25  ;;  %v9017_v20 = vld [vmem:[#allocation12 + $0x5b8] ss:$28 sps:$4 sm:$0xff]   ;;  %v9023_v24 = vld [vmem:[#allocation12 + $0x5f0] ss:$28 sps:$4 sm:$0xff]   ;;  %v9028_v41 = vld [vmem:[#allocation12 + $0x624] ss:$28 sps:$4 sm:$0xff]  }
 0x3c3   :  { %4536 = vmatmul.mubr.bf16.vlgmr.msra.gmra.mrb[20].mxu0 %v10485_v28  ;;  %4700 = vmatmul.mubr.bf16.vlgmr.msra.gmra.mrb[12].mxu1 %v10485_v28 }
 0x3c4   :  { %4545 = vmatpush1.bf16.msra.mxu0 %v8954_v26  ;;  %4709 = vmatpush1.bf16.msra.mxu1 %v8957_v27  ;;  %v9031_v26 = vld [vmem:[#allocation12 + $0x62c] ss:$28 sps:$4 sm:$0xff]   ;;  %v9026_v27 = vld [vmem:[#allocation12 + $0x620] ss:$28 sps:$4 sm:$0xff]  }
 0x3c5   :  { %4576 = vmatprep.mubr.bf16.mxu0 %v10489_v32  ;;  %4740 = vmatprep.mubr.bf16.mxu1 %v10489_v32 }
 0x3c6   :  { %4546 = vmatprep.subr.bf16.mxu0 %v8962_v30  ;;  %4710 = vmatprep.subr.bf16.mxu1 %v8965_v31  ;;  %v9029_v30 = vld [vmem:[#allocation12 + $0x628] ss:$28 sps:$4 sm:$0xff]   ;;  %v9034_v31 = vld [vmem:[#allocation12 + $0x65c] ss:$28 sps:$4 sm:$0xff]  }
 0x3c8   :  { %4547 = vmatpush1.bf16.msra.mxu0 %v8960_v33  ;;  %4711 = vmatpush1.bf16.msra.mxu1 %v8963_v34  ;;  %v9037_v33 = vld [vmem:[#allocation12 + $0x664] ss:$28 sps:$4 sm:$0xff]   ;;  %v775_v34 = vsub.s32 6, %v10417_v43 }
 0x3c9   :  { %4548 = vmatprep.subr.bf16.mxu0 %v8968_v35  ;;  %4712 = vmatprep.subr.bf16.mxu1 %v8971_v36  ;;  %v760_v35 = vrot.slane %v10470_v2, %v10444_v18  ;;  %v9032_v36 = vld [vmem:[#allocation12 + $0x658] ss:$28 sps:$4 sm:$0xff]  }
 0x3cc   :  { %4549 = vmatpush1.bf16.msra.mxu0 %v8966_v37  ;;  %4713 = vmatpush1.bf16.msra.mxu1 %v8969_v38  ;;  %v9035_v37 = vld [vmem:[#allocation12 + $0x660] ss:$28 sps:$4 sm:$0xff]   ;;  %v776_v38 = vrot.slane %v10470_v2, %v775_v34 }
 0x3cd   :  { %4550 = vmatprep.subr.bf16.mxu0 %v8974_v39  ;;  %4714 = vmatprep.subr.bf16.mxu1 %v8977_v40  ;;  %v9040_v39 = vld [vmem:[#allocation12 + $0x694] ss:$28 sps:$4 sm:$0xff]   ;;  %v9043_v40 = vld [vmem:[#allocation12 + $0x69c] ss:$28 sps:$4 sm:$0xff]  }
 0x3d0   :  { %4551 = vmatpush1.bf16.msra.mxu0 %v8972_v42  ;;  %4715 = vmatpush1.bf16.msra.mxu1 %v8975_v45  ;;  %v8475_v42 = vadd.f32 %v10481_v9, %v760_v35  ;;  %v9038_v45 = vld [vmem:[#allocation12 + $0x690] ss:$28 sps:$4 sm:$0xff]   ;;  %v9044_v9 = vld [vmem:[#allocation12 + $0x6c8] ss:$28 sps:$4 sm:$0xff]  }
 0x3d1   :  { %4552 = vmatprep.subr.bf16.mxu0 %v8980_v47  ;;  %4716 = vmatprep.subr.bf16.mxu1 %v8983_v48  ;;  %v9041_v47 = vld [vmem:[#allocation12 + $0x698] ss:$28 sps:$4 sm:$0xff]  }
 0x3d2   :  { %vm1976_vm9 = vcmp.gt.f32.partialorder %v8475_v42, 0.0 }
 0x3d4   :  { %4553 = vmatpush1.bf16.msra.mxu0 %v8978_v49  ;;  %4717 = vmatpush1.bf16.msra.mxu1 %v8981_v50  ;;  %v9046_v49 = vld [vmem:[#allocation12 + $0x6cc] ss:$28 sps:$4 sm:$0xff]   ;;  %v9049_v50 = vld [vmem:[#allocation12 + $0x6d4] ss:$28 sps:$4 sm:$0xff]  }
 0x3d5   :  { %4554 = vmatprep.subr.bf16.mxu0 %v8986_v51  ;;  %4718 = vmatprep.subr.bf16.mxu1 %v8989_v52  ;;  %v1983_v51 = vmul.f32 0.01, %v8475_v42 }
 0x3d8   :  { %4555 = vmatpush1.bf16.msra.mxu0 %v8984_v53  ;;  %4719 = vmatpush1.bf16.msra.mxu1 %v8987_v54 }
 0x3d9   :  { %4556 = vmatprep.subr.bf16.mxu0 %v8992_v3  ;;  %4720 = vmatprep.subr.bf16.mxu1 %v8995_v55  ;;  %v9047_v55 = vld [vmem:[#allocation12 + $0x6d0] ss:$28 sps:$4 sm:$0xff]  }
 0x3da   :  { %v8244_v60 = vpop.f32.mrb[12].mxu0 }
 0x3db   :  { %v8245_v61 = vpop.f32.mrb[13].mxu0 }
 0x3dc   :  { %v10495_v62 = vadd.f32 %v8245_v61, %v8244_v60  ;;  %v8247_v63 = vpop.f32.mrb[14].mxu0  ;;  %4557 = vmatpush1.bf16.msra.mxu0 %v8990_v56  ;;  %4721 = vmatpush1.bf16.msra.mxu1 %v8993_v57  ;;  %v9052_v57 = vld [vmem:[#allocation12 + $0x704] ss:$28 sps:$4 sm:$0xff]  }
 0x3dd   :  { %v8248_v6 = vpop.f32.mrb[15].mxu0  ;;  %4558 = vmatprep.subr.bf16.mxu0 %v8998_v58  ;;  %4722 = vmatprep.subr.bf16.mxu1 %v9001_v59  ;;  %v9055_v58 = vld [vmem:[#allocation12 + $0x70c] ss:$28 sps:$4 sm:$0xff]   ;;  %v1990_v59 = vsel %vm1976_vm9, %v8475_v42, %v1983_v51  ;;  %v9050_v60 = vld [vmem:[#allocation12 + $0x700] ss:$28 sps:$4 sm:$0xff]   ;;  %vm7351_vm9 = vcmask 15360  }
 0x3de   :  { %v1929_v48 = vadd.f32 %v10495_v62, %v776_v38  ;;  %v9053_v61 = vld [vmem:[#allocation12 + $0x708] ss:$28 sps:$4 sm:$0xff]   ;;  %v10507_v62 = vpack.c.bf16 %v1990_v59, %v1990_v59  ;;  %v9058_v63 = vld [vmem:[#allocation12 + $0x73c] ss:$28 sps:$4 sm:$0xff]  }
 0x3df   :  { %v9059_v6 = vld [vmem:[#allocation12 + $0x740] ss:$28 sps:$4 sm:$0xff]   ;;  %v9092_v42 = vld [vmem:[#allocation12 + $0x888] ss:$28 sps:$4 sm:$0xff]  }
 0x3e0   :  { %4559 = vmatpush1.bf16.msra.mxu0 %v8996_v1  ;;  %4723 = vmatpush1.bf16.msra.mxu1 %v8999_v5  ;;  %v9061_v1 = vld [vmem:[#allocation12 + $0x744] ss:$28 sps:$4 sm:$0xff]   ;;  %v9056_v5 = vld [vmem:[#allocation12 + $0x738] ss:$28 sps:$4 sm:$0xff]  }
 0x3e1   :  { %4560 = vmatprep.subr.bf16.mxu0 %v9004_v7  ;;  %4724 = vmatprep.subr.bf16.mxu1 %v9007_v8  ;;  %v9064_v7 = vld [vmem:[#allocation12 + $0x774] ss:$28 sps:$4 sm:$0xff]   ;;  %v9067_v8 = vld [vmem:[#allocation12 + $0x77c] ss:$28 sps:$4 sm:$0xff]  }
 0x3e2   :  { %v9115_v59 = vld [vmem:[#allocation12 + $0x93c] ss:$28 sps:$4 sm:$0xff]  }
 0x3e4   :  { %4561 = vmatpush1.bf16.msra.mxu0 %v9002_v10  ;;  %4725 = vmatpush1.bf16.msra.mxu1 %v9005_v11  ;;  %v9062_v10 = vld [vmem:[#allocation12 + $0x770] ss:$28 sps:$4 sm:$0xff]   ;;  %v9065_v11 = vld [vmem:[#allocation12 + $0x778] ss:$28 sps:$4 sm:$0xff]  }
 0x3e5   :  { %4562 = vmatprep.subr.bf16.mxu0 %v9010_v12  ;;  %4726 = vmatprep.subr.bf16.mxu1 %v9013_v13  ;;  %v9070_v12 = vld [vmem:[#allocation12 + $0x7ac] ss:$28 sps:$4 sm:$0xff]   ;;  %v9073_v13 = vld [vmem:[#allocation12 + $0x7b4] ss:$28 sps:$4 sm:$0xff]  }
 0x3e8   :  { %4563 = vmatpush1.bf16.msra.mxu0 %v9008_v14  ;;  %4727 = vmatpush1.bf16.msra.mxu1 %v9011_v15  ;;  %v9068_v14 = vld [vmem:[#allocation12 + $0x7a8] ss:$28 sps:$4 sm:$0xff]   ;;  %v9071_v15 = vld [vmem:[#allocation12 + $0x7b0] ss:$28 sps:$4 sm:$0xff]  }
 0x3e9   :  { %4564 = vmatprep.subr.bf16.mxu0 %v9016_v16  ;;  %4728 = vmatprep.subr.bf16.mxu1 %v9019_v17  ;;  %v9076_v16 = vld [vmem:[#allocation12 + $0x7e4] ss:$28 sps:$4 sm:$0xff]   ;;  %v9079_v17 = vld [vmem:[#allocation12 + $0x7ec] ss:$28 sps:$4 sm:$0xff]  }
 0x3ec   :  { %4565 = vmatpush1.bf16.msra.mxu0 %v9014_v19  ;;  %4729 = vmatpush1.bf16.msra.mxu1 %v9017_v20  ;;  %v9074_v19 = vld [vmem:[#allocation12 + $0x7e0] ss:$28 sps:$4 sm:$0xff]   ;;  %v9077_v20 = vld [vmem:[#allocation12 + $0x7e8] ss:$28 sps:$4 sm:$0xff]  }
 0x3ed   :  { %4566 = vmatprep.subr.bf16.mxu0 %v9022_v21  ;;  %4730 = vmatprep.subr.bf16.mxu1 %v9025_v22  ;;  %v9082_v21 = vld [vmem:[#allocation12 + $0x81c] ss:$28 sps:$4 sm:$0xff]   ;;  %v9085_v22 = vld [vmem:[#allocation12 + $0x824] ss:$28 sps:$4 sm:$0xff]  }
 0x3f0   :  { %4567 = vmatpush1.bf16.msra.mxu0 %v9020_v23  ;;  %4731 = vmatpush1.bf16.msra.mxu1 %v9023_v24  ;;  %v771_v23 = vsub.s32 5, %v10417_v43  ;;  %v9080_v24 = vld [vmem:[#allocation12 + $0x818] ss:$28 sps:$4 sm:$0xff]  }
 0x3f1   :  { %4568 = vmatprep.subr.bf16.mxu0 %v9028_v41  ;;  %4732 = vmatprep.subr.bf16.mxu1 %v9031_v26  ;;  %v9083_v41 = vld [vmem:[#allocation12 + $0x820] ss:$28 sps:$4 sm:$0xff]   ;;  %v9088_v26 = vld [vmem:[#allocation12 + $0x854] ss:$28 sps:$4 sm:$0xff]  }
 0x3f4   :  { %4569 = vmatpush1.bf16.msra.mxu0 %v9026_v27  ;;  %4733 = vmatpush1.bf16.msra.mxu1 %v9029_v30  ;;  %v9091_v27 = vld [vmem:[#allocation12 + $0x85c] ss:$28 sps:$4 sm:$0xff]   ;;  %v772_v30 = vrot.slane %v10470_v2, %v771_v23 }
 0x3f5   :  { %4570 = vmatprep.subr.bf16.mxu0 %v9034_v31  ;;  %4734 = vmatprep.subr.bf16.mxu1 %v9037_v33  ;;  %v9086_v31 = vld [vmem:[#allocation12 + $0x850] ss:$28 sps:$4 sm:$0xff]   ;;  %v9089_v33 = vld [vmem:[#allocation12 + $0x858] ss:$28 sps:$4 sm:$0xff]  }
 0x3f8   :  { %4571 = vmatpush1.bf16.msra.mxu0 %v9032_v36  ;;  %4735 = vmatpush1.bf16.msra.mxu1 %v9035_v37  ;;  %v9094_v36 = vld [vmem:[#allocation12 + $0x88c] ss:$28 sps:$4 sm:$0xff]   ;;  %v9097_v37 = vld [vmem:[#allocation12 + $0x894] ss:$28 sps:$4 sm:$0xff]  }
 0x3f9   :  { %4572 = vmatprep.subr.bf16.mxu0 %v9040_v39  ;;  %4736 = vmatprep.subr.bf16.mxu1 %v9043_v40 }
 0x3fa   :  { %v1968_v52 = vpop.f32.mrb[16].mxu0 }
 0x3fb   :  { %v10505_v53 = vadd.f32 %v1968_v52, %v1929_v48  ;;  %v8431_v54 = vpop.f32.mrb[17].mxu0  ;;  %v9100_v48 = vld [vmem:[#allocation12 + $0x8c4] ss:$28 sps:$4 sm:$0xff]  }
 0x3fc   :  { %v1971_v3 = vpop.f32.mrb[18].mxu0  ;;  %4573 = vmatpush1.bf16.msra.mxu0 %v9038_v45  ;;  %4737 = vmatpush1.bf16.msra.mxu1 %v9041_v47  ;;  %v9095_v47 = vld [vmem:[#allocation12 + $0x890] ss:$28 sps:$4 sm:$0xff]   ;;  %v9098_v54 = vld [vmem:[#allocation12 + $0x8c0] ss:$28 sps:$4 sm:$0xff]  }
 0x3fd   :  { %v8432_v56 = vpop.f32.mrb[19].mxu0  ;;  %4574 = vmatprep.subr.bf16.mxu0 %v9046_v49  ;;  %4738 = vmatprep.subr.bf16.mxu1 %v9049_v50  ;;  %v9103_v50 = vld [vmem:[#allocation12 + $0x8cc] ss:$28 sps:$4 sm:$0xff]   ;;  %vm1980_vm12 = vcmp.gt.f32.partialorder %v10505_v53, 0.0 }
 0x3fe   :  { %v9101_v3 = vld [vmem:[#allocation12 + $0x8c8] ss:$28 sps:$4 sm:$0xff]   ;;  %v9104_v56 = vld [vmem:[#allocation12 + $0x8f8] ss:$28 sps:$4 sm:$0xff]  }
 0x400   :  { %4575 = vmatpush1.bf16.msra.mxu0 %v9044_v9  ;;  %4739 = vmatpush1.bf16.msra.mxu1 %v9047_v55  ;;  %v9106_v9 = vld [vmem:[#allocation12 + $0x8fc] ss:$28 sps:$4 sm:$0xff]   ;;  %v9109_v55 = vld [vmem:[#allocation12 + $0x904] ss:$28 sps:$4 sm:$0xff]  }
 0x401   :  { %4585 = vmatprep.subr.bf16.mxu0 %v9052_v57  ;;  %4749 = vmatprep.subr.bf16.mxu1 %v9055_v58  ;;  %v9107_v57 = vld [vmem:[#allocation12 + $0x900] ss:$28 sps:$4 sm:$0xff]   ;;  %v9112_v58 = vld [vmem:[#allocation12 + $0x934] ss:$28 sps:$4 sm:$0xff]  }
 0x403   :  { %4577 = vmatmul.mubr.bf16.vlgmr.msra.gmra.mrb[20].mxu0 %v10507_v62  ;;  %4741 = vmatmul.mubr.bf16.vlgmr.msra.gmra.mrb[12].mxu1 %v10507_v62 }
 0x404   :  { %4586 = vmatpush1.bf16.msra.mxu0 %v9050_v60  ;;  %4750 = vmatpush1.bf16.msra.mxu1 %v9053_v61  ;;  %v9110_v60 = vld [vmem:[#allocation12 + $0x930] ss:$28 sps:$4 sm:$0xff]   ;;  %v9113_v61 = vld [vmem:[#allocation12 + $0x938] ss:$28 sps:$4 sm:$0xff]  }
 0x405   :  { %4587 = vmatprep.subr.bf16.mxu0 %v9058_v63  ;;  %4751 = vmatprep.subr.bf16.mxu1 %v9061_v1  ;;  %v9118_v63 = vld [vmem:[#allocation12 + $0x96c] ss:$28 sps:$4 sm:$0xff]   ;;  %v9121_v1 = vld [vmem:[#allocation12 + $0x974] ss:$28 sps:$4 sm:$0xff]  }
 0x408   :  { %4588 = vmatpush1.bf16.msra.mxu0 %v9056_v5  ;;  %4752 = vmatpush1.bf16.msra.mxu1 %v9059_v6  ;;  %v9116_v5 = vld [vmem:[#allocation12 + $0x968] ss:$28 sps:$4 sm:$0xff]   ;;  %v9119_v6 = vld [vmem:[#allocation12 + $0x970] ss:$28 sps:$4 sm:$0xff]  }
 0x409   :  { %4589 = vmatprep.subr.bf16.mxu0 %v9064_v7  ;;  %4753 = vmatprep.subr.bf16.mxu1 %v9067_v8  ;;  %v9124_v7 = vld [vmem:[#allocation12 + $0x9a4] ss:$28 sps:$4 sm:$0xff]   ;;  %v9127_v8 = vld [vmem:[#allocation12 + $0x9ac] ss:$28 sps:$4 sm:$0xff]  }
 0x40c   :  { %4590 = vmatpush1.bf16.msra.mxu0 %v9062_v10  ;;  %4754 = vmatpush1.bf16.msra.mxu1 %v9065_v11  ;;  %v767_v10 = vsub.s32 4, %v10417_v43  ;;  %v9122_v11 = vld [vmem:[#allocation12 + $0x9a0] ss:$28 sps:$4 sm:$0xff]   ;;  %v9717_v43 = vld [vmem:[#allocation15 + $0x62c] ss:$16 sps:$4 sm:$0xff]  }
 0x40d   :  { %4591 = vmatprep.subr.bf16.mxu0 %v9070_v12  ;;  %4755 = vmatprep.subr.bf16.mxu1 %v9073_v13  ;;  %v9125_v12 = vld [vmem:[#allocation12 + $0x9a8] ss:$28 sps:$4 sm:$0xff]   ;;  %v9130_v13 = vld [vmem:[#allocation12 + $0x9dc] ss:$28 sps:$4 sm:$0xff]  }
 0x410   :  { %4592 = vmatpush1.bf16.msra.mxu0 %v9068_v14  ;;  %4756 = vmatpush1.bf16.msra.mxu1 %v9071_v15  ;;  %v9133_v14 = vld [vmem:[#allocation12 + $0x9e4] ss:$28 sps:$4 sm:$0xff]   ;;  %v768_v15 = vrot.slane %v10470_v2, %v767_v10 }
 0x411   :  { %4593 = vmatprep.subr.bf16.mxu0 %v9076_v16  ;;  %4757 = vmatprep.subr.bf16.mxu1 %v9079_v17  ;;  %v9128_v16 = vld [vmem:[#allocation12 + $0x9d8] ss:$28 sps:$4 sm:$0xff]   ;;  %v9131_v17 = vld [vmem:[#allocation12 + $0x9e0] ss:$28 sps:$4 sm:$0xff]   ;;  %v9140_v2 = vld [vmem:[#allocation12 + $0xa48] ss:$28 sps:$4 sm:$0xff]  }
 0x414   :  { %4594 = vmatpush1.bf16.msra.mxu0 %v9074_v19  ;;  %4758 = vmatpush1.bf16.msra.mxu1 %v9077_v20  ;;  %v9136_v19 = vld [vmem:[#allocation12 + $0xa14] ss:$28 sps:$4 sm:$0xff]   ;;  %v9139_v20 = vld [vmem:[#allocation12 + $0xa1c] ss:$28 sps:$4 sm:$0xff]  }
 0x415   :  { %4595 = vmatprep.subr.bf16.mxu0 %v9082_v21  ;;  %4759 = vmatprep.subr.bf16.mxu1 %v9085_v22  ;;  %v9134_v22 = vld [vmem:[#allocation12 + $0xa10] ss:$28 sps:$4 sm:$0xff]  }
 0x418   :  { %4596 = vmatpush1.bf16.msra.mxu0 %v9080_v24  ;;  %4760 = vmatpush1.bf16.msra.mxu1 %v9083_v41  ;;  %v9137_v24 = vld [vmem:[#allocation12 + $0xa18] ss:$28 sps:$4 sm:$0xff]   ;;  %v9142_v41 = vld [vmem:[#allocation12 + $0xa4c] ss:$28 sps:$4 sm:$0xff]  }
 0x419   :  { %v10515_v35 = vpop.f32.mrb[8].mxu1  ;;  %4597 = vmatprep.subr.bf16.mxu0 %v9088_v26  ;;  %4761 = vmatprep.subr.bf16.mxu1 %v9091_v27  ;;  %v9145_v26 = vld [vmem:[#allocation12 + $0xa54] ss:$28 sps:$4 sm:$0xff]  }
 0x41a   :  { %v1889_v38 = vpop.f32.mrb[9].mxu1  ;;  %v8477_v21 = vadd.f32 %v10515_v35, %v768_v15  ;;  %v9146_v35 = vld [vmem:[#allocation12 + $0xa80] ss:$28 sps:$4 sm:$0xff]   ;;  %v9196_v15 = vld [vmem:[#allocation12 + $0x14] ss:$28 sps:$4 sm:$0xff]  }
 0x41b   :  { %v8478_v39 = vadd.f32 %v1889_v38, %v772_v30  ;;  %v1891_v40 = vpop.f32.mrb[10].mxu1  ;;  %v9143_v30 = vld [vmem:[#allocation12 + $0xa50] ss:$28 sps:$4 sm:$0xff]  }
 0x41c   :  { %4598 = vmatpush1.bf16.msra.mxu0 %v9086_v31  ;;  %4762 = vmatpush1.bf16.msra.mxu1 %v9089_v33  ;;  %v1892_v45 = vpop.f32.mrb[11].mxu1  ;;  %v1985_v27 = vmul.f32 0.01, %v8477_v21  ;;  %vm1978_vm11 = vcmp.gt.f32.partialorder %v8477_v21, 0.0  ;;  %v9148_v31 = vld [vmem:[#allocation12 + $0xa84] ss:$28 sps:$4 sm:$0xff]  }
 0x41d   :  { %vm1979_vm10 = vcmp.gt.f32.partialorder %v8478_v39, 0.0  ;;  %v1986_v49 = vmul.f32 0.01, %v8478_v39  ;;  %4599 = vmatprep.subr.bf16.mxu0 %v9094_v36  ;;  %4763 = vmatprep.subr.bf16.mxu1 %v9097_v37  ;;  %v9151_v33 = vld [vmem:[#allocation12 + $0xa8c] ss:$28 sps:$4 sm:$0xff]  }
 0x41e   :  { %v1992_v36 = vsel %vm1978_vm11, %v8477_v21, %v1985_v27  ;;  %v9149_v37 = vld [vmem:[#allocation12 + $0xa88] ss:$28 sps:$4 sm:$0xff]   ;;  %v9155_v45 = vld [vmem:[#allocation12 + $0xac0] ss:$28 sps:$4 sm:$0xff]   ;;  %v9198_v21 = vld [vmem:[#allocation12 + $0x18] ss:$28 sps:$4 sm:$0xff]  }
 0x41f   :  { %v1993_v51 = vsel %vm1979_vm10, %v8478_v39, %v1986_v49  ;;  %v10526_v38 = vpack.c.bf16 %v1992_v36, %v1992_v36  ;;  %v9154_v39 = vld [vmem:[#allocation12 + $0xabc] ss:$28 sps:$4 sm:$0xff]   ;;  %v9157_v40 = vld [vmem:[#allocation12 + $0xac4] ss:$28 sps:$4 sm:$0xff]   ;;  %v9158_v49 = vld [vmem:[#allocation12 + $0xaf0] ss:$28 sps:$4 sm:$0xff]  }
 0x420   :  { %v10517_v52 = vpack.c.bf16 %v1993_v51, %v1993_v51  ;;  %4600 = vmatpush1.bf16.msra.mxu0 %v9092_v42  ;;  %4764 = vmatpush1.bf16.msra.mxu1 %v9095_v47  ;;  %v9152_v42 = vld [vmem:[#allocation12 + $0xab8] ss:$28 sps:$4 sm:$0xff]   ;;  %v9166_v51 = vld [vmem:[#allocation12 + $0xb2c] ss:$28 sps:$4 sm:$0xff]  }
 0x421   :  { %4601 = vmatprep.subr.bf16.mxu0 %v9100_v48  ;;  %4765 = vmatprep.subr.bf16.mxu1 %v9103_v50  ;;  %v9160_v47 = vld [vmem:[#allocation12 + $0xaf4] ss:$28 sps:$4 sm:$0xff]   ;;  %v9163_v48 = vld [vmem:[#allocation12 + $0xafc] ss:$28 sps:$4 sm:$0xff]   ;;  %v9207_v27 = vld [vmem:[#allocation12 + $0x248] ss:$28 sps:$4 sm:$0xff]  }
 0x422   :  { %4617 = vmatprep.mubr.bf16.mxu0 %v10517_v52  ;;  %4781 = vmatprep.mubr.bf16.mxu1 %v10517_v52  ;;  %v9161_v50 = vld [vmem:[#allocation12 + $0xaf8] ss:$28 sps:$4 sm:$0xff]  }
 0x423   :  { %v9209_v36 = vld [vmem:[#allocation12 + $0xb8] ss:$28 sps:$4 sm:$0xff]  }
 0x424   :  { %4602 = vmatpush1.bf16.msra.mxu0 %v9098_v54  ;;  %4766 = vmatpush1.bf16.msra.mxu1 %v9101_v3  ;;  %v9169_v54 = vld [vmem:[#allocation12 + $0xb34] ss:$28 sps:$4 sm:$0xff]   ;;  %v9164_v3 = vld [vmem:[#allocation12 + $0xb28] ss:$28 sps:$4 sm:$0xff]  }
 0x425   :  { %4603 = vmatprep.subr.bf16.mxu0 %v9106_v9  ;;  %4767 = vmatprep.subr.bf16.mxu1 %v9109_v55  ;;  %v9167_v9 = vld [vmem:[#allocation12 + $0xb30] ss:$28 sps:$4 sm:$0xff]   ;;  %v9172_v55 = vld [vmem:[#allocation12 + $0xb64] ss:$28 sps:$4 sm:$0xff]  }
 0x428   :  { %4604 = vmatpush1.bf16.msra.mxu0 %v9104_v56  ;;  %4768 = vmatpush1.bf16.msra.mxu1 %v9107_v57  ;;  %v9175_v56 = vld [vmem:[#allocation12 + $0xb6c] ss:$28 sps:$4 sm:$0xff]   ;;  %v9170_v57 = vld [vmem:[#allocation12 + $0xb60] ss:$28 sps:$4 sm:$0xff]  }
 0x429   :  { %4605 = vmatprep.subr.bf16.mxu0 %v9112_v58  ;;  %4769 = vmatprep.subr.bf16.mxu1 %v9115_v59  ;;  %v9173_v58 = vld [vmem:[#allocation12 + $0xb68] ss:$28 sps:$4 sm:$0xff]   ;;  %v9178_v59 = vld [vmem:[#allocation12 + $0xb9c] ss:$28 sps:$4 sm:$0xff]  }
 0x42c   :  { %4606 = vmatpush1.bf16.msra.mxu0 %v9110_v60  ;;  %4770 = vmatpush1.bf16.msra.mxu1 %v9113_v61  ;;  %v9181_v60 = vld [vmem:[#allocation12 + $0xba4] ss:$28 sps:$4 sm:$0xff]   ;;  %v9176_v61 = vld [vmem:[#allocation12 + $0xb98] ss:$28 sps:$4 sm:$0xff]  }
 0x42d   :  { %4607 = vmatprep.subr.bf16.mxu0 %v9118_v63  ;;  %4771 = vmatprep.subr.bf16.mxu1 %v9121_v1  ;;  %v9179_v63 = vld [vmem:[#allocation12 + $0xba0] ss:$28 sps:$4 sm:$0xff]   ;;  %v9184_v1 = vld [vmem:[#allocation12 + $0xbd4] ss:$28 sps:$4 sm:$0xff]  }
 0x430   :  { %4608 = vmatpush1.bf16.msra.mxu0 %v9116_v5  ;;  %4772 = vmatpush1.bf16.msra.mxu1 %v9119_v6  ;;  %v9187_v5 = vld [vmem:[#allocation12 + $0xbdc] ss:$28 sps:$4 sm:$0xff]   ;;  %v9182_v6 = vld [vmem:[#allocation12 + $0xbd0] ss:$28 sps:$4 sm:$0xff]  }
 0x431   :  { %4609 = vmatprep.subr.bf16.mxu0 %v9124_v7  ;;  %4773 = vmatprep.subr.bf16.mxu1 %v9127_v8  ;;  %v9185_v7 = vld [vmem:[#allocation12 + $0xbd8] ss:$28 sps:$4 sm:$0xff]   ;;  %v9190_v8 = vld [vmem:[#allocation12 + $0xc0c] ss:$28 sps:$4 sm:$0xff]  }
 0x434   :  { %4610 = vmatpush1.bf16.msra.mxu0 %v9122_v11  ;;  %4774 = vmatpush1.bf16.msra.mxu1 %v9125_v12  ;;  %v9193_v11 = vld [vmem:[#allocation12 + $0xc14] ss:$28 sps:$4 sm:$0xff]   ;;  %v1987_v12 = vmul.f32 0.01, %v10505_v53 }
 0x435   :  { %4611 = vmatprep.subr.bf16.mxu0 %v9130_v13  ;;  %4775 = vmatprep.subr.bf16.mxu1 %v9133_v14  ;;  %v9188_v13 = vld [vmem:[#allocation12 + $0xc08] ss:$28 sps:$4 sm:$0xff]   ;;  %v9191_v14 = vld [vmem:[#allocation12 + $0xc10] ss:$28 sps:$4 sm:$0xff]  }
 0x438   :  { %4612 = vmatpush1.bf16.msra.mxu0 %v9128_v16  ;;  %4776 = vmatpush1.bf16.msra.mxu1 %v9131_v17  ;;  %v9197_v16 = vld [vmem:[#allocation12 + $0x1d8] ss:$28 sps:$4 sm:$0xff]   ;;  %v1994_v17 = vsel %vm1980_vm12, %v10505_v53, %v1987_v12  ;;  %v9203_v53 = vld [vmem:[#allocation12 + $0x50] ss:$28 sps:$4 sm:$0xff]  }
 0x439   :  { %4613 = vmatprep.subr.bf16.mxu0 %v9136_v19  ;;  %4777 = vmatprep.subr.bf16.mxu1 %v9139_v20  ;;  %v9194_v19 = vld [vmem:[#allocation12 + $0x10] ss:$28 sps:$4 sm:$0xff]   ;;  %v10535_v20 = vpack.c.bf16 %v1994_v17, %v1994_v17  ;;  %v9251_v12 = vld [vmem:[#allocation12 + $0x27c] ss:$28 sps:$4 sm:$0xff]  }
 0x43a   :  { %v9257_v17 = vld [vmem:[#allocation12 + $0x638] ss:$28 sps:$4 sm:$0xff]  }
 0x43c   :  { %4614 = vmatpush1.bf16.msra.mxu0 %v9134_v22  ;;  %4778 = vmatpush1.bf16.msra.mxu1 %v9137_v24  ;;  %v9201_v22 = vld [vmem:[#allocation12 + $0x4c] ss:$28 sps:$4 sm:$0xff]  }
 0x43d   :  { %4615 = vmatprep.subr.bf16.mxu0 %v9142_v41  ;;  %4779 = vmatprep.subr.bf16.mxu1 %v9145_v26  ;;  %v9202_v24 = vld [vmem:[#allocation12 + $0x210] ss:$28 sps:$4 sm:$0xff]   ;;  %v9199_v41 = vld [vmem:[#allocation12 + $0x48] ss:$28 sps:$4 sm:$0xff]  }
 0x43e   :  { %v9206_v26 = vld [vmem:[#allocation12 + $0x84] ss:$28 sps:$4 sm:$0xff]  }
 0x440   :  { %4616 = vmatpush1.bf16.msra.mxu0 %v9140_v2  ;;  %4780 = vmatpush1.bf16.msra.mxu1 %v9143_v30  ;;  %v9204_v2 = vld [vmem:[#allocation12 + $0x80] ss:$28 sps:$4 sm:$0xff]   ;;  %v9208_v30 = vld [vmem:[#allocation12 + $0x88] ss:$28 sps:$4 sm:$0xff]  }
 0x441   :  { %4626 = vmatprep.subr.bf16.mxu0 %v9148_v31  ;;  %4790 = vmatprep.subr.bf16.mxu1 %v9151_v33  ;;  %v9211_v31 = vld [vmem:[#allocation12 + $0xbc] ss:$28 sps:$4 sm:$0xff]  }
 0x442   :  { %v9212_v33 = vld [vmem:[#allocation12 + $0x280] ss:$28 sps:$4 sm:$0xff]  }
 0x443   :  { %4618 = vmatmul.mubr.bf16.vlgmr.msra.gmra.mrb[20].mxu0 %v10526_v38  ;;  %4782 = vmatmul.mubr.bf16.vlgmr.msra.gmra.mrb[12].mxu1 %v10526_v38 }
 0x444   :  { %4627 = vmatpush1.bf16.msra.mxu0 %v9146_v35  ;;  %4791 = vmatpush1.bf16.msra.mxu1 %v9149_v37  ;;  %v9213_v35 = vld [vmem:[#allocation12 + $0xc0] ss:$28 sps:$4 sm:$0xff]   ;;  %v9216_v37 = vld [vmem:[#allocation12 + $0xf4] ss:$28 sps:$4 sm:$0xff]  }
 0x445   :  { %4628 = vmatprep.subr.bf16.mxu0 %v9154_v39  ;;  %4792 = vmatprep.subr.bf16.mxu1 %v9157_v40  ;;  %v9214_v39 = vld [vmem:[#allocation12 + $0xf0] ss:$28 sps:$4 sm:$0xff]   ;;  %v9218_v40 = vld [vmem:[#allocation12 + $0xf8] ss:$28 sps:$4 sm:$0xff]  }
 0x446   :  { %4658 = vmatprep.mubr.bf16.mxu0 %v10144_v29  ;;  %4822 = vmatprep.mubr.bf16.mxu1 %v10144_v29 }
 0x448   :  { %4629 = vmatpush1.bf16.msra.mxu0 %v9152_v42  ;;  %4793 = vmatpush1.bf16.msra.mxu1 %v9155_v45  ;;  %v9221_v42 = vld [vmem:[#allocation12 + $0x12c] ss:$28 sps:$4 sm:$0xff]  }
 0x449   :  { %4630 = vmatprep.subr.bf16.mxu0 %v9160_v47  ;;  %4794 = vmatprep.subr.bf16.mxu1 %v9163_v48  ;;  %v9222_v45 = vld [vmem:[#allocation12 + $0x2f0] ss:$28 sps:$4 sm:$0xff]   ;;  %v9219_v47 = vld [vmem:[#allocation12 + $0x128] ss:$28 sps:$4 sm:$0xff]  }
 0x44a   :  { %v9223_v48 = vld [vmem:[#allocation12 + $0x130] ss:$28 sps:$4 sm:$0xff]  }
 0x44c   :  { %4631 = vmatpush1.bf16.msra.mxu0 %v9158_v49  ;;  %4795 = vmatpush1.bf16.msra.mxu1 %v9161_v50  ;;  %v9226_v49 = vld [vmem:[#allocation12 + $0x164] ss:$28 sps:$4 sm:$0xff]  }
 0x44d   :  { %4632 = vmatprep.subr.bf16.mxu0 %v9166_v51  ;;  %4796 = vmatprep.subr.bf16.mxu1 %v9169_v54  ;;  %v9227_v50 = vld [vmem:[#allocation12 + $0x328] ss:$28 sps:$4 sm:$0xff]   ;;  %v9224_v51 = vld [vmem:[#allocation12 + $0x160] ss:$28 sps:$4 sm:$0xff]  }
 0x44e   :  { %v9228_v54 = vld [vmem:[#allocation12 + $0x168] ss:$28 sps:$4 sm:$0xff]  }
 0x450   :  { %4633 = vmatpush1.bf16.msra.mxu0 %v9164_v3  ;;  %4797 = vmatpush1.bf16.msra.mxu1 %v9167_v9  ;;  %v9231_v3 = vld [vmem:[#allocation12 + $0x19c] ss:$28 sps:$4 sm:$0xff]  }
 0x451   :  { %4634 = vmatprep.subr.bf16.mxu0 %v9172_v55  ;;  %4798 = vmatprep.subr.bf16.mxu1 %v9175_v56  ;;  %v9232_v9 = vld [vmem:[#allocation12 + $0x360] ss:$28 sps:$4 sm:$0xff]   ;;  %v9229_v55 = vld [vmem:[#allocation12 + $0x198] ss:$28 sps:$4 sm:$0xff]  }
 0x452   :  { %v9233_v56 = vld [vmem:[#allocation12 + $0x1a0] ss:$28 sps:$4 sm:$0xff]  }
 0x454   :  { %4635 = vmatpush1.bf16.msra.mxu0 %v9170_v57  ;;  %4799 = vmatpush1.bf16.msra.mxu1 %v9173_v58  ;;  %v9236_v57 = vld [vmem:[#allocation12 + $0x1d4] ss:$28 sps:$4 sm:$0xff]  }
 0x455   :  { %4636 = vmatprep.subr.bf16.mxu0 %v9178_v59  ;;  %4800 = vmatprep.subr.bf16.mxu1 %v9181_v60  ;;  %v9237_v58 = vld [vmem:[#allocation12 + $0x558] ss:$28 sps:$4 sm:$0xff]   ;;  %v9234_v59 = vld [vmem:[#allocation12 + $0x1d0] ss:$28 sps:$4 sm:$0xff]  }
 0x456   :  { %v9238_v60 = vld [vmem:[#allocation12 + $0x398] ss:$28 sps:$4 sm:$0xff]  }
 0x458   :  { %4637 = vmatpush1.bf16.msra.mxu0 %v9176_v61  ;;  %4801 = vmatpush1.bf16.msra.mxu1 %v9179_v63  ;;  %v9241_v61 = vld [vmem:[#allocation12 + $0x20c] ss:$28 sps:$4 sm:$0xff]  }
 0x459   :  { %4638 = vmatprep.subr.bf16.mxu0 %v9184_v1  ;;  %4802 = vmatprep.subr.bf16.mxu1 %v9187_v5  ;;  %v9242_v63 = vld [vmem:[#allocation12 + $0x590] ss:$28 sps:$4 sm:$0xff]   ;;  %v9239_v1 = vld [vmem:[#allocation12 + $0x208] ss:$28 sps:$4 sm:$0xff]  }
 0x45a   :  { %v9243_v5 = vld [vmem:[#allocation12 + $0x3d0] ss:$28 sps:$4 sm:$0xff]  }
 0x45c   :  { %4639 = vmatpush1.bf16.msra.mxu0 %v9182_v6  ;;  %4803 = vmatpush1.bf16.msra.mxu1 %v9185_v7  ;;  %v9246_v6 = vld [vmem:[#allocation12 + $0x244] ss:$28 sps:$4 sm:$0xff]  }
 0x45d   :  { %4640 = vmatprep.subr.bf16.mxu0 %v9190_v8  ;;  %4804 = vmatprep.subr.bf16.mxu1 %v9193_v11  ;;  %v9247_v7 = vld [vmem:[#allocation12 + $0x5c8] ss:$28 sps:$4 sm:$0xff]   ;;  %v9244_v8 = vld [vmem:[#allocation12 + $0x240] ss:$28 sps:$4 sm:$0xff]  }
 0x45e   :  { %v9248_v11 = vld [vmem:[#allocation12 + $0x408] ss:$28 sps:$4 sm:$0xff]  }
 0x460   :  { %4641 = vmatpush1.bf16.msra.mxu0 %v9188_v13  ;;  %4805 = vmatpush1.bf16.msra.mxu1 %v9191_v14  ;;  %v9252_v13 = vld [vmem:[#allocation12 + $0x600] ss:$28 sps:$4 sm:$0xff]   ;;  %v9249_v14 = vld [vmem:[#allocation12 + $0x278] ss:$28 sps:$4 sm:$0xff]  }
 0x461   :  { %4831 = vmatprep.subr.bf16.mxu0 %v9196_v15  ;;  %8259 = vmatprep.subr.bf16.mxu1 %v9197_v16  ;;  %v9253_v15 = vld [vmem:[#allocation12 + $0x440] ss:$28 sps:$4 sm:$0xff]   ;;  %v9256_v16 = vld [vmem:[#allocation12 + $0x2b4] ss:$28 sps:$4 sm:$0xff]  }
 0x463   :  { %4659 = vmatmul.mubr.bf16.vlgmr.msra.gmra.mrb[20].mxu0 %v10535_v20  ;;  %4823 = vmatmul.mubr.bf16.vlgmr.msra.gmra.mrb[12].mxu1 %v10535_v20 }
 0x464   :  { %4832 = vmatpush1.bf16.msra.mxu0 %v9194_v19  ;;  %4863 = vmatprep.mubr.bf16.mxu0 %v10483_v25  ;;  %v9254_v19 = vld [vmem:[#allocation12 + $0x2b0] ss:$28 sps:$4 sm:$0xff]  }
 0x465   :  { %8260 = vmatpush3.bf16.msra.mxu1 %v9198_v21  ;;  %5027 = vmatprep.mubr.bf16.mxu1 %v10483_v25  ;;  %v9217_v25 = vld [vmem:[#allocation12 + $0x2b8] ss:$28 sps:$4 sm:$0xff]  }
 0x466   :  { %4833 = vmatprep.subr.bf16.mxu0 %v9201_v22  ;;  %8261 = vmatprep.subr.bf16.mxu1 %v9202_v24  ;;  %v9258_v21 = vld [vmem:[#allocation12 + $0x478] ss:$28 sps:$4 sm:$0xff]   ;;  %v9261_v22 = vld [vmem:[#allocation12 + $0x2ec] ss:$28 sps:$4 sm:$0xff]  }
 0x467   :  { %v9262_v24 = vld [vmem:[#allocation12 + $0x670] ss:$28 sps:$4 sm:$0xff]  }
 0x468   :  { %4834 = vmatpush1.bf16.msra.mxu0 %v9199_v41  ;;  %v9259_v41 = vld [vmem:[#allocation12 + $0x2e8] ss:$28 sps:$4 sm:$0xff]  }
 0x469   :  { %8262 = vmatpush3.bf16.msra.mxu1 %v9203_v53  ;;  %4835 = vmatprep.subr.bf16.mxu0 %v9206_v26  ;;  %v9263_v53 = vld [vmem:[#allocation12 + $0x4b0] ss:$28 sps:$4 sm:$0xff]   ;;  %v9266_v26 = vld [vmem:[#allocation12 + $0x324] ss:$28 sps:$4 sm:$0xff]  }
 0x46a   :  { %8263 = vmatprep.subr.bf16.mxu1 %v9207_v27  ;;  %v9267_v27 = vld [vmem:[#allocation12 + $0x6a8] ss:$28 sps:$4 sm:$0xff]  }
 0x46c   :  { %4836 = vmatpush1.bf16.msra.mxu0 %v9204_v2  ;;  %v9264_v2 = vld [vmem:[#allocation12 + $0x320] ss:$28 sps:$4 sm:$0xff]  }
 0x46d   :  { %8264 = vmatpush3.bf16.msra.mxu1 %v9208_v30  ;;  %4837 = vmatprep.subr.bf16.mxu0 %v9211_v31  ;;  %v9268_v30 = vld [vmem:[#allocation12 + $0x4e8] ss:$28 sps:$4 sm:$0xff]   ;;  %v9271_v31 = vld [vmem:[#allocation12 + $0x35c] ss:$28 sps:$4 sm:$0xff]  }
 0x46e   :  { %8265 = vmatprep.subr.bf16.mxu1 %v9212_v33  ;;  %v9272_v33 = vld [vmem:[#allocation12 + $0x6e0] ss:$28 sps:$4 sm:$0xff]  }
 0x470   :  { %4838 = vmatpush1.bf16.msra.mxu0 %v9209_v36  ;;  %v9269_v36 = vld [vmem:[#allocation12 + $0x358] ss:$28 sps:$4 sm:$0xff]  }
 0x471   :  { %8266 = vmatpush3.bf16.msra.mxu1 %v9213_v35  ;;  %4839 = vmatprep.subr.bf16.mxu0 %v9216_v37  ;;  %v9273_v35 = vld [vmem:[#allocation12 + $0x520] ss:$28 sps:$4 sm:$0xff]   ;;  %v9276_v37 = vld [vmem:[#allocation12 + $0x394] ss:$28 sps:$4 sm:$0xff]  }
 0x472   :  { %8267 = vmatprep.subr.bf16.mxu1 %v9217_v25  ;;  %v9277_v25 = vld [vmem:[#allocation12 + $0x8d8] ss:$28 sps:$4 sm:$0xff]  }
 0x474   :  { %4840 = vmatpush1.bf16.msra.mxu0 %v9214_v39  ;;  %v9274_v39 = vld [vmem:[#allocation12 + $0x390] ss:$28 sps:$4 sm:$0xff]  }
 0x475   :  { %8268 = vmatpush3.bf16.msra.mxu1 %v9218_v40  ;;  %4841 = vmatprep.subr.bf16.mxu0 %v9221_v42  ;;  %v9278_v40 = vld [vmem:[#allocation12 + $0x718] ss:$28 sps:$4 sm:$0xff]   ;;  %v9281_v42 = vld [vmem:[#allocation12 + $0x3cc] ss:$28 sps:$4 sm:$0xff]  }
 0x476   :  { %8269 = vmatprep.subr.bf16.mxu1 %v9222_v45  ;;  %v9282_v45 = vld [vmem:[#allocation12 + $0x910] ss:$28 sps:$4 sm:$0xff]  }
 0x478   :  { %4842 = vmatpush1.bf16.msra.mxu0 %v9219_v47  ;;  %v9279_v47 = vld [vmem:[#allocation12 + $0x3c8] ss:$28 sps:$4 sm:$0xff]  }
 0x479   :  { %8270 = vmatpush3.bf16.msra.mxu1 %v9223_v48  ;;  %4843 = vmatprep.subr.bf16.mxu0 %v9226_v49  ;;  %v9283_v48 = vld [vmem:[#allocation12 + $0x750] ss:$28 sps:$4 sm:$0xff]   ;;  %v9286_v49 = vld [vmem:[#allocation12 + $0x404] ss:$28 sps:$4 sm:$0xff]  }
 0x47a   :  { %8271 = vmatprep.subr.bf16.mxu1 %v9227_v50  ;;  %v9287_v50 = vld [vmem:[#allocation12 + $0x948] ss:$28 sps:$4 sm:$0xff]  }
 0x47c   :  { %4844 = vmatpush1.bf16.msra.mxu0 %v9224_v51  ;;  %v9284_v51 = vld [vmem:[#allocation12 + $0x400] ss:$28 sps:$4 sm:$0xff]  }
 0x47d   :  { %8272 = vmatpush3.bf16.msra.mxu1 %v9228_v54  ;;  %4845 = vmatprep.subr.bf16.mxu0 %v9231_v3  ;;  %v9291_v54 = vld [vmem:[#allocation12 + $0x43c] ss:$28 sps:$4 sm:$0xff]  }
 0x47e   :  { %8273 = vmatprep.subr.bf16.mxu1 %v9232_v9  ;;  %v9292_v3 = vld [vmem:[#allocation12 + $0x980] ss:$28 sps:$4 sm:$0xff]   ;;  %v9289_v9 = vld [vmem:[#allocation12 + $0x438] ss:$28 sps:$4 sm:$0xff]  }
 0x480   :  { %4846 = vmatpush1.bf16.msra.mxu0 %v9229_v55  ;;  %v9296_v55 = vld [vmem:[#allocation12 + $0x474] ss:$28 sps:$4 sm:$0xff]  }
 0x481   :  { %8274 = vmatpush3.bf16.msra.mxu1 %v9233_v56  ;;  %4847 = vmatprep.subr.bf16.mxu0 %v9236_v57  ;;  %v9297_v56 = vld [vmem:[#allocation12 + $0x9b8] ss:$28 sps:$4 sm:$0xff]   ;;  %v9294_v57 = vld [vmem:[#allocation12 + $0x470] ss:$28 sps:$4 sm:$0xff]  }
 0x482   :  { %8281 = vmatprep.subr.bf16.mxu1 %v9237_v58  ;;  %v9298_v58 = vld [vmem:[#allocation12 + $0x7f8] ss:$28 sps:$4 sm:$0xff]  }
 0x484   :  { %5028 = vmatmul.mubr.bf16.vlgmr.msra.gmra.mrb[16].mxu1 %v10485_v28  ;;  %4848 = vmatpush1.bf16.msra.mxu0 %v9234_v59  ;;  %v9301_v59 = vld [vmem:[#allocation12 + $0x4ac] ss:$28 sps:$4 sm:$0xff]  }
 0x485   :  { %8282 = vmatpush3.bf16.msra.mxu1 %v9238_v60  ;;  %5067 = vmatprep.mubr.bf16.mxu1 %v10489_v32  ;;  %v9302_v60 = vld [vmem:[#allocation12 + $0x9f0] ss:$28 sps:$4 sm:$0xff]  }
 0x486   :  { %4849 = vmatprep.subr.bf16.mxu0 %v9241_v61  ;;  %8283 = vmatprep.subr.bf16.mxu1 %v9242_v63  ;;  %v9299_v61 = vld [vmem:[#allocation12 + $0x4a8] ss:$28 sps:$4 sm:$0xff]   ;;  %v9303_v63 = vld [vmem:[#allocation12 + $0x830] ss:$28 sps:$4 sm:$0xff]  }
 0x488   :  { %4850 = vmatpush1.bf16.msra.mxu0 %v9239_v1  ;;  %v9306_v1 = vld [vmem:[#allocation12 + $0x4e4] ss:$28 sps:$4 sm:$0xff]  }
 0x489   :  { %8284 = vmatpush3.bf16.msra.mxu1 %v9243_v5  ;;  %4851 = vmatprep.subr.bf16.mxu0 %v9246_v6  ;;  %v9307_v5 = vld [vmem:[#allocation12 + $0xa28] ss:$28 sps:$4 sm:$0xff]   ;;  %v9304_v6 = vld [vmem:[#allocation12 + $0x4e0] ss:$28 sps:$4 sm:$0xff]  }
 0x48a   :  { %8285 = vmatprep.subr.bf16.mxu1 %v9247_v7  ;;  %v9308_v7 = vld [vmem:[#allocation12 + $0x868] ss:$28 sps:$4 sm:$0xff]  }
 0x48c   :  { %4852 = vmatpush1.bf16.msra.mxu0 %v9244_v8  ;;  %v9311_v8 = vld [vmem:[#allocation12 + $0x51c] ss:$28 sps:$4 sm:$0xff]  }
 0x48d   :  { %8286 = vmatpush3.bf16.msra.mxu1 %v9248_v11  ;;  %4853 = vmatprep.subr.bf16.mxu0 %v9251_v12  ;;  %v9312_v11 = vld [vmem:[#allocation12 + $0xa60] ss:$28 sps:$4 sm:$0xff]   ;;  %v9309_v12 = vld [vmem:[#allocation12 + $0x518] ss:$28 sps:$4 sm:$0xff]  }
 0x48e   :  { %8287 = vmatprep.subr.bf16.mxu1 %v9252_v13  ;;  %v9313_v13 = vld [vmem:[#allocation12 + $0x8a0] ss:$28 sps:$4 sm:$0xff]  }
 0x490   :  { %4854 = vmatpush1.bf16.msra.mxu0 %v9249_v14  ;;  %v9316_v14 = vld [vmem:[#allocation12 + $0x554] ss:$28 sps:$4 sm:$0xff]  }
 0x491   :  { %8288 = vmatpush3.bf16.msra.mxu1 %v9253_v15  ;;  %4855 = vmatprep.subr.bf16.mxu0 %v9256_v16  ;;  %v9314_v15 = vld [vmem:[#allocation12 + $0x550] ss:$28 sps:$4 sm:$0xff]   ;;  %v9317_v16 = vld [vmem:[#allocation12 + $0xa98] ss:$28 sps:$4 sm:$0xff]  }
 0x492   :  { %8289 = vmatprep.subr.bf16.mxu1 %v9257_v17  ;;  %v9320_v17 = vld [vmem:[#allocation12 + $0x58c] ss:$28 sps:$4 sm:$0xff]  }
 0x494   :  { %4856 = vmatpush1.bf16.msra.mxu0 %v9254_v19  ;;  %v9318_v19 = vld [vmem:[#allocation12 + $0x588] ss:$28 sps:$4 sm:$0xff]  }
 0x495   :  { %8290 = vmatpush3.bf16.msra.mxu1 %v9258_v21  ;;  %4857 = vmatprep.subr.bf16.mxu0 %v9261_v22  ;;  %v9321_v21 = vld [vmem:[#allocation12 + $0xad0] ss:$28 sps:$4 sm:$0xff]   ;;  %v9324_v22 = vld [vmem:[#allocation12 + $0x5c4] ss:$28 sps:$4 sm:$0xff]  }
 0x496   :  { %8291 = vmatprep.subr.bf16.mxu1 %v9262_v24  ;;  %v9322_v24 = vld [vmem:[#allocation12 + $0x5c0] ss:$28 sps:$4 sm:$0xff]  }
 0x498   :  { %4858 = vmatpush1.bf16.msra.mxu0 %v9259_v41  ;;  %v9325_v41 = vld [vmem:[#allocation12 + $0xb08] ss:$28 sps:$4 sm:$0xff]  }
 0x499   :  { %8292 = vmatpush3.bf16.msra.mxu1 %v9263_v53  ;;  %4859 = vmatprep.subr.bf16.mxu0 %v9266_v26  ;;  %v9328_v53 = vld [vmem:[#allocation12 + $0x5fc] ss:$28 sps:$4 sm:$0xff]  }
 0x49a   :  { %8293 = vmatprep.subr.bf16.mxu1 %v9267_v27  ;;  %v9326_v26 = vld [vmem:[#allocation12 + $0x5f8] ss:$28 sps:$4 sm:$0xff]   ;;  %v9329_v27 = vld [vmem:[#allocation12 + $0xb40] ss:$28 sps:$4 sm:$0xff]  }
 0x49c   :  { %4860 = vmatpush1.bf16.msra.mxu0 %v9264_v2  ;;  %v9332_v2 = vld [vmem:[#allocation12 + $0x634] ss:$28 sps:$4 sm:$0xff]  }
 0x49d   :  { %8294 = vmatpush3.bf16.msra.mxu1 %v9268_v30  ;;  %4861 = vmatprep.subr.bf16.mxu0 %v9271_v31  ;;  %v9330_v30 = vld [vmem:[#allocation12 + $0x630] ss:$28 sps:$4 sm:$0xff]   ;;  %v9333_v31 = vld [vmem:[#allocation12 + $0xb78] ss:$28 sps:$4 sm:$0xff]  }
 0x49e   :  { %8295 = vmatprep.subr.bf16.mxu1 %v9272_v33  ;;  %v9336_v33 = vld [vmem:[#allocation12 + $0x66c] ss:$28 sps:$4 sm:$0xff]  }
 0x4a0   :  { %4862 = vmatpush1.bf16.msra.mxu0 %v9269_v36  ;;  %v9334_v36 = vld [vmem:[#allocation12 + $0x668] ss:$28 sps:$4 sm:$0xff]  }
 0x4a1   :  { %8296 = vmatpush3.bf16.msra.mxu1 %v9273_v35  ;;  %4872 = vmatprep.subr.bf16.mxu0 %v9276_v37  ;;  %v9337_v35 = vld [vmem:[#allocation12 + $0xbb0] ss:$28 sps:$4 sm:$0xff]   ;;  %v9340_v37 = vld [vmem:[#allocation12 + $0x6a4] ss:$28 sps:$4 sm:$0xff]  }
 0x4a2   :  { %8303 = vmatprep.subr.bf16.mxu1 %v9277_v25  ;;  %v9338_v25 = vld [vmem:[#allocation12 + $0x6a0] ss:$28 sps:$4 sm:$0xff]  }
 0x4a3   :  { %4864 = vmatmul.mubr.bf16.vlgmr.msra.gmra.mrb[24].mxu0 %v10485_v28  ;;  %v9288_v28 = vld [vmem:[#allocation12 + $0x788] ss:$28 sps:$4 sm:$0xff]  }
 0x4a4   :  { %5068 = vmatmul.mubr.bf16.vlgmr.msra.gmra.mrb[20].mxu1 %v10507_v62  ;;  %4873 = vmatpush1.bf16.msra.mxu0 %v9274_v39  ;;  %v9341_v39 = vld [vmem:[#allocation12 + $0xbe8] ss:$28 sps:$4 sm:$0xff]  }
 0x4a5   :  { %4904 = vmatprep.mubr.bf16.mxu0 %v10489_v32  ;;  %8304 = vmatpush3.bf16.msra.mxu1 %v9278_v40  ;;  %v9293_v32 = vld [vmem:[#allocation12 + $0x7c0] ss:$28 sps:$4 sm:$0xff]  }
 0x4a6   :  { %5107 = vmatprep.mubr.bf16.mxu1 %v10517_v52  ;;  %4874 = vmatprep.subr.bf16.mxu0 %v9281_v42  ;;  %v9344_v40 = vld [vmem:[#allocation12 + $0x6dc] ss:$28 sps:$4 sm:$0xff]  }
 0x4a7   :  { %8305 = vmatprep.subr.bf16.mxu1 %v9282_v45  ;;  %v9342_v42 = vld [vmem:[#allocation12 + $0x6d8] ss:$28 sps:$4 sm:$0xff]   ;;  %v9345_v45 = vld [vmem:[#allocation12 + $0xc20] ss:$28 sps:$4 sm:$0xff]  }
 0x4a8   :  { %4875 = vmatpush1.bf16.msra.mxu0 %v9279_v47  ;;  %v9348_v47 = vld [vmem:[#allocation12 + $0x714] ss:$28 sps:$4 sm:$0xff]  }
 0x4a9   :  { %8306 = vmatpush3.bf16.msra.mxu1 %v9283_v48  ;;  %4876 = vmatprep.subr.bf16.mxu0 %v9286_v49  ;;  %v9372_v48 = vld [vmem:[#allocation15 + $0x4] ss:$16 sps:$4 sm:$0xff]  }
 0x4aa   :  { %8307 = vmatprep.subr.bf16.mxu1 %v9287_v50  ;;  %v9346_v49 = vld [vmem:[#allocation12 + $0x710] ss:$28 sps:$4 sm:$0xff]  }
 0x4ab   :  { %v9351_v50 = vld [vmem:[#allocation12 + $0x74c] ss:$28 sps:$4 sm:$0xff]  }
 0x4ac   :  { %4877 = vmatpush1.bf16.msra.mxu0 %v9284_v51  ;;  %v9370_v51 = vld [vmem:[#allocation15] ss:$16 sps:$4 sm:$0xff]  }
 0x4ad   :  { %8308 = vmatpush3.bf16.msra.mxu1 %v9288_v28  ;;  %4878 = vmatprep.subr.bf16.mxu0 %v9291_v54  ;;  %v9378_v28 = vld [vmem:[#allocation15 + $0x24] ss:$16 sps:$4 sm:$0xff]   ;;  %v9349_v54 = vld [vmem:[#allocation12 + $0x748] ss:$28 sps:$4 sm:$0xff]  }
 0x4ae   :  { %8309 = vmatprep.subr.bf16.mxu1 %v9292_v3  ;;  %v9354_v3 = vld [vmem:[#allocation12 + $0x784] ss:$28 sps:$4 sm:$0xff]  }
 0x4b0   :  { %4879 = vmatpush1.bf16.msra.mxu0 %v9289_v9  ;;  %v9376_v9 = vld [vmem:[#allocation15 + $0x20] ss:$16 sps:$4 sm:$0xff]  }
 0x4b1   :  { %8310 = vmatpush3.bf16.msra.mxu1 %v9293_v32  ;;  %4880 = vmatprep.subr.bf16.mxu0 %v9296_v55  ;;  %v9384_v32 = vld [vmem:[#allocation15 + $0x44] ss:$16 sps:$4 sm:$0xff]  }
 0x4b2   :  { %8311 = vmatprep.subr.bf16.mxu1 %v9297_v56  ;;  %v9352_v55 = vld [vmem:[#allocation12 + $0x780] ss:$28 sps:$4 sm:$0xff]  }
 0x4b3   :  { %v9357_v56 = vld [vmem:[#allocation12 + $0x7bc] ss:$28 sps:$4 sm:$0xff]  }
 0x4b4   :  { %4881 = vmatpush1.bf16.msra.mxu0 %v9294_v57  ;;  %v9382_v57 = vld [vmem:[#allocation15 + $0x40] ss:$16 sps:$4 sm:$0xff]  }
 0x4b5   :  { %8312 = vmatpush3.bf16.msra.mxu1 %v9298_v58  ;;  %4882 = vmatprep.subr.bf16.mxu0 %v9301_v59  ;;  %v9355_v58 = vld [vmem:[#allocation12 + $0x7b8] ss:$28 sps:$4 sm:$0xff]  }
 0x4b6   :  { %8313 = vmatprep.subr.bf16.mxu1 %v9302_v60  ;;  %v9360_v59 = vld [vmem:[#allocation12 + $0x7f4] ss:$28 sps:$4 sm:$0xff]   ;;  %v9396_v60 = vld [vmem:[#allocation15 + $0x84] ss:$16 sps:$4 sm:$0xff]  }
 0x4b8   :  { %4883 = vmatpush1.bf16.msra.mxu0 %v9299_v61  ;;  %v9358_v61 = vld [vmem:[#allocation12 + $0x7f0] ss:$28 sps:$4 sm:$0xff]  }
 0x4b9   :  { %8314 = vmatpush3.bf16.msra.mxu1 %v9303_v63  ;;  %4884 = vmatprep.subr.bf16.mxu0 %v9306_v1  ;;  %v9363_v63 = vld [vmem:[#allocation12 + $0x82c] ss:$28 sps:$4 sm:$0xff]  }
 0x4ba   :  { %8315 = vmatprep.subr.bf16.mxu1 %v9307_v5  ;;  %v9394_v1 = vld [vmem:[#allocation15 + $0x80] ss:$16 sps:$4 sm:$0xff]   ;;  %v9402_v5 = vld [vmem:[#allocation15 + $0xa4] ss:$16 sps:$4 sm:$0xff]  }
 0x4bc   :  { %4885 = vmatpush1.bf16.msra.mxu0 %v9304_v6  ;;  %v9361_v6 = vld [vmem:[#allocation12 + $0x828] ss:$28 sps:$4 sm:$0xff]  }
 0x4bd   :  { %8316 = vmatpush3.bf16.msra.mxu1 %v9308_v7  ;;  %4886 = vmatprep.subr.bf16.mxu0 %v9311_v8  ;;  %v9366_v7 = vld [vmem:[#allocation12 + $0x864] ss:$28 sps:$4 sm:$0xff]   ;;  %v9400_v8 = vld [vmem:[#allocation15 + $0xa0] ss:$16 sps:$4 sm:$0xff]  }
 0x4be   :  { %8317 = vmatprep.subr.bf16.mxu1 %v9312_v11  ;;  %v9408_v11 = vld [vmem:[#allocation15 + $0xc4] ss:$16 sps:$4 sm:$0xff]  }
 0x4c0   :  { %4887 = vmatpush1.bf16.msra.mxu0 %v9309_v12  ;;  %v9364_v12 = vld [vmem:[#allocation12 + $0x860] ss:$28 sps:$4 sm:$0xff]  }
 0x4c1   :  { %8318 = vmatpush3.bf16.msra.mxu1 %v9313_v13  ;;  %4888 = vmatprep.subr.bf16.mxu0 %v9316_v14  ;;  %v9369_v13 = vld [vmem:[#allocation12 + $0x89c] ss:$28 sps:$4 sm:$0xff]  }
 0x4c2   :  { %8433 = vmatprep.subr.bf16.mxu1 %v10142_v0  ;;  %v9406_v14 = vld [vmem:[#allocation15 + $0xc0] ss:$16 sps:$4 sm:$0xff]  }
 0x4c4   :  { %5108 = vmatmul.mubr.bf16.vlgmr.msra.gmra.mrb[24].mxu1 %v10526_v38  ;;  %4889 = vmatpush1.bf16.msra.mxu0 %v9314_v15  ;;  %v9414_v15 = vld [vmem:[#allocation15 + $0xe4] ss:$16 sps:$4 sm:$0xff]  }
 0x4c5   :  { %8434 = vmatpush3.bf16.msra.mxu1 %v9317_v16  ;;  %4890 = vmatprep.subr.bf16.mxu0 %v9320_v17  ;;  %v9367_v16 = vld [vmem:[#allocation12 + $0x898] ss:$28 sps:$4 sm:$0xff]  }
 0x4c6   :  { %8435 = vmatprep.subr.bf16.mxu1 %v10142_v0  ;;  %8449 = vmatprep.mubr.msk.bf16.mxu1 %vm10143_vm0, %v10142_v0  ;;  %v9375_v17 = vld [vmem:[#allocation12 + $0x8d4] ss:$28 sps:$4 sm:$0xff]  }
 0x4c8   :  { %4891 = vmatpush1.bf16.msra.mxu0 %v9318_v19  ;;  %v9412_v19 = vld [vmem:[#allocation15 + $0xe0] ss:$16 sps:$4 sm:$0xff]  }
 0x4c9   :  { %8436 = vmatpush3.bf16.msra.mxu1 %v9321_v21  ;;  %4892 = vmatprep.subr.bf16.mxu0 %v9324_v22  ;;  %v9420_v21 = vld [vmem:[#allocation15 + $0x104] ss:$16 sps:$4 sm:$0xff]  }
 0x4ca   :  { %8437 = vmatprep.subr.bf16.mxu1 %v10142_v0  ;;  %v9373_v22 = vld [vmem:[#allocation12 + $0x8d0] ss:$28 sps:$4 sm:$0xff]  }
 0x4cc   :  { %4893 = vmatpush1.bf16.msra.mxu0 %v9322_v24  ;;  %v9381_v24 = vld [vmem:[#allocation12 + $0x90c] ss:$28 sps:$4 sm:$0xff]  }
 0x4cd   :  { %8438 = vmatpush3.bf16.msra.mxu1 %v9325_v41  ;;  %4894 = vmatprep.subr.bf16.mxu0 %v9328_v53  ;;  %v9418_v41 = vld [vmem:[#allocation15 + $0x100] ss:$16 sps:$4 sm:$0xff]   ;;  %v9426_v53 = vld [vmem:[#allocation15 + $0x124] ss:$16 sps:$4 sm:$0xff]  }
 0x4ce   :  { %8439 = vmatprep.subr.bf16.mxu1 %v10142_v0 }
 0x4d0   :  { %4895 = vmatpush1.bf16.msra.mxu0 %v9326_v26  ;;  %v9379_v26 = vld [vmem:[#allocation12 + $0x908] ss:$28 sps:$4 sm:$0xff]  }
 0x4d1   :  { %8440 = vmatpush3.bf16.msra.mxu1 %v9329_v27  ;;  %4896 = vmatprep.subr.bf16.mxu0 %v9332_v2  ;;  %v9387_v27 = vld [vmem:[#allocation12 + $0x944] ss:$28 sps:$4 sm:$0xff]   ;;  %v9424_v2 = vld [vmem:[#allocation15 + $0x120] ss:$16 sps:$4 sm:$0xff]  }
 0x4d2   :  { %8441 = vmatprep.subr.bf16.mxu1 %v10142_v0 }
 0x4d4   :  { %4897 = vmatpush1.bf16.msra.mxu0 %v9330_v30  ;;  %v9432_v30 = vld [vmem:[#allocation15 + $0x144] ss:$16 sps:$4 sm:$0xff]  }
 0x4d5   :  { %8442 = vmatpush3.bf16.msra.mxu1 %v9333_v31  ;;  %4898 = vmatprep.subr.bf16.mxu0 %v9336_v33  ;;  %v9385_v31 = vld [vmem:[#allocation12 + $0x940] ss:$28 sps:$4 sm:$0xff]  }
 0x4d6   :  { %8443 = vmatprep.subr.bf16.mxu1 %v10142_v0  ;;  %v9393_v33 = vld [vmem:[#allocation12 + $0x97c] ss:$28 sps:$4 sm:$0xff]  }
 0x4d8   :  { %4899 = vmatpush1.bf16.msra.mxu0 %v9334_v36  ;;  %v9430_v36 = vld [vmem:[#allocation15 + $0x140] ss:$16 sps:$4 sm:$0xff]  }
 0x4d9   :  { %8444 = vmatpush3.bf16.msra.mxu1 %v9337_v35  ;;  %4900 = vmatprep.subr.bf16.mxu0 %v9340_v37  ;;  %v9438_v35 = vld [vmem:[#allocation15 + $0x164] ss:$16 sps:$4 sm:$0xff]   ;;  %v9391_v37 = vld [vmem:[#allocation12 + $0x978] ss:$28 sps:$4 sm:$0xff]  }
 0x4da   :  { %8445 = vmatprep.subr.bf16.mxu1 %v10142_v0 }
 0x4dc   :  { %4901 = vmatpush1.bf16.msra.mxu0 %v9338_v25  ;;  %v9399_v25 = vld [vmem:[#allocation12 + $0x9b4] ss:$28 sps:$4 sm:$0xff]  }
 0x4dd   :  { %8446 = vmatpush3.bf16.msra.mxu1 %v9341_v39  ;;  %4902 = vmatprep.subr.bf16.mxu0 %v9344_v40  ;;  %v9436_v39 = vld [vmem:[#allocation15 + $0x160] ss:$16 sps:$4 sm:$0xff]   ;;  %v9444_v40 = vld [vmem:[#allocation15 + $0x184] ss:$16 sps:$4 sm:$0xff]  }
 0x4de   :  { %8447 = vmatprep.subr.bf16.mxu1 %v10142_v0 }
 0x4e0   :  { %4903 = vmatpush1.bf16.msra.mxu0 %v9342_v42  ;;  %v9397_v42 = vld [vmem:[#allocation12 + $0x9b0] ss:$28 sps:$4 sm:$0xff]  }
 0x4e1   :  { %8448 = vmatpush3.bf16.msra.mxu1 %v9345_v45  ;;  %4913 = vmatprep.subr.bf16.mxu0 %v9348_v47  ;;  %v9405_v45 = vld [vmem:[#allocation12 + $0x9ec] ss:$28 sps:$4 sm:$0xff]  }
 0x4e2   :  { %6549 = vmatprep.subr.bf16.mxu1 %v9372_v48  ;;  %v9442_v47 = vld [vmem:[#allocation15 + $0x180] ss:$16 sps:$4 sm:$0xff]   ;;  %v9450_v48 = vld [vmem:[#allocation15 + $0x1a4] ss:$16 sps:$4 sm:$0xff]  }
 0x4e3   :  { %4905 = vmatmul.mubr.bf16.vlgmr.msra.gmra.mrb[24].mxu0 %v10507_v62  ;;  %v9390_v62 = vld [vmem:[#allocation15 + $0x64] ss:$16 sps:$4 sm:$0xff]  }
 0x4e4   :  { %8450 = vmatmul.mubr.bf16.vlgmr.msra.gmra.mrb[28].mxu1 %v10535_v20  ;;  %4914 = vmatpush1.bf16.msra.mxu0 %v9346_v49  ;;  %v9403_v49 = vld [vmem:[#allocation12 + $0x9e8] ss:$28 sps:$4 sm:$0xff]  }
 0x4e5   :  { %4945 = vmatprep.mubr.bf16.mxu0 %v10517_v52  ;;  %4915 = vmatprep.subr.bf16.mxu0 %v9351_v50  ;;  %v9388_v52 = vld [vmem:[#allocation15 + $0x60] ss:$16 sps:$4 sm:$0xff]   ;;  %v9411_v50 = vld [vmem:[#allocation12 + $0xa24] ss:$28 sps:$4 sm:$0xff]  }
 0x4e6   :  { %6550 = vmatpush1.bf16.msra.mxu1 %v9370_v51  ;;  %v9448_v51 = vld [vmem:[#allocation15 + $0x1a0] ss:$16 sps:$4 sm:$0xff]  }
 0x4e7   :  { %6551 = vmatprep.subr.bf16.mxu1 %v9378_v28  ;;  %v9456_v28 = vld [vmem:[#allocation15 + $0x1c4] ss:$16 sps:$4 sm:$0xff]  }
 0x4e8   :  { %4916 = vmatpush1.bf16.msra.mxu0 %v9349_v54  ;;  %v9409_v54 = vld [vmem:[#allocation12 + $0xa20] ss:$28 sps:$4 sm:$0xff]  }
 0x4e9   :  { %4917 = vmatprep.subr.bf16.mxu0 %v9354_v3  ;;  %v9417_v3 = vld [vmem:[#allocation12 + $0xa5c] ss:$28 sps:$4 sm:$0xff]  }
 0x4ea   :  { %6552 = vmatpush1.bf16.msra.mxu1 %v9376_v9  ;;  %v9454_v9 = vld [vmem:[#allocation15 + $0x1c0] ss:$16 sps:$4 sm:$0xff]  }
 0x4eb   :  { %6553 = vmatprep.subr.bf16.mxu1 %v9384_v32  ;;  %v9462_v32 = vld [vmem:[#allocation15 + $0x1e4] ss:$16 sps:$4 sm:$0xff]  }
 0x4ec   :  { %4918 = vmatpush1.bf16.msra.mxu0 %v9352_v55  ;;  %v9415_v55 = vld [vmem:[#allocation12 + $0xa58] ss:$28 sps:$4 sm:$0xff]  }
 0x4ed   :  { %4919 = vmatprep.subr.bf16.mxu0 %v9357_v56  ;;  %v9423_v56 = vld [vmem:[#allocation12 + $0xa94] ss:$28 sps:$4 sm:$0xff]  }
 0x4ee   :  { %6554 = vmatpush1.bf16.msra.mxu1 %v9382_v57  ;;  %v9460_v57 = vld [vmem:[#allocation15 + $0x1e0] ss:$16 sps:$4 sm:$0xff]  }
 0x4ef   :  { %6555 = vmatprep.subr.bf16.mxu1 %v9390_v62  ;;  %v9468_v62 = vld [vmem:[#allocation15 + $0x204] ss:$16 sps:$4 sm:$0xff]  }
 0x4f0   :  { %4920 = vmatpush1.bf16.msra.mxu0 %v9355_v58  ;;  %v9421_v58 = vld [vmem:[#allocation12 + $0xa90] ss:$28 sps:$4 sm:$0xff]  }
 0x4f1   :  { %4921 = vmatprep.subr.bf16.mxu0 %v9360_v59  ;;  %v9429_v59 = vld [vmem:[#allocation12 + $0xacc] ss:$28 sps:$4 sm:$0xff]  }
 0x4f2   :  { %6556 = vmatpush1.bf16.msra.mxu1 %v9388_v52  ;;  %v9427_v52 = vld [vmem:[#allocation12 + $0xac8] ss:$28 sps:$4 sm:$0xff]  }
 0x4f3   :  { %6557 = vmatprep.subr.bf16.mxu1 %v9396_v60  ;;  %v9435_v60 = vld [vmem:[#allocation12 + $0xb04] ss:$28 sps:$4 sm:$0xff]  }
 0x4f4   :  { %4922 = vmatpush1.bf16.msra.mxu0 %v9358_v61  ;;  %v9433_v61 = vld [vmem:[#allocation12 + $0xb00] ss:$28 sps:$4 sm:$0xff]  }
 0x4f5   :  { %4923 = vmatprep.subr.bf16.mxu0 %v9363_v63  ;;  %v9441_v63 = vld [vmem:[#allocation12 + $0xb3c] ss:$28 sps:$4 sm:$0xff]  }
 0x4f6   :  { %6558 = vmatpush1.bf16.msra.mxu1 %v9394_v1  ;;  %v9439_v1 = vld [vmem:[#allocation12 + $0xb38] ss:$28 sps:$4 sm:$0xff]  }
 0x4f7   :  { %6559 = vmatprep.subr.bf16.mxu1 %v9402_v5  ;;  %v9447_v5 = vld [vmem:[#allocation12 + $0xb74] ss:$28 sps:$4 sm:$0xff]  }
 0x4f8   :  { %4924 = vmatpush1.bf16.msra.mxu0 %v9361_v6  ;;  %v9445_v6 = vld [vmem:[#allocation12 + $0xb70] ss:$28 sps:$4 sm:$0xff]  }
 0x4f9   :  { %4925 = vmatprep.subr.bf16.mxu0 %v9366_v7  ;;  %v10563_v7 = vld [vmem:[#allocation13] sm:$0xff] }
 0x4fa   :  { %6560 = vmatpush1.bf16.msra.mxu1 %v9400_v8  ;;  %v2455_v8 = vrot.slane %v10563_v7, %v10420_v44 }
 0x4fb   :  { %6561 = vmatprep.subr.bf16.mxu1 %v9408_v11  ;;  %v2459_v11 = vrot.slane %v10563_v7, %v10425_v46 }
 0x4fc   :  { %4926 = vmatpush1.bf16.msra.mxu0 %v9364_v12  ;;  %v2467_v12 = vrot.slane %v10563_v7, %v10473_v4 }
 0x4fd   :  { %4927 = vmatprep.subr.bf16.mxu0 %v9369_v13  ;;  %v9451_v13 = vld [vmem:[#allocation12 + $0xba8] ss:$28 sps:$4 sm:$0xff]  }
 0x4fe   :  { %6562 = vmatpush1.bf16.msra.mxu1 %v9406_v14  ;;  %v9459_v14 = vld [vmem:[#allocation12 + $0xbe4] ss:$28 sps:$4 sm:$0xff]  }
 0x4ff   :  { %6563 = vmatprep.subr.bf16.mxu1 %v9414_v15 }
 0x500   :  { %4928 = vmatpush1.bf16.msra.mxu0 %v9367_v16 }
 0x501   :  { %4929 = vmatprep.subr.bf16.mxu0 %v9375_v17 }
 0x502   :  { %6564 = vmatpush1.bf16.msra.mxu1 %v9412_v19 }
 0x503   :  { %6565 = vmatprep.subr.bf16.mxu1 %v9420_v21 }
 0x504   :  { %4930 = vmatpush1.bf16.msra.mxu0 %v9373_v22 }
 0x505   :  { %4931 = vmatprep.subr.bf16.mxu0 %v9381_v24 }
 0x506   :  { %6566 = vmatpush1.bf16.msra.mxu1 %v9418_v41 }
 0x507   :  { %6567 = vmatprep.subr.bf16.mxu1 %v9426_v53 }
 0x508   :  { %4932 = vmatpush1.bf16.msra.mxu0 %v9379_v26  ;;  %v9457_v26 = vld [vmem:[#allocation12 + $0xbe0] ss:$28 sps:$4 sm:$0xff]  }
 0x509   :  { %4933 = vmatprep.subr.bf16.mxu0 %v9387_v27 }
 0x50a   :  { %6568 = vmatpush1.bf16.msra.mxu1 %v9424_v2  ;;  %v9465_v2 = vld [vmem:[#allocation12 + $0xc1c] ss:$28 sps:$4 sm:$0xff]  }
 0x50b   :  { %6569 = vmatprep.subr.bf16.mxu1 %v9432_v30 }
 0x50c   :  { %4934 = vmatpush1.bf16.msra.mxu0 %v9385_v31 }
 0x50d   :  { %4935 = vmatprep.subr.bf16.mxu0 %v9393_v33 }
 0x50e   :  { %6570 = vmatpush1.bf16.msra.mxu1 %v9430_v36 }
 0x50f   :  { %6571 = vmatprep.subr.bf16.mxu1 %v9438_v35 }
 0x510   :  { %4936 = vmatpush1.bf16.msra.mxu0 %v9391_v37  ;;  %v9463_v37 = vld [vmem:[#allocation12 + $0xc18] ss:$28 sps:$4 sm:$0xff]  }
 0x511   :  { %4937 = vmatprep.subr.bf16.mxu0 %v9399_v25 }
 0x512   :  { %6572 = vmatpush1.bf16.msra.mxu1 %v9436_v39 }
 0x513   :  { %6573 = vmatprep.subr.bf16.mxu1 %v9444_v40 }
 0x514   :  { %4938 = vmatpush1.bf16.msra.mxu0 %v9397_v42  ;;  %v9466_v42 = vld [vmem:[#allocation15 + $0x200] ss:$16 sps:$4 sm:$0xff]  }
 0x515   :  { %4939 = vmatprep.subr.bf16.mxu0 %v9405_v45 }
 0x516   :  { %6574 = vmatpush1.bf16.msra.mxu1 %v9442_v47  ;;  %v9471_v47 = vld [vmem:[#allocation15 + $0x224] ss:$16 sps:$4 sm:$0xff]  }
 0x517   :  { %6575 = vmatprep.subr.bf16.mxu1 %v9450_v48  ;;  %v9474_v48 = vld [vmem:[#allocation15 + $0xc] ss:$16 sps:$4 sm:$0xff]  }
 0x518   :  { %4940 = vmatpush1.bf16.msra.mxu0 %v9403_v49 }
 0x519   :  { %4941 = vmatprep.subr.bf16.mxu0 %v9411_v50  ;;  %v9472_v50 = vld [vmem:[#allocation15 + $0x8] ss:$16 sps:$4 sm:$0xff]  }
 0x51a   :  { %6576 = vmatpush1.bf16.msra.mxu1 %v9448_v51  ;;  %v9469_v51 = vld [vmem:[#allocation15 + $0x220] ss:$16 sps:$4 sm:$0xff]  }
 0x51b   :  { %6577 = vmatprep.subr.bf16.mxu1 %v9456_v28  ;;  %v9480_v28 = vld [vmem:[#allocation15 + $0x2c] ss:$16 sps:$4 sm:$0xff]  }
 0x51c   :  { %4942 = vmatpush1.bf16.msra.mxu0 %v9409_v54  ;;  %v9477_v54 = vld [vmem:[#allocation15 + $0x244] ss:$16 sps:$4 sm:$0xff]  }
 0x51d   :  { %4943 = vmatprep.subr.bf16.mxu0 %v9417_v3  ;;  %v9478_v3 = vld [vmem:[#allocation15 + $0x28] ss:$16 sps:$4 sm:$0xff]  }
 0x51e   :  { %6578 = vmatpush1.bf16.msra.mxu1 %v9454_v9  ;;  %v9475_v9 = vld [vmem:[#allocation15 + $0x240] ss:$16 sps:$4 sm:$0xff]  }
 0x51f   :  { %6579 = vmatprep.subr.bf16.mxu1 %v9462_v32  ;;  %v9486_v32 = vld [vmem:[#allocation15 + $0x4c] ss:$16 sps:$4 sm:$0xff]  }
 0x520   :  { %4944 = vmatpush1.bf16.msra.mxu0 %v9415_v55  ;;  %v9483_v55 = vld [vmem:[#allocation15 + $0x264] ss:$16 sps:$4 sm:$0xff]  }
 0x521   :  { %4954 = vmatprep.subr.bf16.mxu0 %v9423_v56  ;;  %v9484_v56 = vld [vmem:[#allocation15 + $0x48] ss:$16 sps:$4 sm:$0xff]  }
 0x522   :  { %6580 = vmatpush1.bf16.msra.mxu1 %v9460_v57  ;;  %v9481_v57 = vld [vmem:[#allocation15 + $0x260] ss:$16 sps:$4 sm:$0xff]  }
 0x523   :  { %4946 = vmatmul.mubr.bf16.vlgmr.msra.gmra.mrb[24].mxu0 %v10526_v38  ;;  %6590 = vmatprep.subr.bf16.mxu1 %v9468_v62  ;;  %v9453_v38 = vld [vmem:[#allocation12 + $0xbac] ss:$28 sps:$4 sm:$0xff]   ;;  %v9492_v62 = vld [vmem:[#allocation15 + $0x6c] ss:$16 sps:$4 sm:$0xff]  }
 0x524   :  { %4955 = vmatpush1.bf16.msra.mxu0 %v9421_v58  ;;  %4986 = vmatprep.mubr.bf16.mxu0 %v10144_v29  ;;  %v9489_v58 = vld [vmem:[#allocation15 + $0x284] ss:$16 sps:$4 sm:$0xff]  }
 0x525   :  { %4956 = vmatprep.subr.bf16.mxu0 %v9429_v59  ;;  %v9490_v59 = vld [vmem:[#allocation15 + $0x68] ss:$16 sps:$4 sm:$0xff]  }
 0x528   :  { %4957 = vmatpush1.bf16.msra.mxu0 %v9427_v52  ;;  %v9498_v52 = vld [vmem:[#allocation15 + $0x8c] ss:$16 sps:$4 sm:$0xff]  }
 0x529   :  { %4958 = vmatprep.subr.bf16.mxu0 %v9435_v60  ;;  %v9495_v60 = vld [vmem:[#allocation15 + $0x2a4] ss:$16 sps:$4 sm:$0xff]  }
 0x52c   :  { %4959 = vmatpush1.bf16.msra.mxu0 %v9433_v61  ;;  %v9496_v61 = vld [vmem:[#allocation15 + $0x88] ss:$16 sps:$4 sm:$0xff]  }
 0x52d   :  { %4960 = vmatprep.subr.bf16.mxu0 %v9441_v63  ;;  %v9493_v63 = vld [vmem:[#allocation15 + $0x2a0] ss:$16 sps:$4 sm:$0xff]  }
 0x530   :  { %4961 = vmatpush1.bf16.msra.mxu0 %v9439_v1  ;;  %v9504_v1 = vld [vmem:[#allocation15 + $0xac] ss:$16 sps:$4 sm:$0xff]  }
 0x531   :  { %4962 = vmatprep.subr.bf16.mxu0 %v9447_v5  ;;  %v9501_v5 = vld [vmem:[#allocation15 + $0x2c4] ss:$16 sps:$4 sm:$0xff]  }
 0x534   :  { %4963 = vmatpush1.bf16.msra.mxu0 %v9445_v6  ;;  %v9502_v6 = vld [vmem:[#allocation15 + $0xa8] ss:$16 sps:$4 sm:$0xff]  }
 0x535   :  { %4964 = vmatprep.subr.bf16.mxu0 %v9453_v38  ;;  %v9499_v38 = vld [vmem:[#allocation15 + $0x2c0] ss:$16 sps:$4 sm:$0xff]  }
 0x536   :  { %v4660_v15 = vpop.f32.mrb[20].mxu0  ;;  %v10571_v16 = vpop.f32.mrb[12].mxu1 }
 0x537   :  { %v8479_v17 = vadd.f32 %v4660_v15, %v2455_v8  ;;  %v4662_v19 = vpop.f32.mrb[21].mxu0  ;;  %v4826_v21 = vpop.f32.mrb[13].mxu1  ;;  %v9510_v8 = vld [vmem:[#allocation15 + $0xcc] ss:$16 sps:$4 sm:$0xff]  }
 0x538   :  { %v8480_v22 = vadd.f32 %v4662_v19, %v2459_v11  ;;  %v8482_v24 = vadd.f32 %v4826_v21, %v2467_v12  ;;  %v4664_v41 = vpop.f32.mrb[22].mxu0  ;;  %v4828_v53 = vpop.f32.mrb[14].mxu1  ;;  %4965 = vmatpush1.bf16.msra.mxu0 %v9451_v13  ;;  %v9507_v11 = vld [vmem:[#allocation15 + $0x2e4] ss:$16 sps:$4 sm:$0xff]   ;;  %v9505_v19 = vld [vmem:[#allocation15 + $0x2e0] ss:$16 sps:$4 sm:$0xff]  }
 0x539   :  { %vm5155_vm13 = vcmp.gt.f32.partialorder %v8479_v17, 0.0  ;;  %v5162_v27 = vmul.f32 0.01, %v8479_v17  ;;  %4966 = vmatprep.subr.bf16.mxu0 %v9459_v14  ;;  %v4665_v36 = vpop.f32.mrb[23].mxu0  ;;  %v4829_v35 = vpop.f32.mrb[15].mxu1 }
 0x53a   :  { %vm5156_vm14 = vcmp.gt.f32.partialorder %v8480_v22, 0.0  ;;  %v5163_v30 = vmul.f32 0.01, %v8480_v22  ;;  %vm5158_vm15 = vcmp.gt.f32.partialorder %v8482_v24, 0.0  ;;  %v5165_v31 = vmul.f32 0.01, %v8482_v24 }
 0x53b   :  { %v5169_v33 = vsel %vm5155_vm13, %v8479_v17, %v5162_v27  ;;  %v9508_v14 = vld [vmem:[#allocation15 + $0xc8] ss:$16 sps:$4 sm:$0xff]   ;;  %v9516_v21 = vld [vmem:[#allocation15 + $0xec] ss:$16 sps:$4 sm:$0xff]   ;;  %v9511_v53 = vld [vmem:[#allocation15 + $0x300] ss:$16 sps:$4 sm:$0xff]  }
 0x53c   :  { %4967 = vmatpush1.bf16.msra.mxu0 %v9457_v26  ;;  %v5170_v25 = vsel %vm5156_vm14, %v8480_v22, %v5163_v30  ;;  %v5172_v39 = vsel %vm5158_vm15, %v8482_v24, %v5165_v31  ;;  %v10573_v45 = vpack.c.bf16 %v5169_v33, %v5169_v33  ;;  %v9513_v24 = vld [vmem:[#allocation15 + $0x304] ss:$16 sps:$4 sm:$0xff]   ;;  %v9514_v41 = vld [vmem:[#allocation15 + $0xe8] ss:$16 sps:$4 sm:$0xff]   ;;  %v9522_v26 = vld [vmem:[#allocation15 + $0x10c] ss:$16 sps:$4 sm:$0xff]  }
 0x53d   :  { %4968 = vmatprep.subr.bf16.mxu0 %v9465_v2  ;;  %v5402_v40 = vpack.c.bf16 %v5170_v25, %v5170_v25  ;;  %v10575_v49 = vpack.c.bf16 %v5172_v39, %v5172_v39  ;;  %v9519_v27 = vld [vmem:[#allocation15 + $0x324] ss:$16 sps:$4 sm:$0xff]   ;;  %v9520_v2 = vld [vmem:[#allocation15 + $0x108] ss:$16 sps:$4 sm:$0xff]   ;;  %v9517_v30 = vld [vmem:[#allocation15 + $0x320] ss:$16 sps:$4 sm:$0xff]  }
 0x53e   :  { %v9528_v31 = vld [vmem:[#allocation15 + $0x12c] ss:$16 sps:$4 sm:$0xff]   ;;  %v9525_v33 = vld [vmem:[#allocation15 + $0x344] ss:$16 sps:$4 sm:$0xff]   ;;  %v9526_v36 = vld [vmem:[#allocation15 + $0x128] ss:$16 sps:$4 sm:$0xff]  }
 0x53f   :  { %6581 = vmatprep.mubr.bf16.mxu1 %v5402_v40  ;;  %v9523_v35 = vld [vmem:[#allocation15 + $0x340] ss:$16 sps:$4 sm:$0xff]   ;;  %v9531_v25 = vld [vmem:[#allocation15 + $0x364] ss:$16 sps:$4 sm:$0xff]   ;;  %v9532_v39 = vld [vmem:[#allocation15 + $0x148] ss:$16 sps:$4 sm:$0xff]  }
 0x540   :  { %4969 = vmatpush1.bf16.msra.mxu0 %v9463_v37  ;;  %6582 = vmatmul.mubr.bf16.vlgmr.msra.gmra.mrb[32].mxu1 %v10573_v45  ;;  %v9534_v37 = vld [vmem:[#allocation15 + $0x14c] ss:$16 sps:$4 sm:$0xff]  }
 0x541   :  { %6591 = vmatpush1.bf16.msra.mxu1 %v9466_v42  ;;  %6622 = vmatprep.mubr.bf16.mxu1 %v10575_v49  ;;  %v9540_v42 = vld [vmem:[#allocation15 + $0x16c] ss:$16 sps:$4 sm:$0xff]  }
 0x542   :  { %6592 = vmatprep.subr.bf16.mxu1 %v9471_v47  ;;  %6713 = vmatprep.subr.bf16.mxu0 %v9474_v48  ;;  %v9537_v47 = vld [vmem:[#allocation15 + $0x384] ss:$16 sps:$4 sm:$0xff]   ;;  %v9538_v48 = vld [vmem:[#allocation15 + $0x168] ss:$16 sps:$4 sm:$0xff]  }
 0x543   :  { %4987 = vmatmul.mubr.bf16.vlgmr.msra.gmra.mrb[24].mxu0 %v10535_v20  ;;  %v9487_v20 = vld [vmem:[#allocation15 + $0x280] ss:$16 sps:$4 sm:$0xff]  }
 0x544   :  { %6714 = vmatpush1.bf16.msra.mxu0 %v9472_v50  ;;  %6745 = vmatprep.mubr.bf16.mxu0 %v5402_v40  ;;  %v9529_v40 = vld [vmem:[#allocation15 + $0x360] ss:$16 sps:$4 sm:$0xff]  }
 0x545   :  { %6593 = vmatpush1.bf16.msra.mxu1 %v9469_v51  ;;  %6715 = vmatprep.subr.bf16.mxu0 %v9480_v28  ;;  %v9535_v50 = vld [vmem:[#allocation15 + $0x380] ss:$16 sps:$4 sm:$0xff]   ;;  %v9546_v51 = vld [vmem:[#allocation15 + $0x18c] ss:$16 sps:$4 sm:$0xff]   ;;  %v9543_v28 = vld [vmem:[#allocation15 + $0x3a4] ss:$16 sps:$4 sm:$0xff]  }
 0x546   :  { %6594 = vmatprep.subr.bf16.mxu1 %v9477_v54  ;;  %v2463_v54 = vrot.slane %v10563_v7, %v10444_v18 }
 0x548   :  { %6716 = vmatpush1.bf16.msra.mxu0 %v9478_v3  ;;  %v9544_v3 = vld [vmem:[#allocation15 + $0x188] ss:$16 sps:$4 sm:$0xff]  }
 0x549   :  { %6595 = vmatpush1.bf16.msra.mxu1 %v9475_v9  ;;  %6717 = vmatprep.subr.bf16.mxu0 %v9486_v32  ;;  %v9541_v9 = vld [vmem:[#allocation15 + $0x3a0] ss:$16 sps:$4 sm:$0xff]   ;;  %v9552_v32 = vld [vmem:[#allocation15 + $0x1ac] ss:$16 sps:$4 sm:$0xff]  }
 0x54a   :  { %6596 = vmatprep.subr.bf16.mxu1 %v9483_v55  ;;  %v9549_v55 = vld [vmem:[#allocation15 + $0x3c4] ss:$16 sps:$4 sm:$0xff]  }
 0x54c   :  { %6718 = vmatpush1.bf16.msra.mxu0 %v9484_v56  ;;  %v8481_v56 = vadd.f32 %v10571_v16, %v2463_v54 }
 0x54d   :  { %6597 = vmatpush1.bf16.msra.mxu1 %v9481_v57  ;;  %6719 = vmatprep.subr.bf16.mxu0 %v9492_v62  ;;  %v9550_v57 = vld [vmem:[#allocation15 + $0x1a8] ss:$16 sps:$4 sm:$0xff]   ;;  %v2479_v62 = vrot.slane %v10563_v7, %v775_v34  ;;  %v9561_v34 = vld [vmem:[#allocation15 + $0x1ec] ss:$16 sps:$4 sm:$0xff]  }
 0x54e   :  { %6598 = vmatprep.subr.bf16.mxu1 %v9489_v58  ;;  %v9547_v58 = vld [vmem:[#allocation15 + $0x3c0] ss:$16 sps:$4 sm:$0xff]   ;;  %vm5157_vm1 = vcmp.gt.f32.partialorder %v8481_v56, 0.0 }
 0x550   :  { %6720 = vmatpush1.bf16.msra.mxu0 %v9490_v59  ;;  %v9558_v59 = vld [vmem:[#allocation15 + $0x1cc] ss:$16 sps:$4 sm:$0xff]  }
 0x551   :  { %6599 = vmatpush1.bf16.msra.mxu1 %v9487_v20  ;;  %6721 = vmatprep.subr.bf16.mxu0 %v9498_v52  ;;  %v9555_v20 = vld [vmem:[#allocation15 + $0x3e4] ss:$16 sps:$4 sm:$0xff]   ;;  %v5164_v52 = vmul.f32 0.01, %v8481_v56 }
 0x552   :  { %6600 = vmatprep.subr.bf16.mxu1 %v9495_v60 }
 0x554   :  { %6722 = vmatpush1.bf16.msra.mxu0 %v9496_v61 }
 0x555   :  { %6601 = vmatpush1.bf16.msra.mxu1 %v9493_v63  ;;  %6723 = vmatprep.subr.bf16.mxu0 %v9504_v1  ;;  %v9556_v63 = vld [vmem:[#allocation15 + $0x1c8] ss:$16 sps:$4 sm:$0xff]  }
 0x556   :  { %6602 = vmatprep.subr.bf16.mxu1 %v9501_v5 }
 0x557   :  { %v8275_v12 = vpop.f32.mrb[16].mxu1 }
 0x558   :  { %v8276_v13 = vpop.f32.mrb[17].mxu1  ;;  %6724 = vmatpush1.bf16.msra.mxu0 %v9502_v6  ;;  %v9553_v6 = vld [vmem:[#allocation15 + $0x3e0] ss:$16 sps:$4 sm:$0xff]  }
 0x559   :  { %v10580_v15 = vadd.f32 %v8276_v13, %v8275_v12  ;;  %v8278_v17 = vpop.f32.mrb[18].mxu1  ;;  %6603 = vmatpush1.bf16.msra.mxu1 %v9499_v38  ;;  %6725 = vmatprep.subr.bf16.mxu0 %v9510_v8  ;;  %v9612_v8 = vld [vmem:[#allocation15 + $0x404] ss:$16 sps:$4 sm:$0xff]   ;;  %v9559_v13 = vld [vmem:[#allocation15 + $0x1e8] ss:$16 sps:$4 sm:$0xff]  }
 0x55a   :  { %v8279_v22 = vpop.f32.mrb[19].mxu1  ;;  %6604 = vmatprep.subr.bf16.mxu1 %v9507_v11  ;;  %v5171_v11 = vsel %vm5157_vm1, %v8481_v56, %v5164_v52  ;;  %v9610_v17 = vld [vmem:[#allocation15 + $0x400] ss:$16 sps:$4 sm:$0xff]  }
 0x55b   :  { %v5030_v16 = vadd.f32 %v10580_v15, %v2479_v62  ;;  %v9618_v15 = vld [vmem:[#allocation15 + $0x424] ss:$16 sps:$4 sm:$0xff]   ;;  %v9567_v22 = vld [vmem:[#allocation15 + $0x22c] ss:$16 sps:$4 sm:$0xff]   ;;  %v9652_v56 = vld [vmem:[#allocation15 + $0x4e0] ss:$16 sps:$4 sm:$0xff]  }
 0x55c   :  { %6726 = vmatpush1.bf16.msra.mxu0 %v9508_v14  ;;  %v9564_v14 = vld [vmem:[#allocation15 + $0x20c] ss:$16 sps:$4 sm:$0xff]   ;;  %v9660_v62 = vld [vmem:[#allocation15 + $0x504] ss:$16 sps:$4 sm:$0xff]   ;;  %v9658_v52 = vld [vmem:[#allocation15 + $0x500] ss:$16 sps:$4 sm:$0xff]  }
 0x55d   :  { %6605 = vmatpush1.bf16.msra.mxu1 %v9505_v19  ;;  %6727 = vmatprep.subr.bf16.mxu0 %v9516_v21  ;;  %v10591_v19 = vpack.c.bf16 %v5171_v11, %v5171_v11  ;;  %v9562_v21 = vld [vmem:[#allocation15 + $0x208] ss:$16 sps:$4 sm:$0xff]   ;;  %v9597_v11 = vld [vmem:[#allocation15 + $0x36c] ss:$16 sps:$4 sm:$0xff]  }
 0x55e   :  { %6606 = vmatprep.subr.bf16.mxu1 %v9513_v24  ;;  %v9616_v24 = vld [vmem:[#allocation15 + $0x420] ss:$16 sps:$4 sm:$0xff]  }
 0x560   :  { %6728 = vmatpush1.bf16.msra.mxu0 %v9514_v41  ;;  %v9624_v41 = vld [vmem:[#allocation15 + $0x444] ss:$16 sps:$4 sm:$0xff]  }
 0x561   :  { %6607 = vmatpush1.bf16.msra.mxu1 %v9511_v53  ;;  %6729 = vmatprep.subr.bf16.mxu0 %v9522_v26  ;;  %v9565_v53 = vld [vmem:[#allocation15 + $0x228] ss:$16 sps:$4 sm:$0xff]   ;;  %v9570_v26 = vld [vmem:[#allocation15 + $0x24c] ss:$16 sps:$4 sm:$0xff]  }
 0x562   :  { %6608 = vmatprep.subr.bf16.mxu1 %v9519_v27  ;;  %v9622_v27 = vld [vmem:[#allocation15 + $0x440] ss:$16 sps:$4 sm:$0xff]  }
 0x564   :  { %6730 = vmatpush1.bf16.msra.mxu0 %v9520_v2  ;;  %v9630_v2 = vld [vmem:[#allocation15 + $0x464] ss:$16 sps:$4 sm:$0xff]  }
 0x565   :  { %6609 = vmatpush1.bf16.msra.mxu1 %v9517_v30  ;;  %6731 = vmatprep.subr.bf16.mxu0 %v9528_v31  ;;  %v9568_v30 = vld [vmem:[#allocation15 + $0x248] ss:$16 sps:$4 sm:$0xff]   ;;  %v9573_v31 = vld [vmem:[#allocation15 + $0x26c] ss:$16 sps:$4 sm:$0xff]  }
 0x566   :  { %6610 = vmatprep.subr.bf16.mxu1 %v9525_v33  ;;  %v9628_v33 = vld [vmem:[#allocation15 + $0x460] ss:$16 sps:$4 sm:$0xff]  }
 0x568   :  { %6732 = vmatpush1.bf16.msra.mxu0 %v9526_v36  ;;  %v9636_v36 = vld [vmem:[#allocation15 + $0x484] ss:$16 sps:$4 sm:$0xff]  }
 0x569   :  { %6611 = vmatpush1.bf16.msra.mxu1 %v9523_v35  ;;  %6733 = vmatprep.subr.bf16.mxu0 %v9534_v37  ;;  %v9576_v35 = vld [vmem:[#allocation15 + $0x28c] ss:$16 sps:$4 sm:$0xff]   ;;  %v9642_v37 = vld [vmem:[#allocation15 + $0x4a4] ss:$16 sps:$4 sm:$0xff]  }
 0x56a   :  { %6612 = vmatprep.subr.bf16.mxu1 %v9531_v25  ;;  %v9574_v25 = vld [vmem:[#allocation15 + $0x288] ss:$16 sps:$4 sm:$0xff]  }
 0x56c   :  { %6734 = vmatpush1.bf16.msra.mxu0 %v9532_v39  ;;  %v9579_v39 = vld [vmem:[#allocation15 + $0x2ac] ss:$16 sps:$4 sm:$0xff]  }
 0x56d   :  { %6613 = vmatpush1.bf16.msra.mxu1 %v9529_v40  ;;  %6735 = vmatprep.subr.bf16.mxu0 %v9540_v42  ;;  %v9640_v40 = vld [vmem:[#allocation15 + $0x4a0] ss:$16 sps:$4 sm:$0xff]   ;;  %v9648_v42 = vld [vmem:[#allocation15 + $0x4c4] ss:$16 sps:$4 sm:$0xff]  }
 0x56e   :  { %6614 = vmatprep.subr.bf16.mxu1 %v9537_v47  ;;  %v9577_v47 = vld [vmem:[#allocation15 + $0x2a8] ss:$16 sps:$4 sm:$0xff]  }
 0x570   :  { %6736 = vmatpush1.bf16.msra.mxu0 %v9538_v48  ;;  %v9582_v48 = vld [vmem:[#allocation15 + $0x2cc] ss:$16 sps:$4 sm:$0xff]  }
 0x571   :  { %6615 = vmatpush1.bf16.msra.mxu1 %v9535_v50  ;;  %6737 = vmatprep.subr.bf16.mxu0 %v9546_v51  ;;  %v9646_v50 = vld [vmem:[#allocation15 + $0x4c0] ss:$16 sps:$4 sm:$0xff]   ;;  %v9654_v51 = vld [vmem:[#allocation15 + $0x4e4] ss:$16 sps:$4 sm:$0xff]  }
 0x572   :  { %6616 = vmatprep.subr.bf16.mxu1 %v9543_v28 }
 0x574   :  { %6738 = vmatpush1.bf16.msra.mxu0 %v9544_v3  ;;  %v9580_v3 = vld [vmem:[#allocation15 + $0x2c8] ss:$16 sps:$4 sm:$0xff]  }
 0x575   :  { %6617 = vmatpush1.bf16.msra.mxu1 %v9541_v9  ;;  %6739 = vmatprep.subr.bf16.mxu0 %v9552_v32 }
 0x576   :  { %6618 = vmatprep.subr.bf16.mxu1 %v9549_v55  ;;  %v9585_v55 = vld [vmem:[#allocation15 + $0x2ec] ss:$16 sps:$4 sm:$0xff]  }
 0x577   :  { %v8297_v60 = vpop.f32.mrb[20].mxu1 }
 0x578   :  { %v8298_v61 = vpop.f32.mrb[21].mxu1  ;;  %6740 = vmatpush1.bf16.msra.mxu0 %v9550_v57 }
 0x579   :  { %v8299_v1 = vadd.f32 %v8298_v61, %v8297_v60  ;;  %v8300_v5 = vpop.f32.mrb[22].mxu1  ;;  %6619 = vmatpush1.bf16.msra.mxu1 %v9547_v58  ;;  %6741 = vmatprep.subr.bf16.mxu0 %v9558_v59  ;;  %v9583_v59 = vld [vmem:[#allocation15 + $0x2e8] ss:$16 sps:$4 sm:$0xff]   ;;  %v9666_v60 = vld [vmem:[#allocation15 + $0x524] ss:$16 sps:$4 sm:$0xff]  }
 0x57a   :  { %v8301_v38 = vpop.f32.mrb[23].mxu1  ;;  %6620 = vmatprep.subr.bf16.mxu1 %v9555_v20  ;;  %v9588_v20 = vld [vmem:[#allocation15 + $0x30c] ss:$16 sps:$4 sm:$0xff]   ;;  %v9586_v61 = vld [vmem:[#allocation15 + $0x308] ss:$16 sps:$4 sm:$0xff]  }
 0x57b   :  { %v10589_v12 = vadd.f32 %v8299_v1, %v5030_v16  ;;  %v9664_v16 = vld [vmem:[#allocation15 + $0x520] ss:$16 sps:$4 sm:$0xff]   ;;  %v9672_v1 = vld [vmem:[#allocation15 + $0x544] ss:$16 sps:$4 sm:$0xff]   ;;  %v9589_v5 = vld [vmem:[#allocation15 + $0x328] ss:$16 sps:$4 sm:$0xff]  }
 0x57c   :  { %6742 = vmatpush1.bf16.msra.mxu0 %v9556_v63  ;;  %v9591_v63 = vld [vmem:[#allocation15 + $0x32c] ss:$16 sps:$4 sm:$0xff]   ;;  %v9678_v38 = vld [vmem:[#allocation15 + $0x564] ss:$16 sps:$4 sm:$0xff]  }
 0x57d   :  { %6621 = vmatpush1.bf16.msra.mxu1 %v9553_v6  ;;  %6743 = vmatprep.subr.bf16.mxu0 %v9561_v34  ;;  %v9594_v6 = vld [vmem:[#allocation15 + $0x34c] ss:$16 sps:$4 sm:$0xff]   ;;  %v9670_v34 = vld [vmem:[#allocation15 + $0x540] ss:$16 sps:$4 sm:$0xff]  }
 0x57e   :  { %6631 = vmatprep.subr.bf16.mxu1 %v9612_v8  ;;  %v9592_v8 = vld [vmem:[#allocation15 + $0x348] ss:$16 sps:$4 sm:$0xff]  }
 0x580   :  { %6623 = vmatmul.mubr.bf16.vlgmr.msra.gmra.mrb[32].mxu1 %v10591_v19  ;;  %6744 = vmatpush1.bf16.msra.mxu0 %v9559_v13  ;;  %v9684_v13 = vld [vmem:[#allocation15 + $0x584] ss:$16 sps:$4 sm:$0xff]  }
 0x581   :  { %6754 = vmatprep.subr.bf16.mxu0 %v9564_v14  ;;  %6632 = vmatpush1.bf16.msra.mxu1 %v9610_v17  ;;  %v9595_v14 = vld [vmem:[#allocation15 + $0x368] ss:$16 sps:$4 sm:$0xff]   ;;  %v9600_v17 = vld [vmem:[#allocation15 + $0x38c] ss:$16 sps:$4 sm:$0xff]  }
 0x582   :  { %6633 = vmatprep.subr.bf16.mxu1 %v9618_v15  ;;  %v9682_v15 = vld [vmem:[#allocation15 + $0x580] ss:$16 sps:$4 sm:$0xff]  }
 0x583   :  { %6746 = vmatmul.mubr.bf16.vlgmr.msra.gmra.mrb[28].mxu0 %v10573_v45  ;;  %v9571_v45 = vld [vmem:[#allocation15 + $0x268] ss:$16 sps:$4 sm:$0xff]  }
 0x584   :  { %6755 = vmatpush1.bf16.msra.mxu0 %v9562_v21  ;;  %6786 = vmatprep.mubr.bf16.mxu0 %v10575_v49  ;;  %v9634_v49 = vld [vmem:[#allocation15 + $0x480] ss:$16 sps:$4 sm:$0xff]   ;;  %v9690_v21 = vld [vmem:[#allocation15 + $0x5a4] ss:$16 sps:$4 sm:$0xff]  }
 0x585   :  { %6756 = vmatprep.subr.bf16.mxu0 %v9567_v22  ;;  %6634 = vmatpush1.bf16.msra.mxu1 %v9616_v24  ;;  %v9598_v22 = vld [vmem:[#allocation15 + $0x388] ss:$16 sps:$4 sm:$0xff]   ;;  %v9603_v24 = vld [vmem:[#allocation15 + $0x3ac] ss:$16 sps:$4 sm:$0xff]  }
 0x586   :  { %6635 = vmatprep.subr.bf16.mxu1 %v9624_v41  ;;  %v9688_v41 = vld [vmem:[#allocation15 + $0x5a0] ss:$16 sps:$4 sm:$0xff]  }
 0x588   :  { %6757 = vmatpush1.bf16.msra.mxu0 %v9565_v53  ;;  %v9696_v53 = vld [vmem:[#allocation15 + $0x5c4] ss:$16 sps:$4 sm:$0xff]  }
 0x589   :  { %6758 = vmatprep.subr.bf16.mxu0 %v9570_v26  ;;  %6636 = vmatpush1.bf16.msra.mxu1 %v9622_v27  ;;  %v9601_v26 = vld [vmem:[#allocation15 + $0x3a8] ss:$16 sps:$4 sm:$0xff]   ;;  %v9606_v27 = vld [vmem:[#allocation15 + $0x3cc] ss:$16 sps:$4 sm:$0xff]  }
 0x58a   :  { %6637 = vmatprep.subr.bf16.mxu1 %v9630_v2  ;;  %v9694_v2 = vld [vmem:[#allocation15 + $0x5c0] ss:$16 sps:$4 sm:$0xff]  }
 0x58c   :  { %6759 = vmatpush1.bf16.msra.mxu0 %v9568_v30  ;;  %v9702_v30 = vld [vmem:[#allocation15 + $0x5e4] ss:$16 sps:$4 sm:$0xff]  }
 0x58d   :  { %6760 = vmatprep.subr.bf16.mxu0 %v9573_v31  ;;  %6638 = vmatpush1.bf16.msra.mxu1 %v9628_v33 }
 0x58e   :  { %6639 = vmatprep.subr.bf16.mxu1 %v9636_v36 }
 0x590   :  { %6761 = vmatpush1.bf16.msra.mxu0 %v9571_v45  ;;  %v9604_v45 = vld [vmem:[#allocation15 + $0x3c8] ss:$16 sps:$4 sm:$0xff]  }
 0x591   :  { %6762 = vmatprep.subr.bf16.mxu0 %v9576_v35  ;;  %6640 = vmatpush1.bf16.msra.mxu1 %v9634_v49  ;;  %v9609_v49 = vld [vmem:[#allocation15 + $0x3ec] ss:$16 sps:$4 sm:$0xff]  }
 0x592   :  { %6641 = vmatprep.subr.bf16.mxu1 %v9642_v37  ;;  %v9700_v37 = vld [vmem:[#allocation15 + $0x5e0] ss:$16 sps:$4 sm:$0xff]  }
 0x594   :  { %6763 = vmatpush1.bf16.msra.mxu0 %v9574_v25 }
 0x595   :  { %6764 = vmatprep.subr.bf16.mxu0 %v9579_v39  ;;  %6642 = vmatpush1.bf16.msra.mxu1 %v9640_v40  ;;  %v9708_v39 = vld [vmem:[#allocation15 + $0x604] ss:$16 sps:$4 sm:$0xff]   ;;  %v9607_v40 = vld [vmem:[#allocation15 + $0x3e8] ss:$16 sps:$4 sm:$0xff]  }
 0x596   :  { %6643 = vmatprep.subr.bf16.mxu1 %v9648_v42  ;;  %v9615_v42 = vld [vmem:[#allocation15 + $0x40c] ss:$16 sps:$4 sm:$0xff]  }
 0x597   :  { %v8319_v28 = vpop.f32.mrb[24].mxu1 }
 0x598   :  { %v8320_v54 = vpop.f32.mrb[25].mxu1  ;;  %6765 = vmatpush1.bf16.msra.mxu0 %v9577_v47  ;;  %v9613_v47 = vld [vmem:[#allocation15 + $0x408] ss:$16 sps:$4 sm:$0xff]  }
 0x599   :  { %v8321_v9 = vadd.f32 %v8320_v54, %v8319_v28  ;;  %v8322_v32 = vpop.f32.mrb[26].mxu1  ;;  %6766 = vmatprep.subr.bf16.mxu0 %v9582_v48  ;;  %6644 = vmatpush1.bf16.msra.mxu1 %v9646_v50  ;;  %v9621_v48 = vld [vmem:[#allocation15 + $0x42c] ss:$16 sps:$4 sm:$0xff]   ;;  %v9619_v50 = vld [vmem:[#allocation15 + $0x428] ss:$16 sps:$4 sm:$0xff]  }
 0x59a   :  { %v8323_v57 = vpop.f32.mrb[27].mxu1  ;;  %6645 = vmatprep.subr.bf16.mxu1 %v9654_v51  ;;  %v9627_v51 = vld [vmem:[#allocation15 + $0x44c] ss:$16 sps:$4 sm:$0xff]   ;;  %v9625_v28 = vld [vmem:[#allocation15 + $0x448] ss:$16 sps:$4 sm:$0xff]  }
 0x59b   :  { %v5110_v58 = vadd.f32 %v8321_v9, %v10589_v12  ;;  %v9676_v12 = vld [vmem:[#allocation15 + $0x560] ss:$16 sps:$4 sm:$0xff]   ;;  %v9633_v54 = vld [vmem:[#allocation15 + $0x46c] ss:$16 sps:$4 sm:$0xff]   ;;  %v9637_v32 = vld [vmem:[#allocation15 + $0x488] ss:$16 sps:$4 sm:$0xff]  }
 0x59c   :  { %6767 = vmatpush1.bf16.msra.mxu0 %v9580_v3  ;;  %v9631_v3 = vld [vmem:[#allocation15 + $0x468] ss:$16 sps:$4 sm:$0xff]   ;;  %v9639_v9 = vld [vmem:[#allocation15 + $0x48c] ss:$16 sps:$4 sm:$0xff]  }
 0x59d   :  { %6768 = vmatprep.subr.bf16.mxu0 %v9585_v55  ;;  %6646 = vmatpush1.bf16.msra.mxu1 %v9652_v56  ;;  %v9645_v55 = vld [vmem:[#allocation15 + $0x4ac] ss:$16 sps:$4 sm:$0xff]   ;;  %v9643_v56 = vld [vmem:[#allocation15 + $0x4a8] ss:$16 sps:$4 sm:$0xff]  }
 0x59e   :  { %6647 = vmatprep.subr.bf16.mxu1 %v9660_v62  ;;  %v9649_v57 = vld [vmem:[#allocation15 + $0x4c8] ss:$16 sps:$4 sm:$0xff]   ;;  %v9657_v62 = vld [vmem:[#allocation15 + $0x4ec] ss:$16 sps:$4 sm:$0xff]  }
 0x5a0   :  { %6769 = vmatpush1.bf16.msra.mxu0 %v9583_v59  ;;  %v9663_v59 = vld [vmem:[#allocation15 + $0x50c] ss:$16 sps:$4 sm:$0xff]  }
 0x5a1   :  { %6770 = vmatprep.subr.bf16.mxu0 %v9588_v20  ;;  %6648 = vmatpush1.bf16.msra.mxu1 %v9658_v52  ;;  %v9661_v20 = vld [vmem:[#allocation15 + $0x508] ss:$16 sps:$4 sm:$0xff]   ;;  %v9669_v52 = vld [vmem:[#allocation15 + $0x52c] ss:$16 sps:$4 sm:$0xff]  }
 0x5a2   :  { %6649 = vmatprep.subr.bf16.mxu1 %v9666_v60  ;;  %v9667_v60 = vld [vmem:[#allocation15 + $0x528] ss:$16 sps:$4 sm:$0xff]  }
 0x5a4   :  { %6771 = vmatpush1.bf16.msra.mxu0 %v9586_v61  ;;  %v9675_v61 = vld [vmem:[#allocation15 + $0x54c] ss:$16 sps:$4 sm:$0xff]  }
 0x5a5   :  { %6772 = vmatprep.subr.bf16.mxu0 %v9591_v63  ;;  %6650 = vmatpush1.bf16.msra.mxu1 %v9664_v16  ;;  %v9673_v63 = vld [vmem:[#allocation15 + $0x548] ss:$16 sps:$4 sm:$0xff]   ;;  %v9681_v16 = vld [vmem:[#allocation15 + $0x56c] ss:$16 sps:$4 sm:$0xff]  }
 0x5a6   :  { %6651 = vmatprep.subr.bf16.mxu1 %v9672_v1  ;;  %v9679_v1 = vld [vmem:[#allocation15 + $0x568] ss:$16 sps:$4 sm:$0xff]  }
 0x5a8   :  { %6773 = vmatpush1.bf16.msra.mxu0 %v9589_v5  ;;  %v9687_v5 = vld [vmem:[#allocation15 + $0x58c] ss:$16 sps:$4 sm:$0xff]  }
 0x5a9   :  { %6774 = vmatprep.subr.bf16.mxu0 %v9594_v6  ;;  %6652 = vmatpush1.bf16.msra.mxu1 %v9670_v34  ;;  %v9685_v6 = vld [vmem:[#allocation15 + $0x588] ss:$16 sps:$4 sm:$0xff]   ;;  %v9693_v34 = vld [vmem:[#allocation15 + $0x5ac] ss:$16 sps:$4 sm:$0xff]  }
 0x5aa   :  { %6653 = vmatprep.subr.bf16.mxu1 %v9678_v38  ;;  %v9691_v38 = vld [vmem:[#allocation15 + $0x5a8] ss:$16 sps:$4 sm:$0xff]  }
 0x5ac   :  { %6775 = vmatpush1.bf16.msra.mxu0 %v9592_v8  ;;  %v9699_v8 = vld [vmem:[#allocation15 + $0x5cc] ss:$16 sps:$4 sm:$0xff]  }
 0x5ad   :  { %6776 = vmatprep.subr.bf16.mxu0 %v9597_v11  ;;  %6654 = vmatpush1.bf16.msra.mxu1 %v9676_v12  ;;  %v9697_v11 = vld [vmem:[#allocation15 + $0x5c8] ss:$16 sps:$4 sm:$0xff]   ;;  %v9705_v12 = vld [vmem:[#allocation15 + $0x5ec] ss:$16 sps:$4 sm:$0xff]  }
 0x5ae   :  { %6655 = vmatprep.subr.bf16.mxu1 %v9684_v13  ;;  %v9703_v13 = vld [vmem:[#allocation15 + $0x5e8] ss:$16 sps:$4 sm:$0xff]  }
 0x5b0   :  { %6777 = vmatpush1.bf16.msra.mxu0 %v9595_v14  ;;  %v9711_v14 = vld [vmem:[#allocation15 + $0x60c] ss:$16 sps:$4 sm:$0xff]  }
 0x5b1   :  { %6778 = vmatprep.subr.bf16.mxu0 %v9600_v17  ;;  %6656 = vmatpush1.bf16.msra.mxu1 %v9682_v15  ;;  %v2471_v17 = vrot.slane %v10563_v7, %v767_v10  ;;  %v2475_v15 = vrot.slane %v10563_v7, %v771_v23  ;;  %v9712_v23 = vld [vmem:[#allocation15 + $0x620] ss:$16 sps:$4 sm:$0xff]   ;;  %v9715_v7 = vld [vmem:[#allocation15 + $0x628] ss:$16 sps:$4 sm:$0xff]  }
 0x5b2   :  { %6657 = vmatprep.subr.bf16.mxu1 %v9690_v21 }
 0x5b4   :  { %6779 = vmatpush1.bf16.msra.mxu0 %v9598_v22 }
 0x5b5   :  { %6780 = vmatprep.subr.bf16.mxu0 %v9603_v24  ;;  %6658 = vmatpush1.bf16.msra.mxu1 %v9688_v41 }
 0x5b6   :  { %6659 = vmatprep.subr.bf16.mxu1 %v9696_v53 }
 0x5b7   :  { %v5149_v31 = vpop.f32.mrb[28].mxu1 }
 0x5b8   :  { %v10597_v33 = vadd.f32 %v5149_v31, %v5110_v58  ;;  %v8451_v36 = vpop.f32.mrb[29].mxu1  ;;  %6781 = vmatpush1.bf16.msra.mxu0 %v9601_v26  ;;  %v9655_v58 = vld [vmem:[#allocation15 + $0x4e8] ss:$16 sps:$4 sm:$0xff]  }
 0x5b9   :  { %v5152_v35 = vpop.f32.mrb[30].mxu1  ;;  %6782 = vmatprep.subr.bf16.mxu0 %v9606_v27  ;;  %6660 = vmatpush1.bf16.msra.mxu1 %v9694_v2 }
 0x5ba   :  { %v8452_v25 = vpop.f32.mrb[31].mxu1  ;;  %6661 = vmatprep.subr.bf16.mxu1 %v9702_v30  ;;  %v9709_v35 = vld [vmem:[#allocation15 + $0x608] ss:$16 sps:$4 sm:$0xff]   ;;  %vm5161_vm4 = vcmp.gt.f32.partialorder %v10597_v33, 0.0 }
 0x5bb   :  { %v9723_v25 = vld [vmem:[#allocation15 + $0x64c] ss:$16 sps:$4 sm:$0xff]  }
 0x5bc   :  { %6783 = vmatpush1.bf16.msra.mxu0 %v9604_v45  ;;  %v9706_v45 = vld [vmem:[#allocation15 + $0x600] ss:$16 sps:$4 sm:$0xff]  }
 0x5bd   :  { %6784 = vmatprep.subr.bf16.mxu0 %v9609_v49  ;;  %6662 = vmatpush1.bf16.msra.mxu1 %v9700_v37  ;;  %v9714_v49 = vld [vmem:[#allocation15 + $0x624] ss:$16 sps:$4 sm:$0xff]  }
 0x5be   :  { %6672 = vmatprep.subr.bf16.mxu1 %v9708_v39  ;;  %v9720_v37 = vld [vmem:[#allocation15 + $0x644] ss:$16 sps:$4 sm:$0xff]   ;;  %v9718_v39 = vld [vmem:[#allocation15 + $0x640] ss:$16 sps:$4 sm:$0xff]  }
 0x5c0   :  { %6785 = vmatpush1.bf16.msra.mxu0 %v9607_v40  ;;  %v9721_v40 = vld [vmem:[#allocation15 + $0x648] ss:$16 sps:$4 sm:$0xff]  }
 0x5c1   :  { %6795 = vmatprep.subr.bf16.mxu0 %v9615_v42  ;;  %v9726_v42 = vld [vmem:[#allocation15 + $0x664] ss:$16 sps:$4 sm:$0xff]  }
 0x5c3   :  { %6787 = vmatmul.mubr.bf16.vlgmr.msra.gmra.mrb[28].mxu0 %v10591_v19  ;;  %v9651_v19 = vld [vmem:[#allocation15 + $0x4cc] ss:$16 sps:$4 sm:$0xff]  }
 0x5c4   :  { %6796 = vmatpush1.bf16.msra.mxu0 %v9613_v47  ;;  %v9729_v47 = vld [vmem:[#allocation15 + $0x66c] ss:$16 sps:$4 sm:$0xff]  }
 0x5c5   :  { %6797 = vmatprep.subr.bf16.mxu0 %v9621_v48  ;;  %v9724_v48 = vld [vmem:[#allocation15 + $0x660] ss:$16 sps:$4 sm:$0xff]  }
 0x5c8   :  { %6798 = vmatpush1.bf16.msra.mxu0 %v9619_v50  ;;  %v9727_v50 = vld [vmem:[#allocation15 + $0x668] ss:$16 sps:$4 sm:$0xff]  }
 0x5c9   :  { %6799 = vmatprep.subr.bf16.mxu0 %v9627_v51  ;;  %v9732_v51 = vld [vmem:[#allocation15 + $0x684] ss:$16 sps:$4 sm:$0xff]  }
 0x5cc   :  { %6800 = vmatpush1.bf16.msra.mxu0 %v9625_v28  ;;  %v9735_v28 = vld [vmem:[#allocation15 + $0x68c] ss:$16 sps:$4 sm:$0xff]  }
 0x5cd   :  { %6801 = vmatprep.subr.bf16.mxu0 %v9633_v54  ;;  %v9730_v54 = vld [vmem:[#allocation15 + $0x680] ss:$16 sps:$4 sm:$0xff]  }
 0x5d0   :  { %6802 = vmatpush1.bf16.msra.mxu0 %v9631_v3  ;;  %v9738_v3 = vld [vmem:[#allocation15 + $0x6a4] ss:$16 sps:$4 sm:$0xff]  }
 0x5d1   :  { %6803 = vmatprep.subr.bf16.mxu0 %v9639_v9  ;;  %v9741_v9 = vld [vmem:[#allocation15 + $0x6ac] ss:$16 sps:$4 sm:$0xff]  }
 0x5d4   :  { %6804 = vmatpush1.bf16.msra.mxu0 %v9637_v32  ;;  %v9736_v32 = vld [vmem:[#allocation15 + $0x6a0] ss:$16 sps:$4 sm:$0xff]  }
 0x5d5   :  { %6805 = vmatprep.subr.bf16.mxu0 %v9645_v55  ;;  %v9739_v55 = vld [vmem:[#allocation15 + $0x6a8] ss:$16 sps:$4 sm:$0xff]  }
 0x5d8   :  { %6806 = vmatpush1.bf16.msra.mxu0 %v9643_v56  ;;  %v9744_v56 = vld [vmem:[#allocation15 + $0x6c4] ss:$16 sps:$4 sm:$0xff]  }
 0x5d9   :  { %6807 = vmatprep.subr.bf16.mxu0 %v9651_v19  ;;  %v9747_v19 = vld [vmem:[#allocation15 + $0x6cc] ss:$16 sps:$4 sm:$0xff]  }
 0x5dc   :  { %6808 = vmatpush1.bf16.msra.mxu0 %v9649_v57  ;;  %v9742_v57 = vld [vmem:[#allocation15 + $0x6c0] ss:$16 sps:$4 sm:$0xff]  }
 0x5dd   :  { %6809 = vmatprep.subr.bf16.mxu0 %v9657_v62  ;;  %v9745_v62 = vld [vmem:[#allocation15 + $0x6c8] ss:$16 sps:$4 sm:$0xff]  }
 0x5e0   :  { %6810 = vmatpush1.bf16.msra.mxu0 %v9655_v58  ;;  %v9750_v58 = vld [vmem:[#allocation15 + $0x6e4] ss:$16 sps:$4 sm:$0xff]  }
 0x5e1   :  { %6811 = vmatprep.subr.bf16.mxu0 %v9663_v59  ;;  %v9753_v59 = vld [vmem:[#allocation15 + $0x6ec] ss:$16 sps:$4 sm:$0xff]  }
 0x5e4   :  { %6812 = vmatpush1.bf16.msra.mxu0 %v9661_v20  ;;  %v5168_v20 = vmul.f32 0.01, %v10597_v33 }
 0x5e5   :  { %6813 = vmatprep.subr.bf16.mxu0 %v9669_v52  ;;  %v9748_v52 = vld [vmem:[#allocation15 + $0x6e0] ss:$16 sps:$4 sm:$0xff]  }
 0x5e8   :  { %6814 = vmatpush1.bf16.msra.mxu0 %v9667_v60  ;;  %v9751_v60 = vld [vmem:[#allocation15 + $0x6e8] ss:$16 sps:$4 sm:$0xff]  }
 0x5e9   :  { %6815 = vmatprep.subr.bf16.mxu0 %v9675_v61  ;;  %v9754_v61 = vld [vmem:[#allocation18 + $0x40] sm:$0xff]  }
 0x5ec   :  { %6816 = vmatpush1.bf16.msra.mxu0 %v9673_v63  ;;  %v5175_v63 = vsel %vm5161_vm4, %v10597_v33, %v5168_v20  ;;  %v9762_v33 = vld [vmem:[#allocation18 + $0x60] sm:$0xff]  }
 0x5ed   :  { %6817 = vmatprep.subr.bf16.mxu0 %v9681_v16  ;;  %v9755_v16 = vld [vmem:[#allocation18] sm:$0xff]  }
 0x5f0   :  { %6818 = vmatpush1.bf16.msra.mxu0 %v9679_v1  ;;  %v5407_v1 = vpack.c.bf16 %v5175_v63, %v5175_v63  ;;  %v9787_v63 = vld [vmem:[#allocation21 + $0x8] sm:$0xff]  }
 0x5f1   :  { %6819 = vmatprep.subr.bf16.mxu0 %v9687_v5  ;;  %v9756_v5 = vld [vmem:[#allocation18 + $0x48] sm:$0xff]  }
 0x5f4   :  { %6820 = vmatpush1.bf16.msra.mxu0 %v9685_v6  ;;  %v9757_v6 = vld [vmem:[#allocation18 + $0x8] sm:$0xff]  }
 0x5f5   :  { %6821 = vmatprep.subr.bf16.mxu0 %v9693_v34  ;;  %v9758_v34 = vld [vmem:[#allocation18 + $0x50] sm:$0xff]  }
 0x5f8   :  { %6822 = vmatpush1.bf16.msra.mxu0 %v9691_v38  ;;  %v9759_v38 = vld [vmem:[#allocation18 + $0x10] sm:$0xff]  }
 0x5f9   :  { %6823 = vmatprep.subr.bf16.mxu0 %v9699_v8  ;;  %v9760_v8 = vld [vmem:[#allocation18 + $0x58] sm:$0xff]  }
 0x5fc   :  { %6824 = vmatpush1.bf16.msra.mxu0 %v9697_v11  ;;  %v9761_v11 = vld [vmem:[#allocation18 + $0x18] sm:$0xff]  }
 0x5fd   :  { %6825 = vmatprep.subr.bf16.mxu0 %v9705_v12  ;;  %v9763_v12 = vld [vmem:[#allocation18 + $0x20] sm:$0xff]  }
 0x600   :  { %6826 = vmatpush1.bf16.msra.mxu0 %v9703_v13  ;;  %v9764_v13 = vld [vmem:[#allocation18 + $0x68] sm:$0xff]  }
 0x601   :  { %6836 = vmatprep.subr.bf16.mxu0 %v9711_v14  ;;  %v9765_v14 = vld [vmem:[#allocation18 + $0x28] sm:$0xff]  }
 0x616   :  { %v4988_v21 = vpop.f32.mrb[24].mxu0 }
 0x617   :  { %v8483_v22 = vadd.f32 %v4988_v21, %v2471_v17  ;;  %v4990_v24 = vpop.f32.mrb[25].mxu0  ;;  %v9766_v17 = vld [vmem:[#allocation18 + $0x70] sm:$0xff]   ;;  %v9768_v21 = vld [vmem:[#allocation18 + $0x78] sm:$0xff]  }
 0x618   :  { %v8484_v41 = vadd.f32 %v4990_v24, %v2475_v15  ;;  %v4992_v53 = vpop.f32.mrb[26].mxu0  ;;  %v9767_v15 = vld [vmem:[#allocation18 + $0x30] sm:$0xff]   ;;  %v9770_v24 = vld [vmem:[#allocation18 + $0xc0] sm:$0xff]  }
 0x619   :  { %vm5159_vm2 = vcmp.gt.f32.partialorder %v8483_v22, 0.0  ;;  %v5166_v26 = vmul.f32 0.01, %v8483_v22  ;;  %v4993_v27 = vpop.f32.mrb[27].mxu0 }
 0x61a   :  { %vm5160_vm3 = vcmp.gt.f32.partialorder %v8484_v41, 0.0  ;;  %v5167_v2 = vmul.f32 0.01, %v8484_v41 }
 0x61b   :  { %v5173_v30 = vsel %vm5159_vm2, %v8483_v22, %v5166_v26  ;;  %v9769_v22 = vld [vmem:[#allocation18 + $0x38] sm:$0xff]  }
 0x61c   :  { %v5174_v31 = vsel %vm5160_vm3, %v8484_v41, %v5167_v2  ;;  %v5405_v10 = vpack.c.bf16 %v5173_v30, %v5173_v30  ;;  %v5400_v41 = vld [vmem:[#allocation16] sm:$0xf] }
 0x61d   :  { %v5406_v36 = vpack.c.bf16 %v5174_v31, %v5174_v31  ;;  %v5412_v53 = vrot.slane %v5400_v41, %v10420_v44  ;;  %v5416_v26 = vrot.slane %v5400_v41, %v10425_v46  ;;  %v5424_v27 = vrot.slane %v5400_v41, %v10473_v4 }
 0x61f   :  { %6663 = vmatprep.mubr.bf16.mxu1 %v5406_v36  ;;  %6827 = vmatprep.mubr.bf16.mxu0 %v5406_v36 }
 0x620   :  { %6664 = vmatmul.mubr.bf16.vlgmr.msra.gmra.mrb[32].mxu1 %v5405_v10  ;;  %6828 = vmatmul.mubr.bf16.vlgmr.msra.gmra.mrb[28].mxu0 %v5405_v10 }
 0x621   :  { %6673 = vmatpush1.bf16.msra.mxu1 %v9706_v45  ;;  %6837 = vmatpush1.bf16.msra.mxu0 %v9709_v35 }
 0x622   :  { %6674 = vmatprep.subr.bf16.mxu1 %v9714_v49  ;;  %6838 = vmatprep.subr.bf16.mxu0 %v9717_v43 }
 0x623   :  { %6704 = vmatprep.mubr.bf16.mxu1 %v10144_v29  ;;  %6868 = vmatprep.mubr.bf16.mxu0 %v10144_v29  ;;  %v9733_v29 = vld [vmem:[#allocation15 + $0x688] ss:$16 sps:$4 sm:$0xff]  }
 0x625   :  { %6675 = vmatpush1.bf16.msra.mxu1 %v9712_v23  ;;  %6839 = vmatpush1.bf16.msra.mxu0 %v9715_v7 }
 0x626   :  { %6676 = vmatprep.subr.bf16.mxu1 %v9720_v37  ;;  %6840 = vmatprep.subr.bf16.mxu0 %v9723_v25 }
 0x629   :  { %6677 = vmatpush1.bf16.msra.mxu1 %v9718_v39  ;;  %6841 = vmatpush1.bf16.msra.mxu0 %v9721_v40 }
 0x62a   :  { %6678 = vmatprep.subr.bf16.mxu1 %v9726_v42  ;;  %6842 = vmatprep.subr.bf16.mxu0 %v9729_v47  ;;  %v9771_v42 = vld [vmem:[#allocation18 + $0x80] sm:$0xff]  }
 0x62d   :  { %6679 = vmatpush1.bf16.msra.mxu1 %v9724_v48  ;;  %6843 = vmatpush1.bf16.msra.mxu0 %v9727_v50  ;;  %v9772_v48 = vld [vmem:[#allocation18 + $0xc8] sm:$0xff]  }
 0x62e   :  { %6680 = vmatprep.subr.bf16.mxu1 %v9732_v51  ;;  %6844 = vmatprep.subr.bf16.mxu0 %v9735_v28  ;;  %v9773_v51 = vld [vmem:[#allocation18 + $0x88] sm:$0xff]   ;;  %v9774_v28 = vld [vmem:[#allocation18 + $0xd0] sm:$0xff]  }
 0x631   :  { %6681 = vmatpush1.bf16.msra.mxu1 %v9730_v54  ;;  %6845 = vmatpush1.bf16.msra.mxu0 %v9733_v29  ;;  %v9775_v54 = vld [vmem:[#allocation18 + $0x90] sm:$0xff]   ;;  %v9776_v29 = vld [vmem:[#allocation18 + $0xd8] sm:$0xff]  }
 0x632   :  { %6682 = vmatprep.subr.bf16.mxu1 %v9738_v3  ;;  %6846 = vmatprep.subr.bf16.mxu0 %v9741_v9  ;;  %v9777_v3 = vld [vmem:[#allocation18 + $0x98] sm:$0xff]   ;;  %v9778_v9 = vld [vmem:[#allocation18 + $0xe0] sm:$0xff]  }
 0x635   :  { %6683 = vmatpush1.bf16.msra.mxu1 %v9736_v32  ;;  %6847 = vmatpush1.bf16.msra.mxu0 %v9739_v55  ;;  %v9779_v32 = vld [vmem:[#allocation18 + $0xa0] sm:$0xff]   ;;  %v9780_v55 = vld [vmem:[#allocation18 + $0xe8] sm:$0xff]  }
 0x636   :  { %6684 = vmatprep.subr.bf16.mxu1 %v9744_v56  ;;  %6848 = vmatprep.subr.bf16.mxu0 %v9747_v19  ;;  %v5420_v56 = vrot.slane %v5400_v41, %v10444_v18  ;;  %v9781_v19 = vld [vmem:[#allocation18 + $0xa8] sm:$0xff]  }
 0x637   :  { %v9786_v18 = vld [vmem:[#allocation21] sm:$0xff]  }
 0x639   :  { %6685 = vmatpush1.bf16.msra.mxu1 %v9742_v57  ;;  %6849 = vmatpush1.bf16.msra.mxu0 %v9745_v62  ;;  %v9782_v57 = vld [vmem:[#allocation18 + $0xf0] sm:$0xff]  }
 0x63a   :  { %6686 = vmatprep.subr.bf16.mxu1 %v9750_v58  ;;  %6850 = vmatprep.subr.bf16.mxu0 %v9753_v59  ;;  %v9783_v58 = vld [vmem:[#allocation18 + $0xb0] sm:$0xff]   ;;  %v9784_v59 = vld [vmem:[#allocation18 + $0xf8] sm:$0xff]  }
 0x63d   :  { %6687 = vmatpush1.bf16.msra.mxu1 %v9748_v52  ;;  %6851 = vmatpush1.bf16.msra.mxu0 %v9751_v60  ;;  %v9785_v52 = vld [vmem:[#allocation18 + $0xb8] sm:$0xff]  }
 0x63e   :  { %8334 = vmatprep.subr.bf16.mxu1 %v9754_v61 }
 0x640   :  { %6705 = vmatmul.mubr.bf16.vlgmr.msra.gmra.mrb[32].mxu1 %v5407_v1  ;;  %6869 = vmatmul.mubr.bf16.vlgmr.msra.gmra.mrb[28].mxu0 %v5407_v1  ;;  %v9789_v1 = vld [vmem:[#allocation21 + $0x18] sm:$0xff]  }
 0x641   :  { %8335 = vmatpush3.bf16.msra.mxu1 %v9755_v16  ;;  %v9788_v16 = vld [vmem:[#allocation21 + $0x10] sm:$0xff]  }
 0x642   :  { %8336 = vmatprep.subr.bf16.mxu1 %v9756_v5  ;;  %v9790_v5 = vld [vmem:[#allocation21 + $0x20] sm:$0xff]  }
 0x645   :  { %8337 = vmatpush3.bf16.msra.mxu1 %v9757_v6  ;;  %v9791_v6 = vld [vmem:[#allocation21 + $0x28] sm:$0xff]  }
 0x646   :  { %8338 = vmatprep.subr.bf16.mxu1 %v9758_v34  ;;  %v9792_v34 = vld [vmem:[#allocation21 + $0x30] sm:$0xff]  }
 0x649   :  { %8339 = vmatpush3.bf16.msra.mxu1 %v9759_v38  ;;  %v9793_v38 = vld [vmem:[#allocation21 + $0x38] sm:$0xff]  }
 0x64a   :  { %8340 = vmatprep.subr.bf16.mxu1 %v9760_v8 }
 0x64d   :  { %8341 = vmatpush3.bf16.msra.mxu1 %v9761_v11 }
 0x64e   :  { %8342 = vmatprep.subr.bf16.mxu1 %v9762_v33 }
 0x651   :  { %8343 = vmatpush3.bf16.msra.mxu1 %v9763_v12 }
 0x652   :  { %8344 = vmatprep.subr.bf16.mxu1 %v9764_v13 }
 0x655   :  { %8345 = vmatpush3.bf16.msra.mxu1 %v9765_v14  ;;  %v8175_v14 = vld [vmem:[#allocation19] ss:$0 sm:$0xff] }
 0x656   :  { %8346 = vmatprep.subr.bf16.mxu1 %v9766_v17 }
 0x659   :  { %8347 = vmatpush3.bf16.msra.mxu1 %v9767_v15 }
 0x65a   :  { %8348 = vmatprep.subr.bf16.mxu1 %v9768_v21 }
 0x65d   :  { %8349 = vmatpush3.bf16.msra.mxu1 %v9769_v22 }
 0x65e   :  { %8356 = vmatprep.subr.bf16.mxu1 %v9770_v24 }
 0x713   :  { %v6706_v2 = vpop.f32.mrb[32].mxu1  ;;  %v6870_v30 = vpop.f32.mrb[28].mxu0 }
 0x714   :  { %v8485_v31 = vadd.f32 %v6706_v2, %v5412_v53  ;;  %v6708_v36 = vpop.f32.mrb[33].mxu1  ;;  %v6872_v45 = vpop.f32.mrb[29].mxu0  ;;  %v8487_v62 = vadd.f32 %v6870_v30, %v5420_v56 }
 0x715   :  { %v8486_v35 = vadd.f32 %v6708_v36, %v5416_v26  ;;  %v8488_v10 = vadd.f32 %v6872_v45, %v5424_v27  ;;  %v6710_v49 = vpop.f32.mrb[34].mxu1  ;;  %v6874_v43 = vpop.f32.mrb[30].mxu0 }
 0x716   :  { %vm6877_vm5 = vcmp.gt.f32.partialorder %v8485_v31, 0.0  ;;  %v6881_v23 = vmul.f32 0.01, %v8485_v31  ;;  %v6711_v25 = vpop.f32.mrb[35].mxu1  ;;  %v6875_v46 = vpop.f32.mrb[31].mxu0  ;;  %vm6879_vm8 = vcmp.gt.f32.partialorder %v8487_v62, 0.0 }
 0x717   :  { %vm6878_vm6 = vcmp.gt.f32.partialorder %v8486_v35, 0.0  ;;  %v6882_v7 = vmul.f32 0.01, %v8486_v35  ;;  %vm6880_vm7 = vcmp.gt.f32.partialorder %v8488_v10, 0.0  ;;  %v6884_v37 = vmul.f32 0.01, %v8488_v10 }
 0x718   :  { %v6885_v44 = vsel %vm6877_vm5, %v8485_v31, %v6881_v23  ;;  %v6883_v20 = vmul.f32 0.01, %v8487_v62 }
 0x719   :  { %v6886_v39 = vsel %vm6878_vm6, %v8486_v35, %v6882_v7  ;;  %v6888_v4 = vsel %vm6880_vm7, %v8488_v10, %v6884_v37  ;;  %v6954_v47 = vpack.c.bf16 %v6885_v44, %v6885_v44 }
 0x71a   :  { %v6955_v40 = vpack.c.bf16 %v6886_v39, %v6886_v39  ;;  %v6957_v50 = vpack.c.bf16 %v6888_v4, %v6888_v4  ;;  %v6887_v60 = vsel %vm6879_vm8, %v8487_v62, %v6883_v20 }
 0x71b   :  { %v6956_v61 = vpack.c.bf16 %v6887_v60, %v6887_v60 }
 0x71c   :  { %7188 = vmatprep.mubr.bf16.mxu1 %v6955_v40 }
 0x71d   :  { %7189 = vmatmul.mubr.bf16.vlgmr.msra.gmra.mrb[36].mxu1 %v6954_v47 }
 0x71e   :  { %8357 = vmatpush3.bf16.msra.mxu1 %v9771_v42  ;;  %7228 = vmatprep.mubr.bf16.mxu1 %v6957_v50 }
 0x71f   :  { %8358 = vmatprep.subr.bf16.mxu1 %v9772_v48 }
 0x722   :  { %8359 = vmatpush3.bf16.msra.mxu1 %v9773_v51 }
 0x723   :  { %8360 = vmatprep.subr.bf16.mxu1 %v9774_v28 }
 0x726   :  { %8361 = vmatpush3.bf16.msra.mxu1 %v9775_v54 }
 0x727   :  { %8362 = vmatprep.subr.bf16.mxu1 %v9776_v29 }
 0x72a   :  { %8363 = vmatpush3.bf16.msra.mxu1 %v9777_v3 }
 0x72b   :  { %8364 = vmatprep.subr.bf16.mxu1 %v9778_v9 }
 0x72e   :  { %8365 = vmatpush3.bf16.msra.mxu1 %v9779_v32 }
 0x72f   :  { %8366 = vmatprep.subr.bf16.mxu1 %v9780_v55 }
 0x732   :  { %8367 = vmatpush3.bf16.msra.mxu1 %v9781_v19 }
 0x733   :  { %8368 = vmatprep.subr.bf16.mxu1 %v9782_v57 }
 0x736   :  { %8369 = vmatpush3.bf16.msra.mxu1 %v9783_v58 }
 0x737   :  { %8370 = vmatprep.subr.bf16.mxu1 %v9784_v59 }
 0x73a   :  { %8371 = vmatpush3.bf16.msra.mxu1 %v9785_v52 }
 0x73b   :  { %8453 = vmatprep.subr.bf16.mxu1 %v10142_v0 }
 0x73d   :  { %7229 = vmatmul.mubr.bf16.vlgmr.msra.gmra.mrb[40].mxu1 %v6956_v61 }
 0x73e   :  { %8469 = vmatprep.mubr.msk.bf16.mxu1 %vm10143_vm0, %v10142_v0  ;;  %8454 = vmatpush3.bf16.msra.mxu1 %v9786_v18 }
 0x73f   :  { %8455 = vmatprep.subr.bf16.mxu1 %v10142_v0 }
 0x742   :  { %8456 = vmatpush3.bf16.msra.mxu1 %v9787_v63 }
 0x743   :  { %8457 = vmatprep.subr.bf16.mxu1 %v10142_v0 }
 0x746   :  { %8458 = vmatpush3.bf16.msra.mxu1 %v9788_v16 }
 0x747   :  { %8459 = vmatprep.subr.bf16.mxu1 %v10142_v0 }
 0x74a   :  { %8460 = vmatpush3.bf16.msra.mxu1 %v9789_v1 }
 0x74b   :  { %8461 = vmatprep.subr.bf16.mxu1 %v10142_v0 }
 0x74e   :  { %8462 = vmatpush3.bf16.msra.mxu1 %v9790_v5 }
 0x74f   :  { %8463 = vmatprep.subr.bf16.mxu1 %v10142_v0 }
 0x752   :  { %8464 = vmatpush3.bf16.msra.mxu1 %v9791_v6 }
 0x753   :  { %8465 = vmatprep.subr.bf16.mxu1 %v10142_v0 }
 0x756   :  { %8466 = vmatpush3.bf16.msra.mxu1 %v9792_v34 }
 0x757   :  { %8467 = vmatprep.subr.bf16.mxu1 %v10142_v0  ;;  %v8208_v0 = vld [vmem:[#allocation22] ss:$0 sm:$0xff] }
 0x75a   :  { %8468 = vmatpush3.bf16.msra.mxu1 %v9793_v38 }
 0x7f0   :  { %v8350_v8 = vpop.f32.mrb[36].mxu1 }
 0x7f1   :  { %v8351_v11 = vpop.f32.mrb[37].mxu1 }
 0x7f2   :  { %v8352_v33 = vadd.f32 %v8351_v11, %v8350_v8  ;;  %v8353_v12 = vpop.f32.mrb[38].mxu1 }
 0x7f3   :  { %v8354_v13 = vpop.f32.mrb[39].mxu1 }
 0x7f4   :  { %v7191_v21 = vadd.f32 %v8352_v33, %v8175_v14 }
 0x810   :  { %v8372_v17 = vpop.f32.mrb[40].mxu1 }
 0x811   :  { %v8373_v15 = vpop.f32.mrb[41].mxu1 }
 0x812   :  { %v8374_v22 = vadd.f32 %v8373_v15, %v8372_v17  ;;  %v8375_v24 = vpop.f32.mrb[42].mxu1 }
 0x813   :  { %v8376_v41 = vpop.f32.mrb[43].mxu1 }
 0x814   :  { %v7231_v53 = vadd.f32 %v8374_v22, %v7191_v21 }
 0x816   :  { %vm7236_vm0 = vcmp.gt.f32.partialorder %v7231_v53, 0.0  ;;  %v7237_v26 = vmul.f32 0.01, %v7231_v53 }
 0x818   :  { %v7238_v27 = vsel %vm7236_vm0, %v7231_v53, %v7237_v26 }
 0x819   :  { %v7256_v2 = vpack.c.bf16 %v7238_v27, %v7238_v27 }
 0x81b   :  { %8470 = vmatmul.mubr.bf16.vlgmr.msra.gmra.mrb[44].mxu1 %v7256_v2 }
 0x8ee   :  { %v7345_v30 = vpop.f32.mrb[44].mxu1 }
 0x8ef   :  { %v7346_v31 = vadd.f32 %v8208_v0, %v7345_v30  ;;  %v8471_v36 = vpop.f32.mrb[45].mxu1 }
 0x8f0   :  { %v7348_v45 = vpop.f32.mrb[46].mxu1 }
 0x8f1   :  { %7352 = vst.msk [vmem:[%s10643_s15] sm:$0xff] %vm7351_vm9, %v7346_v31  ;;  %v8472_v35 = vpop.f32.mrb[47].mxu1 }
 0x8f2   :  { %7357 = vsyncpa [#allocation3], 1 }
 0x8f3   :  { %7358 = vsyncpa [#allocation5], 1 }
 0x8f4   :  { %7359 = vsyncpa [#allocation8], 1 }
 0x8f5   :  { %7360 = vsyncpa [#allocation11], 1 }
 0x8f6   :  { %7361 = vsyncpa [#allocation14], 1 }
 0x8f7   :  { %7362 = vsyncpa [#allocation17], 1 }
 0x8f8   :  { %7363 = vsyncpa [#allocation20], 1 }
 0x8f9   :  { %7364 = vsyncpa [#allocation23], 1 }

</bundles_post_ra>
